<compile_context>
chip_gen: v7x
topology: tpu7x:2x2x1
jax: 0.10.0
libtpu: 0.0.40
codegen_flags: <defaults>
</compile_context>

<pallas_src>
import jax
import jax.numpy as jnp
from jax import lax
from jax.experimental import pallas as pl
from jax.experimental.pallas import tpu as pltpu

R1 = 40   # rows per example fed to conv1: 2 pad + 28 image + 2 pad + 8 spare zeros
R2 = 20   # row stride per example after pool1 (14 valid pooled rows + spare)


def _round_up(v, m):
    return ((v + m - 1) // m) * m


# ---------------------------------------------------------------------------
# Fused kernel (one batch tile per grid step)
# ---------------------------------------------------------------------------
def _lenet_kernel(x_ref, t1_ref, b1_ref, pw1_ref,
                  t2_ref, b2_ref, pw2_ref,
                  w3_ref, b3_ref, w4_ref, b4_ref, w5_ref, b5_ref,
                  o_ref, wbuf, pbuf, vbuf):
    f32, bf16 = jnp.float32, jnp.bfloat16
    tb = o_ref.shape[0]
    n1 = x_ref.shape[0]            # tb * R1
    l1 = n1 - 8                    # conv1 rows computed (last 8 spare rows dropped)
    l2 = tb * R2 - 4               # pool1 rows materialised
    la = tb * R2 - 8               # conv2 rows computed

    # ---- conv1: 5 banded bf16 matmuls (kernel row ki = sublane shift) ------
    acc1 = jnp.zeros((l1, 6 * 28), f32)
    for ki in range(5):
        xk = x_ref[pl.ds(ki, l1), :]                              # (l1, 32) bf16
        acc1 = acc1 + jnp.dot(xk, t1_ref[ki], preferred_element_type=f32)
    s1 = jax.nn.sigmoid(acc1 + b1_ref[...]).astype(bf16)          # (l1, 168)

    # ---- pool1: width via 0.25 block-diag matmul, height via strided pairs -
    wbuf[...] = jnp.dot(s1, pw1_ref[...], preferred_element_type=f32)
    pbuf[...] = (wbuf[pl.ds(0, l2, 2), :] +                       # rows 2q
                 wbuf[pl.ds(1, l2, 2), :])                        # rows 2q+1

    # ---- conv2: 5 banded bf16 matmuls over the pooled (14-wide) rows -------
    acc2 = jnp.zeros((la, 16 * 10), f32)
    for ki in range(5):
        ak = pbuf[pl.ds(ki, la), :].astype(bf16)                  # (la, 84)
        acc2 = acc2 + jnp.dot(ak, t2_ref[ki], preferred_element_type=f32)
    s2 = jax.nn.sigmoid(acc2 + b2_ref[...]).astype(bf16)          # (la, 160)

    # ---- pool2 width (0.25 matmul); height folded into the fc1 gather ------
    vbuf[...] = jnp.dot(s2, pw2_ref[...], preferred_element_type=f32)

    # ---- fc1: gather the 5 pooled rows per example -> one (tb,400) matmul --
    feat = []
    for qi in range(5):
        even = vbuf[pl.ds(2 * qi, tb, R2), :]                     # (tb, 80)
        odd = vbuf[pl.ds(2 * qi + 1, tb, R2), :]
        feat.append(even + odd)                                   # pool2 row qi
    feat = jnp.concatenate(feat, axis=1).astype(bf16)             # (tb, 400)
    h = jax.nn.sigmoid(jnp.dot(feat, w3_ref[...],
                               preferred_element_type=f32) + b3_ref[...])

    # ---- fc2 (bf16) + fc3 (f32 for accuracy) -------------------------------
    h = jax.nn.sigmoid(jnp.dot(h.astype(bf16), w4_ref[...],
                               preferred_element_type=f32) + b4_ref[...])
    out = jnp.dot(h, w5_ref[...], preferred_element_type=f32) + b5_ref[...]
    o_ref[...] = out.astype(o_ref.dtype)                          # (tb, 10)


def _const_spec(shape):
    zeros = (0,) * len(shape)
    return pl.BlockSpec(shape, lambda i: zeros)


def _lenet_pallas(x2d, prep, tb, bp):
    weights = [prep[k] for k in ("t1", "b1", "pw1", "t2", "b2", "pw2",
                                 "w3", "b3", "w4", "b4", "w5", "b5")]
    return pl.pallas_call(
        _lenet_kernel,
        out_shape=jax.ShapeDtypeStruct((bp, 10), jnp.float32),
        grid=(bp // tb,),
        in_specs=[pl.BlockSpec((tb * R1, 32), lambda i: (i, 0))]
                 + [_const_spec(w.shape) for w in weights],
        out_specs=pl.BlockSpec((tb, 10), lambda i: (i, 0)),
        scratch_shapes=[
            pltpu.VMEM((tb * R1 - 8, 84), jnp.float32),   # width-pooled conv1
            pltpu.VMEM((tb * R2 - 4, 84), jnp.float32),   # pool1 output
            pltpu.VMEM((tb * R2 - 8, 80), jnp.float32),   # width-pooled conv2
        ],
        compiler_params=pltpu.CompilerParams(
            dimension_semantics=("parallel",),
            vmem_limit_bytes=32 * 1024 * 1024),
    )(x2d, *weights)


# ---------------------------------------------------------------------------
# Parameters (PyTorch layouts) + one-time layout preparation
# ---------------------------------------------------------------------------
def init_params(key):
    def uni(k, shape, fan_in):
        bound = 1.0 / (fan_in ** 0.5)
        return jax.random.uniform(k, shape, jnp.float32, -bound, bound)

    ks = jax.random.split(key, 10)
    return {
        "conv1_w": uni(ks[0], (6, 1, 5, 5), 25),
        "conv1_b": uni(ks[1], (6,), 25),
        "conv2_w": uni(ks[2], (16, 6, 5, 5), 150),
        "conv2_b": uni(ks[3], (16,), 150),
        "fc1_w": uni(ks[4], (120, 400), 400),
        "fc1_b": uni(ks[5], (120,), 400),
        "fc2_w": uni(ks[6], (84, 120), 120),
        "fc2_b": uni(ks[7], (84,), 120),
        "fc3_w": uni(ks[8], (10, 84), 84),
        "fc3_b": uni(ks[9], (10,), 84),
    }


def prepare_params(p):
    """One-time weight re-layout / casting (outside the jitted forward)."""
    f32, bf16 = jnp.float32, jnp.bfloat16

    # conv1 banded weights: t1[ki, w, oc*28 + j] = conv1_w[oc,0,ki,w-j]
    eyes1 = jnp.stack([jnp.eye(32, 28, k=-kj, dtype=f32) for kj in range(5)])
    t1 = jnp.einsum("oab,bwj->awoj",
                    p["conv1_w"][:, 0].astype(f32), eyes1).reshape(5, 32, 168)

    # conv2 banded weights (over pooled 14-wide rows):
    # t2[ki, ic*14 + jq, oc*10 + j2] = conv2_w[oc,ic,ki,jq-j2]
    eyes2 = jnp.stack([jnp.eye(14, 10, k=-kj, dtype=f32) for kj in range(5)])
    t2 = jnp.einsum("oiak,kwj->aiwoj",
                    p["conv2_w"].astype(f32), eyes2).reshape(5, 84, 160)

    # 2x2 average-pool width matrices; 0.25 = both pooling halves folded in.
    def pool_mat(n):
        q = jnp.arange(n)
        m = jnp.zeros((2 * n, n), f32)
        return m.at[2 * q, q].set(0.25).at[2 * q + 1, q].set(0.25)
    pw1 = jnp.kron(jnp.eye(6, dtype=f32), pool_mat(14))       # (168, 84)
    pw2 = jnp.kron(jnp.eye(16, dtype=f32), pool_mat(5))       # (160, 80)

    # fc1 weights in the kernel's (qi, oc, qj) feature order.
    w3 = (p["fc1_w"].reshape(120, 16, 5, 5)
          .transpose(2, 1, 3, 0).reshape(400, 120))

    return {
        "t1": t1.astype(bf16),
        "b1": jnp.repeat(p["conv1_b"], 28).reshape(1, 168).astype(f32),
        "pw1": pw1.astype(bf16),
        "t2": t2.astype(bf16),
        "b2": jnp.repeat(p["conv2_b"], 10).reshape(1, 160).astype(f32),
        "pw2": pw2.astype(bf16),
        "w3": w3.astype(bf16),
        "b3": p["fc1_b"].reshape(1, 120).astype(f32),
        "w4": p["fc2_w"].T.astype(bf16),
        "b4": p["fc2_b"].reshape(1, 84).astype(f32),
        "w5": p["fc3_w"].T.astype(f32),
        "b5": p["fc3_b"].reshape(1, 10).astype(f32),
    }


# ---------------------------------------------------------------------------
# Forward pass (mirrors LeNet.forward)
# ---------------------------------------------------------------------------
def lenet_forward(prep, x, tb_max=128):
    # tb_max=128 works on all generations (~12 MB live VMEM per step); lower
    # it (e.g. 64) if targeting very tight VMEM budgets on v7x.
    x = x.reshape(-1, 28, 28).astype(jnp.float32)        # x.view(-1, 1, 28, 28)
    b = x.shape[0]
    tb = min(tb_max, _round_up(b, 8))
    bp = _round_up(b, tb)
    # pad: batch -> bp; height 28 -> R1 (2+28+2 conv pad + 8 spare zero rows);
    # width 28 -> 32 (conv1 padding=(2,2)).
    xp = jnp.pad(x, ((0, bp - b), (2, R1 - 30), (2, 2)))
    x2d = xp.astype(jnp.bfloat16).reshape(bp * R1, 32)
    out = _lenet_pallas(x2d, prep, tb, bp)
    return out[:b]


# ---------------------------------------------------------------------------
# Pure-JAX reference (numerical self-check)
# ---------------------------------------------------------------------------
def lenet_reference(params, x):
    x = x.reshape(-1, 1, 28, 28).astype(jnp.float32)
    dn = ("NCHW", "OIHW", "NCHW")
    y = lax.conv_general_dilated(x, params["conv1_w"], (1, 1),
                                 ((2, 2), (2, 2)), dimension_numbers=dn)
    y = jax.nn.sigmoid(y + params["conv1_b"].reshape(1, 6, 1, 1))
    y = lax.reduce_window(y, 0.0, lax.add, (1, 1, 2, 2), (1, 1, 2, 2), "VALID") * 0.25
    y = lax.conv_general_dilated(y, params["conv2_w"], (1, 1),
                                 ((0, 0), (0, 0)), dimension_numbers=dn)
    y = jax.nn.sigmoid(y + params["conv2_b"].reshape(1, 16, 1, 1))
    y = lax.reduce_window(y, 0.0, lax.add, (1, 1, 2, 2), (1, 1, 2, 2), "VALID") * 0.25
    y = y.reshape(y.shape[0], -1)
    y = jax.nn.sigmoid(y @ params["fc1_w"].T + params["fc1_b"])
    y = jax.nn.sigmoid(y @ params["fc2_w"].T + params["fc2_b"])
    return y @ params["fc3_w"].T + params["fc3_b"]


if __name__ == "__main__":
    key = jax.random.PRNGKey(0)
    pkey, xkey, xkey2 = jax.random.split(key, 3)
    params = init_params(pkey)
    prep = prepare_params(params)

    fwd = jax.jit(lenet_forward, static_argnames=("tb_max",))
    ref_fn = jax.jit(lenet_reference)

    # Small test matching the module's expected input.
    x = jax.random.normal(xkey, (2, 1, 28, 28), dtype=jnp.float32)
    out = jax.block_until_ready(fwd(prep, x))
    assert out.shape == (2, 10) and out.dtype == jnp.float32
    ref = jax.block_until_ready(ref_fn(params, x))
    err = float(jnp.max(jnp.abs(out - ref)))
    assert err < 8e-2, f"max abs error vs reference: {err}"

    # Second check exercising a multi-step ("parallel") grid + batch padding.
    x2 = jax.random.normal(xkey2, (20, 1, 28, 28), dtype=jnp.float32)
    out2 = jax.block_until_ready(fwd(prep, x2, tb_max=8))
    ref2 = jax.block_until_ready(ref_fn(params, x2))
    err2 = float(jnp.max(jnp.abs(out2 - ref2)))
    assert out2.shape == (20, 10)
    assert err2 < 8e-2, f"max abs error vs reference (grid>1): {err2}"

    print("KERNEL_OK")
</pallas_src>

<mosaic_0001>
module attributes {stable_mosaic.version = 11 : i64} {
  func.func @_lenet_kernel(%arg0: i32, %arg1: memref<320x32xbf16, #tpu.memory_space<vmem>>, %arg2: memref<5x32x168xbf16, #tpu.memory_space<vmem>>, %arg3: memref<1x168xf32, #tpu.memory_space<vmem>>, %arg4: memref<168x84xbf16, #tpu.memory_space<vmem>>, %arg5: memref<5x84x160xbf16, #tpu.memory_space<vmem>>, %arg6: memref<1x160xf32, #tpu.memory_space<vmem>>, %arg7: memref<160x80xbf16, #tpu.memory_space<vmem>>, %arg8: memref<400x120xbf16, #tpu.memory_space<vmem>>, %arg9: memref<1x120xf32, #tpu.memory_space<vmem>>, %arg10: memref<120x84xbf16, #tpu.memory_space<vmem>>, %arg11: memref<1x84xf32, #tpu.memory_space<vmem>>, %arg12: memref<84x10xf32, #tpu.memory_space<vmem>>, %arg13: memref<1x10xf32, #tpu.memory_space<vmem>>, %arg14: memref<8x10xf32, #tpu.memory_space<vmem>>, %arg15: memref<312x84xf32, #tpu.memory_space<vmem>>, %arg16: memref<156x84xf32, #tpu.memory_space<vmem>>, %arg17: memref<152x80xf32, #tpu.memory_space<vmem>>) attributes {dimension_semantics = [#tpu.dimension_semantics<parallel>], iteration_bounds = array<i64: 1>, scalar_prefetch = 0 : i64, scratch_operands = 3 : i64, tpu.core_type = #tpu.core_type<tc>, window_params = [{transform_indices = @transform_0, window_bounds = array<i64: 320, 32>}, {pipeline_mode = #tpu.pipeline_mode<synchronous>, transform_indices = @transform_1, window_bounds = array<i64: 5, 32, 168>}, {pipeline_mode = #tpu.pipeline_mode<synchronous>, transform_indices = @transform_2, window_bounds = array<i64: 1, 168>}, {pipeline_mode = #tpu.pipeline_mode<synchronous>, transform_indices = @transform_3, window_bounds = array<i64: 168, 84>}, {pipeline_mode = #tpu.pipeline_mode<synchronous>, transform_indices = @transform_4, window_bounds = array<i64: 5, 84, 160>}, {pipeline_mode = #tpu.pipeline_mode<synchronous>, transform_indices = @transform_5, window_bounds = array<i64: 1, 160>}, {pipeline_mode = #tpu.pipeline_mode<synchronous>, transform_indices = @transform_6, window_bounds = array<i64: 160, 80>}, {pipeline_mode = #tpu.pipeline_mode<synchronous>, transform_indices = @transform_7, window_bounds = array<i64: 400, 120>}, {pipeline_mode = #tpu.pipeline_mode<synchronous>, transform_indices = @transform_8, window_bounds = array<i64: 1, 120>}, {pipeline_mode = #tpu.pipeline_mode<synchronous>, transform_indices = @transform_9, window_bounds = array<i64: 120, 84>}, {pipeline_mode = #tpu.pipeline_mode<synchronous>, transform_indices = @transform_10, window_bounds = array<i64: 1, 84>}, {pipeline_mode = #tpu.pipeline_mode<synchronous>, transform_indices = @transform_11, window_bounds = array<i64: 84, 10>}, {pipeline_mode = #tpu.pipeline_mode<synchronous>, transform_indices = @transform_12, window_bounds = array<i64: 1, 10>}, {transform_indices = @transform_13, window_bounds = array<i64: 8, 10>}]} {
    %cst = arith.constant 0.000000e+00 : f32
    %0 = vector.broadcast %cst : f32 to vector<312x168xf32>
    %c0 = arith.constant 0 : index
    %c0_0 = arith.constant 0 : index
    %1 = vector.load %arg1[%c0, %c0_0] : memref<320x32xbf16, #tpu.memory_space<vmem>>, vector<312x32xbf16>
    %c0_1 = arith.constant 0 : index
    %c0_2 = arith.constant 0 : index
    %c0_3 = arith.constant 0 : index
    %2 = vector.load %arg2[%c0_1, %c0_2, %c0_3] : memref<5x32x168xbf16, #tpu.memory_space<vmem>>, vector<1x32x168xbf16>
    %3 = vector.shape_cast %2 : vector<1x32x168xbf16> to vector<32x168xbf16>
    %cst_4 = arith.constant dense<0.000000e+00> : vector<312x168xf32>
    %4 = tpu.matmul %1, %3, %cst_4 {dimension_numbers = #tpu.dot_dimension_numbers<[1], [0], [0], [1], [0, 0, 1, 1], [], []>} : vector<312x32xbf16>, vector<32x168xbf16>, vector<312x168xf32> -> vector<312x168xf32>
    %5 = arith.addf %0, %4 : vector<312x168xf32>
    %c1 = arith.constant 1 : index
    %c0_5 = arith.constant 0 : index
    %6 = vector.load %arg1[%c1, %c0_5] : memref<320x32xbf16, #tpu.memory_space<vmem>>, vector<312x32xbf16>
    %c1_6 = arith.constant 1 : index
    %c0_7 = arith.constant 0 : index
    %c0_8 = arith.constant 0 : index
    %7 = vector.load %arg2[%c1_6, %c0_7, %c0_8] : memref<5x32x168xbf16, #tpu.memory_space<vmem>>, vector<1x32x168xbf16>
    %8 = vector.shape_cast %7 : vector<1x32x168xbf16> to vector<32x168xbf16>
    %cst_9 = arith.constant dense<0.000000e+00> : vector<312x168xf32>
    %9 = tpu.matmul %6, %8, %cst_9 {dimension_numbers = #tpu.dot_dimension_numbers<[1], [0], [0], [1], [0, 0, 1, 1], [], []>} : vector<312x32xbf16>, vector<32x168xbf16>, vector<312x168xf32> -> vector<312x168xf32>
    %10 = arith.addf %5, %9 : vector<312x168xf32>
    %c2 = arith.constant 2 : index
    %c0_10 = arith.constant 0 : index
    %11 = vector.load %arg1[%c2, %c0_10] : memref<320x32xbf16, #tpu.memory_space<vmem>>, vector<312x32xbf16>
    %c2_11 = arith.constant 2 : index
    %c0_12 = arith.constant 0 : index
    %c0_13 = arith.constant 0 : index
    %12 = vector.load %arg2[%c2_11, %c0_12, %c0_13] : memref<5x32x168xbf16, #tpu.memory_space<vmem>>, vector<1x32x168xbf16>
    %13 = vector.shape_cast %12 : vector<1x32x168xbf16> to vector<32x168xbf16>
    %cst_14 = arith.constant dense<0.000000e+00> : vector<312x168xf32>
    %14 = tpu.matmul %11, %13, %cst_14 {dimension_numbers = #tpu.dot_dimension_numbers<[1], [0], [0], [1], [0, 0, 1, 1], [], []>} : vector<312x32xbf16>, vector<32x168xbf16>, vector<312x168xf32> -> vector<312x168xf32>
    %15 = arith.addf %10, %14 : vector<312x168xf32>
    %c3 = arith.constant 3 : index
    %c0_15 = arith.constant 0 : index
    %16 = vector.load %arg1[%c3, %c0_15] : memref<320x32xbf16, #tpu.memory_space<vmem>>, vector<312x32xbf16>
    %c3_16 = arith.constant 3 : index
    %c0_17 = arith.constant 0 : index
    %c0_18 = arith.constant 0 : index
    %17 = vector.load %arg2[%c3_16, %c0_17, %c0_18] : memref<5x32x168xbf16, #tpu.memory_space<vmem>>, vector<1x32x168xbf16>
    %18 = vector.shape_cast %17 : vector<1x32x168xbf16> to vector<32x168xbf16>
    %cst_19 = arith.constant dense<0.000000e+00> : vector<312x168xf32>
    %19 = tpu.matmul %16, %18, %cst_19 {dimension_numbers = #tpu.dot_dimension_numbers<[1], [0], [0], [1], [0, 0, 1, 1], [], []>} : vector<312x32xbf16>, vector<32x168xbf16>, vector<312x168xf32> -> vector<312x168xf32>
    %20 = arith.addf %15, %19 : vector<312x168xf32>
    %c4 = arith.constant 4 : index
    %c0_20 = arith.constant 0 : index
    %21 = vector.load %arg1[%c4, %c0_20] : memref<320x32xbf16, #tpu.memory_space<vmem>>, vector<312x32xbf16>
    %c4_21 = arith.constant 4 : index
    %c0_22 = arith.constant 0 : index
    %c0_23 = arith.constant 0 : index
    %22 = vector.load %arg2[%c4_21, %c0_22, %c0_23] : memref<5x32x168xbf16, #tpu.memory_space<vmem>>, vector<1x32x168xbf16>
    %23 = vector.shape_cast %22 : vector<1x32x168xbf16> to vector<32x168xbf16>
    %cst_24 = arith.constant dense<0.000000e+00> : vector<312x168xf32>
    %24 = tpu.matmul %21, %23, %cst_24 {dimension_numbers = #tpu.dot_dimension_numbers<[1], [0], [0], [1], [0, 0, 1, 1], [], []>} : vector<312x32xbf16>, vector<32x168xbf16>, vector<312x168xf32> -> vector<312x168xf32>
    %25 = arith.addf %20, %24 : vector<312x168xf32>
    %c0_25 = arith.constant 0 : index
    %c0_26 = arith.constant 0 : index
    %26 = vector.load %arg3[%c0_25, %c0_26] : memref<1x168xf32, #tpu.memory_space<vmem>>, vector<1x168xf32>
    %27 = vector.broadcast %26 : vector<1x168xf32> to vector<312x168xf32>
    %28 = arith.addf %25, %27 : vector<312x168xf32>
    %29 = arith.negf %28 : vector<312x168xf32>
    %30 = math.exp %29 : vector<312x168xf32>
    %cst_27 = arith.constant 1.000000e+00 : f32
    %31 = vector.broadcast %cst_27 : f32 to vector<312x168xf32>
    %32 = arith.addf %31, %30 : vector<312x168xf32>
    %33 = arith.divf %31, %32 : vector<312x168xf32>
    %34 = arith.truncf %33 : vector<312x168xf32> to vector<312x168xbf16>
    %c0_28 = arith.constant 0 : index
    %c0_29 = arith.constant 0 : index
    %35 = vector.load %arg4[%c0_28, %c0_29] : memref<168x84xbf16, #tpu.memory_space<vmem>>, vector<168x84xbf16>
    %cst_30 = arith.constant dense<0.000000e+00> : vector<312x84xf32>
    %36 = tpu.matmul %34, %35, %cst_30 {dimension_numbers = #tpu.dot_dimension_numbers<[1], [0], [0], [1], [0, 0, 1, 1], [], []>} : vector<312x168xbf16>, vector<168x84xbf16>, vector<312x84xf32> -> vector<312x84xf32>
    %c0_31 = arith.constant 0 : index
    %c0_32 = arith.constant 0 : index
    %37 = vector.load %arg15[%c0_31, %c0_32] : memref<312x84xf32, #tpu.memory_space<vmem>>, vector<312x84xf32>
    tpu.vector_store %arg15[%c0_31, %c0_32], %36 {strides = array<i32>} : memref<312x84xf32, #tpu.memory_space<vmem>>, vector<312x84xf32>,
    %c0_33 = arith.constant 0 : index
    %c0_34 = arith.constant 0 : index
    %38 = tpu.strided_load %arg15[%c0_33, %c0_34] {strides = array<i32: 2, 1>} : memref<312x84xf32, #tpu.memory_space<vmem>>, vector<156x84xf32>
    %c1_35 = arith.constant 1 : index
    %c0_36 = arith.constant 0 : index
    %39 = tpu.strided_load %arg15[%c1_35, %c0_36] {strides = array<i32: 2, 1>} : memref<312x84xf32, #tpu.memory_space<vmem>>, vector<156x84xf32>
    %40 = arith.addf %38, %39 : vector<156x84xf32>
    %c0_37 = arith.constant 0 : index
    %c0_38 = arith.constant 0 : index
    %41 = vector.load %arg16[%c0_37, %c0_38] : memref<156x84xf32, #tpu.memory_space<vmem>>, vector<156x84xf32>
    tpu.vector_store %arg16[%c0_37, %c0_38], %40 {strides = array<i32>} : memref<156x84xf32, #tpu.memory_space<vmem>>, vector<156x84xf32>,
    %cst_39 = arith.constant 0.000000e+00 : f32
    %42 = vector.broadcast %cst_39 : f32 to vector<152x160xf32>
    %c0_40 = arith.constant 0 : index
    %c0_41 = arith.constant 0 : index
    %43 = vector.load %arg16[%c0_40, %c0_41] : memref<156x84xf32, #tpu.memory_space<vmem>>, vector<152x84xf32>
    %44 = arith.truncf %43 : vector<152x84xf32> to vector<152x84xbf16>
    %c0_42 = arith.constant 0 : index
    %c0_43 = arith.constant 0 : index
    %c0_44 = arith.constant 0 : index
    %45 = vector.load %arg5[%c0_42, %c0_43, %c0_44] : memref<5x84x160xbf16, #tpu.memory_space<vmem>>, vector<1x84x160xbf16>
    %46 = vector.shape_cast %45 : vector<1x84x160xbf16> to vector<84x160xbf16>
    %cst_45 = arith.constant dense<0.000000e+00> : vector<152x160xf32>
    %47 = tpu.matmul %44, %46, %cst_45 {dimension_numbers = #tpu.dot_dimension_numbers<[1], [0], [0], [1], [0, 0, 1, 1], [], []>} : vector<152x84xbf16>, vector<84x160xbf16>, vector<152x160xf32> -> vector<152x160xf32>
    %48 = arith.addf %42, %47 : vector<152x160xf32>
    %c1_46 = arith.constant 1 : index
    %c0_47 = arith.constant 0 : index
    %49 = vector.load %arg16[%c1_46, %c0_47] : memref<156x84xf32, #tpu.memory_space<vmem>>, vector<152x84xf32>
    %50 = arith.truncf %49 : vector<152x84xf32> to vector<152x84xbf16>
    %c1_48 = arith.constant 1 : index
    %c0_49 = arith.constant 0 : index
    %c0_50 = arith.constant 0 : index
    %51 = vector.load %arg5[%c1_48, %c0_49, %c0_50] : memref<5x84x160xbf16, #tpu.memory_space<vmem>>, vector<1x84x160xbf16>
    %52 = vector.shape_cast %51 : vector<1x84x160xbf16> to vector<84x160xbf16>
    %cst_51 = arith.constant dense<0.000000e+00> : vector<152x160xf32>
    %53 = tpu.matmul %50, %52, %cst_51 {dimension_numbers = #tpu.dot_dimension_numbers<[1], [0], [0], [1], [0, 0, 1, 1], [], []>} : vector<152x84xbf16>, vector<84x160xbf16>, vector<152x160xf32> -> vector<152x160xf32>
    %54 = arith.addf %48, %53 : vector<152x160xf32>
    %c2_52 = arith.constant 2 : index
    %c0_53 = arith.constant 0 : index
    %55 = vector.load %arg16[%c2_52, %c0_53] : memref<156x84xf32, #tpu.memory_space<vmem>>, vector<152x84xf32>
    %56 = arith.truncf %55 : vector<152x84xf32> to vector<152x84xbf16>
    %c2_54 = arith.constant 2 : index
    %c0_55 = arith.constant 0 : index
    %c0_56 = arith.constant 0 : index
    %57 = vector.load %arg5[%c2_54, %c0_55, %c0_56] : memref<5x84x160xbf16, #tpu.memory_space<vmem>>, vector<1x84x160xbf16>
    %58 = vector.shape_cast %57 : vector<1x84x160xbf16> to vector<84x160xbf16>
    %cst_57 = arith.constant dense<0.000000e+00> : vector<152x160xf32>
    %59 = tpu.matmul %56, %58, %cst_57 {dimension_numbers = #tpu.dot_dimension_numbers<[1], [0], [0], [1], [0, 0, 1, 1], [], []>} : vector<152x84xbf16>, vector<84x160xbf16>, vector<152x160xf32> -> vector<152x160xf32>
    %60 = arith.addf %54, %59 : vector<152x160xf32>
    %c3_58 = arith.constant 3 : index
    %c0_59 = arith.constant 0 : index
    %61 = vector.load %arg16[%c3_58, %c0_59] : memref<156x84xf32, #tpu.memory_space<vmem>>, vector<152x84xf32>
    %62 = arith.truncf %61 : vector<152x84xf32> to vector<152x84xbf16>
    %c3_60 = arith.constant 3 : index
    %c0_61 = arith.constant 0 : index
    %c0_62 = arith.constant 0 : index
    %63 = vector.load %arg5[%c3_60, %c0_61, %c0_62] : memref<5x84x160xbf16, #tpu.memory_space<vmem>>, vector<1x84x160xbf16>
    %64 = vector.shape_cast %63 : vector<1x84x160xbf16> to vector<84x160xbf16>
    %cst_63 = arith.constant dense<0.000000e+00> : vector<152x160xf32>
    %65 = tpu.matmul %62, %64, %cst_63 {dimension_numbers = #tpu.dot_dimension_numbers<[1], [0], [0], [1], [0, 0, 1, 1], [], []>} : vector<152x84xbf16>, vector<84x160xbf16>, vector<152x160xf32> -> vector<152x160xf32>
    %66 = arith.addf %60, %65 : vector<152x160xf32>
    %c4_64 = arith.constant 4 : index
    %c0_65 = arith.constant 0 : index
    %67 = vector.load %arg16[%c4_64, %c0_65] : memref<156x84xf32, #tpu.memory_space<vmem>>, vector<152x84xf32>
    %68 = arith.truncf %67 : vector<152x84xf32> to vector<152x84xbf16>
    %c4_66 = arith.constant 4 : index
    %c0_67 = arith.constant 0 : index
    %c0_68 = arith.constant 0 : index
    %69 = vector.load %arg5[%c4_66, %c0_67, %c0_68] : memref<5x84x160xbf16, #tpu.memory_space<vmem>>, vector<1x84x160xbf16>
    %70 = vector.shape_cast %69 : vector<1x84x160xbf16> to vector<84x160xbf16>
    %cst_69 = arith.constant dense<0.000000e+00> : vector<152x160xf32>
    %71 = tpu.matmul %68, %70, %cst_69 {dimension_numbers = #tpu.dot_dimension_numbers<[1], [0], [0], [1], [0, 0, 1, 1], [], []>} : vector<152x84xbf16>, vector<84x160xbf16>, vector<152x160xf32> -> vector<152x160xf32>
    %72 = arith.addf %66, %71 : vector<152x160xf32>
    %c0_70 = arith.constant 0 : index
    %c0_71 = arith.constant 0 : index
    %73 = vector.load %arg6[%c0_70, %c0_71] : memref<1x160xf32, #tpu.memory_space<vmem>>, vector<1x160xf32>
    %74 = vector.broadcast %73 : vector<1x160xf32> to vector<152x160xf32>
    %75 = arith.addf %72, %74 : vector<152x160xf32>
    %76 = arith.negf %75 : vector<152x160xf32>
    %77 = math.exp %76 : vector<152x160xf32>
    %cst_72 = arith.constant 1.000000e+00 : f32
    %78 = vector.broadcast %cst_72 : f32 to vector<152x160xf32>
    %79 = arith.addf %78, %77 : vector<152x160xf32>
    %80 = arith.divf %78, %79 : vector<152x160xf32>
    %81 = arith.truncf %80 : vector<152x160xf32> to vector<152x160xbf16>
    %c0_73 = arith.constant 0 : index
    %c0_74 = arith.constant 0 : index
    %82 = vector.load %arg7[%c0_73, %c0_74] : memref<160x80xbf16, #tpu.memory_space<vmem>>, vector<160x80xbf16>
    %cst_75 = arith.constant dense<0.000000e+00> : vector<152x80xf32>
    %83 = tpu.matmul %81, %82, %cst_75 {dimension_numbers = #tpu.dot_dimension_numbers<[1], [0], [0], [1], [0, 0, 1, 1], [], []>} : vector<152x160xbf16>, vector<160x80xbf16>, vector<152x80xf32> -> vector<152x80xf32>
    %c0_76 = arith.constant 0 : index
    %c0_77 = arith.constant 0 : index
    %84 = vector.load %arg17[%c0_76, %c0_77] : memref<152x80xf32, #tpu.memory_space<vmem>>, vector<152x80xf32>
    tpu.vector_store %arg17[%c0_76, %c0_77], %83 {strides = array<i32>} : memref<152x80xf32, #tpu.memory_space<vmem>>, vector<152x80xf32>,
    %c0_78 = arith.constant 0 : index
    %c0_79 = arith.constant 0 : index
    %85 = tpu.strided_load %arg17[%c0_78, %c0_79] {strides = array<i32: 20, 1>} : memref<152x80xf32, #tpu.memory_space<vmem>>, vector<8x80xf32>
    %c1_80 = arith.constant 1 : index
    %c0_81 = arith.constant 0 : index
    %86 = tpu.strided_load %arg17[%c1_80, %c0_81] {strides = array<i32: 20, 1>} : memref<152x80xf32, #tpu.memory_space<vmem>>, vector<8x80xf32>
    %87 = arith.addf %85, %86 : vector<8x80xf32>
    %c2_82 = arith.constant 2 : index
    %c0_83 = arith.constant 0 : index
    %88 = tpu.strided_load %arg17[%c2_82, %c0_83] {strides = array<i32: 20, 1>} : memref<152x80xf32, #tpu.memory_space<vmem>>, vector<8x80xf32>
    %c3_84 = arith.constant 3 : index
    %c0_85 = arith.constant 0 : index
    %89 = tpu.strided_load %arg17[%c3_84, %c0_85] {strides = array<i32: 20, 1>} : memref<152x80xf32, #tpu.memory_space<vmem>>, vector<8x80xf32>
    %90 = arith.addf %88, %89 : vector<8x80xf32>
    %c4_86 = arith.constant 4 : index
    %c0_87 = arith.constant 0 : index
    %91 = tpu.strided_load %arg17[%c4_86, %c0_87] {strides = array<i32: 20, 1>} : memref<152x80xf32, #tpu.memory_space<vmem>>, vector<8x80xf32>
    %c5 = arith.constant 5 : index
    %c0_88 = arith.constant 0 : index
    %92 = tpu.strided_load %arg17[%c5, %c0_88] {strides = array<i32: 20, 1>} : memref<152x80xf32, #tpu.memory_space<vmem>>, vector<8x80xf32>
    %93 = arith.addf %91, %92 : vector<8x80xf32>
    %c6 = arith.constant 6 : index
    %c0_89 = arith.constant 0 : index
    %94 = tpu.strided_load %arg17[%c6, %c0_89] {strides = array<i32: 20, 1>} : memref<152x80xf32, #tpu.memory_space<vmem>>, vector<8x80xf32>
    %c7 = arith.constant 7 : index
    %c0_90 = arith.constant 0 : index
    %95 = tpu.strided_load %arg17[%c7, %c0_90] {strides = array<i32: 20, 1>} : memref<152x80xf32, #tpu.memory_space<vmem>>, vector<8x80xf32>
    %96 = arith.addf %94, %95 : vector<8x80xf32>
    %c8 = arith.constant 8 : index
    %c0_91 = arith.constant 0 : index
    %97 = tpu.strided_load %arg17[%c8, %c0_91] {strides = array<i32: 20, 1>} : memref<152x80xf32, #tpu.memory_space<vmem>>, vector<8x80xf32>
    %c9 = arith.constant 9 : index
    %c0_92 = arith.constant 0 : index
    %98 = tpu.strided_load %arg17[%c9, %c0_92] {strides = array<i32: 20, 1>} : memref<152x80xf32, #tpu.memory_space<vmem>>, vector<8x80xf32>
    %99 = arith.addf %97, %98 : vector<8x80xf32>
    %100 = tpu.concatenate %87, %90, %93, %96, %99 in 1 : vector<8x80xf32>, vector<8x80xf32>, vector<8x80xf32>, vector<8x80xf32>, vector<8x80xf32> -> vector<8x400xf32>
    %101 = arith.truncf %100 : vector<8x400xf32> to vector<8x400xbf16>
    %c0_93 = arith.constant 0 : index
    %c0_94 = arith.constant 0 : index
    %102 = vector.load %arg8[%c0_93, %c0_94] : memref<400x120xbf16, #tpu.memory_space<vmem>>, vector<400x120xbf16>
    %cst_95 = arith.constant dense<0.000000e+00> : vector<8x120xf32>
    %103 = tpu.matmul %101, %102, %cst_95 {dimension_numbers = #tpu.dot_dimension_numbers<[1], [0], [0], [1], [0, 0, 1, 1], [], []>} : vector<8x400xbf16>, vector<400x120xbf16>, vector<8x120xf32> -> vector<8x120xf32>
    %c0_96 = arith.constant 0 : index
    %c0_97 = arith.constant 0 : index
    %104 = vector.load %arg9[%c0_96, %c0_97] : memref<1x120xf32, #tpu.memory_space<vmem>>, vector<1x120xf32>
    %105 = vector.broadcast %104 : vector<1x120xf32> to vector<8x120xf32>
    %106 = arith.addf %103, %105 : vector<8x120xf32>
    %107 = arith.negf %106 : vector<8x120xf32>
    %108 = math.exp %107 : vector<8x120xf32>
    %cst_98 = arith.constant 1.000000e+00 : f32
    %109 = vector.broadcast %cst_98 : f32 to vector<8x120xf32>
    %110 = arith.addf %109, %108 : vector<8x120xf32>
    %111 = arith.divf %109, %110 : vector<8x120xf32>
    %112 = arith.truncf %111 : vector<8x120xf32> to vector<8x120xbf16>
    %c0_99 = arith.constant 0 : index
    %c0_100 = arith.constant 0 : index
    %113 = vector.load %arg10[%c0_99, %c0_100] : memref<120x84xbf16, #tpu.memory_space<vmem>>, vector<120x84xbf16>
    %cst_101 = arith.constant dense<0.000000e+00> : vector<8x84xf32>
    %114 = tpu.matmul %112, %113, %cst_101 {dimension_numbers = #tpu.dot_dimension_numbers<[1], [0], [0], [1], [0, 0, 1, 1], [], []>} : vector<8x120xbf16>, vector<120x84xbf16>, vector<8x84xf32> -> vector<8x84xf32>
    %c0_102 = arith.constant 0 : index
    %c0_103 = arith.constant 0 : index
    %115 = vector.load %arg11[%c0_102, %c0_103] : memref<1x84xf32, #tpu.memory_space<vmem>>, vector<1x84xf32>
    %116 = vector.broadcast %115 : vector<1x84xf32> to vector<8x84xf32>
    %117 = arith.addf %114, %116 : vector<8x84xf32>
    %118 = arith.negf %117 : vector<8x84xf32>
    %119 = math.exp %118 : vector<8x84xf32>
    %cst_104 = arith.constant 1.000000e+00 : f32
    %120 = vector.broadcast %cst_104 : f32 to vector<8x84xf32>
    %121 = arith.addf %120, %119 : vector<8x84xf32>
    %122 = arith.divf %120, %121 : vector<8x84xf32>
    %c0_105 = arith.constant 0 : index
    %c0_106 = arith.constant 0 : index
    %123 = vector.load %arg12[%c0_105, %c0_106] : memref<84x10xf32, #tpu.memory_space<vmem>>, vector<84x10xf32>
    %cst_107 = arith.constant dense<0.000000e+00> : vector<8x10xf32>
    %124 = tpu.matmul %122, %123, %cst_107 {dimension_numbers = #tpu.dot_dimension_numbers<[1], [0], [0], [1], [0, 0, 1, 1], [], []>} : vector<8x84xf32>, vector<84x10xf32>, vector<8x10xf32> -> vector<8x10xf32>
    %c0_108 = arith.constant 0 : index
    %c0_109 = arith.constant 0 : index
    %125 = vector.load %arg13[%c0_108, %c0_109] : memref<1x10xf32, #tpu.memory_space<vmem>>, vector<1x10xf32>
    %126 = vector.broadcast %125 : vector<1x10xf32> to vector<8x10xf32>
    %127 = arith.addf %124, %126 : vector<8x10xf32>
    %c0_110 = arith.constant 0 : index
    %c0_111 = arith.constant 0 : index
    %128 = vector.load %arg14[%c0_110, %c0_111] : memref<8x10xf32, #tpu.memory_space<vmem>>, vector<8x10xf32>
    tpu.vector_store %arg14[%c0_110, %c0_111], %127 {strides = array<i32>} : memref<8x10xf32, #tpu.memory_space<vmem>>, vector<8x10xf32>,
    return
  }
  func.func @transform_0(%arg0: i32) -> (i32, i32) {
    %c0_i32 = arith.constant 0 : i32
    %c0_i32_0 = arith.constant 0 : i32
    return %arg0, %c0_i32 : i32, i32
  }
  func.func @transform_1(%arg0: i32) -> (i32, i32, i32) {
    %c0_i32 = arith.constant 0 : i32
    %c0_i32_0 = arith.constant 0 : i32
    %c0_i32_1 = arith.constant 0 : i32
    %c0_i32_2 = arith.constant 0 : i32
    return %c0_i32, %c0_i32_0, %c0_i32_1 : i32, i32, i32
  }
  func.func @transform_2(%arg0: i32) -> (i32, i32) {
    %c0_i32 = arith.constant 0 : i32
    %c0_i32_0 = arith.constant 0 : i32
    %c0_i32_1 = arith.constant 0 : i32
    return %c0_i32, %c0_i32_0 : i32, i32
  }
  func.func @transform_3(%arg0: i32) -> (i32, i32) {
    %c0_i32 = arith.constant 0 : i32
    %c0_i32_0 = arith.constant 0 : i32
    %c0_i32_1 = arith.constant 0 : i32
    return %c0_i32, %c0_i32_0 : i32, i32
  }
  func.func @transform_4(%arg0: i32) -> (i32, i32, i32) {
    %c0_i32 = arith.constant 0 : i32
    %c0_i32_0 = arith.constant 0 : i32
    %c0_i32_1 = arith.constant 0 : i32
    %c0_i32_2 = arith.constant 0 : i32
    return %c0_i32, %c0_i32_0, %c0_i32_1 : i32, i32, i32
  }
  func.func @transform_5(%arg0: i32) -> (i32, i32) {
    %c0_i32 = arith.constant 0 : i32
    %c0_i32_0 = arith.constant 0 : i32
    %c0_i32_1 = arith.constant 0 : i32
    return %c0_i32, %c0_i32_0 : i32, i32
  }
  func.func @transform_6(%arg0: i32) -> (i32, i32) {
    %c0_i32 = arith.constant 0 : i32
    %c0_i32_0 = arith.constant 0 : i32
    %c0_i32_1 = arith.constant 0 : i32
    return %c0_i32, %c0_i32_0 : i32, i32
  }
  func.func @transform_7(%arg0: i32) -> (i32, i32) {
    %c0_i32 = arith.constant 0 : i32
    %c0_i32_0 = arith.constant 0 : i32
    %c0_i32_1 = arith.constant 0 : i32
    return %c0_i32, %c0_i32_0 : i32, i32
  }
  func.func @transform_8(%arg0: i32) -> (i32, i32) {
    %c0_i32 = arith.constant 0 : i32
    %c0_i32_0 = arith.constant 0 : i32
    %c0_i32_1 = arith.constant 0 : i32
    return %c0_i32, %c0_i32_0 : i32, i32
  }
  func.func @transform_9(%arg0: i32) -> (i32, i32) {
    %c0_i32 = arith.constant 0 : i32
    %c0_i32_0 = arith.constant 0 : i32
    %c0_i32_1 = arith.constant 0 : i32
    return %c0_i32, %c0_i32_0 : i32, i32
  }
  func.func @transform_10(%arg0: i32) -> (i32, i32) {
    %c0_i32 = arith.constant 0 : i32
    %c0_i32_0 = arith.constant 0 : i32
    %c0_i32_1 = arith.constant 0 : i32
    return %c0_i32, %c0_i32_0 : i32, i32
  }
  func.func @transform_11(%arg0: i32) -> (i32, i32) {
    %c0_i32 = arith.constant 0 : i32
    %c0_i32_0 = arith.constant 0 : i32
    %c0_i32_1 = arith.constant 0 : i32
    return %c0_i32, %c0_i32_0 : i32, i32
  }
  func.func @transform_12(%arg0: i32) -> (i32, i32) {
    %c0_i32 = arith.constant 0 : i32
    %c0_i32_0 = arith.constant 0 : i32
    %c0_i32_1 = arith.constant 0 : i32
    return %c0_i32, %c0_i32_0 : i32, i32
  }
  func.func @transform_13(%arg0: i32) -> (i32, i32) {
    %c0_i32 = arith.constant 0 : i32
    %c0_i32_0 = arith.constant 0 : i32
    return %arg0, %c0_i32 : i32, i32
  }
}

</mosaic_0001>

<bundles_post_ra>
// kernel: lenet_forward.1
= control target key start
LH: loop header
LB: loop body
LE: loop exit
PB: predicated region body
PF: predicated region fallthrough
CT: control target
= control target key end

     0   :  { %v7711_v1 = vmov 0   ;;  %vm194_vm0 = vsmask.f32 7424  ;;  %vm374_vm1 = vcmask 261120   ;;  %vm968_vm2 = vcmask 1046528   ;;  %s7712_s24 = smov 80   ;;  %s9318_s1 = inlined_call_operand.vmem [shape: bf16[5,32,168], index: 1, kind: input, shape index: {}]   ;;  %s9319_s0 = inlined_call_operand.vmem [shape: bf16[320,32], index: 0, kind: input, shape index: {}]   ;;  %s9320_s3 = inlined_call_operand.vmem [shape: bf16[168,84], index: 3, kind: input, shape index: {}]   ;;  %s9321_s2 = inlined_call_operand.vmem [shape: f32[1,168], index: 2, kind: input, shape index: {}]   ;;  %s9322_s4 = inlined_call_operand.vmem [shape: bf16[5,84,160], index: 4, kind: input, shape index: {}]   ;;  %s9323_s6 = inlined_call_operand.vmem [shape: bf16[160,80], index: 6, kind: input, shape index: {}]   ;;  %s9324_s5 = inlined_call_operand.vmem [shape: f32[1,160], index: 5, kind: input, shape index: {}]   ;;  %s9325_s7 = inlined_call_operand.vmem [shape: bf16[400,120], index: 7, kind: input, shape index: {}]   ;;  %s9326_s9 = inlined_call_operand.vmem [shape: bf16[120,84], index: 9, kind: input, shape index: {}]   ;;  %s9327_s8 = inlined_call_operand.vmem [shape: f32[1,120], index: 8, kind: input, shape index: {}]   ;;  %s9328_s11 = inlined_call_operand.vmem [shape: f32[84,10], index: 11, kind: input, shape index: {}]   ;;  %s9329_s10 = inlined_call_operand.vmem [shape: f32[1,84], index: 10, kind: input, shape index: {}]   ;;  %s9330_s12 = inlined_call_operand.vmem [shape: f32[1,10], index: 12, kind: input, shape index: {}]   ;;  %s9331_s13 = inlined_call_operand.vmem [shape: f32[8,10], index: 13, kind: output, shape index: {}]  }
   0x1   :  { %v7046_v0 = vld [vmem:[%s9318_s1 + $0x24] ss:$8 sps:$4 sm:$0xff]   ;;  %467 = vmatprep.mubr.bf16.mxu0 %v7711_v1  ;;  %3070 = vmatprep.subr.bf16.mxu1 %v7711_v1  ;;  %v7048_v2 = vld [vmem:[%s9318_s1 + $0x20] ss:$8 sps:$4 sm:$0xff]   ;;  %v7049_v3 = vld [vmem:[%s9318_s1 + $0x34] ss:$8 sps:$4 sm:$0xff]  }
   0x2   :  { %435 = vmatprep.subr.bf16.mxu0 %v7046_v0  ;;  %v7051_v4 = vld [vmem:[%s9318_s1 + $0x30] ss:$8 sps:$4 sm:$0xff]   ;;  %v45_v5 = vld [vmem:[%s9319_s0] sm:$0xf]  ;;  %v7809_v6 = vld [vmem:[%s9319_s0 + $0x4] sm:$0xf] }
   0x3   :  { %436 = vmatpush1.bf16.msra.mxu0 %v7048_v2  ;;  %v7812_v7 = vcombine.low %v45_v5, %v7809_v6  ;;  %v7817_v8 = vld [vmem:[%s9319_s0 + $0x8] sm:$0xff]   ;;  %v7828_v13 = vld [vmem:[%s9319_s0 + $0x10] sm:$0xff]   ;;  %v7847_v23 = vld [vmem:[%s9319_s0 + $0x18] sm:$0xff]   ;;  %vm1406_vm3 = vsmask.f32 6400  ;;  %vm1894_vm4 = vcmask 1045504  }
   0x4   :  { %437 = vmatprep.subr.bf16.mxu0 %v7049_v3  ;;  %v7056_v9 = vld [vmem:[%s9318_s1 + $0x4] ss:$8 sps:$4 sm:$0xff]   ;;  %v203_v12 = vshll.u32 %v7817_v8, 16  ;;  %v7054_v16 = vld [vmem:[%s9318_s1] ss:$8 sps:$4 sm:$0xff]   ;;  %v207_v18 = vshrl.u32 %v7817_v8, 16 }
   0x5   :  { %v196_v10 = vshrl.u32 %v7812_v7, 16  ;;  %v198_v11 = vshll.u32 %v7812_v7, 16  ;;  %v211_v19 = vshll.u32 %v7828_v13, 16  ;;  %v215_v25 = vshrl.u32 %v7828_v13, 16  ;;  %v7067_v27 = vld [vmem:[%s9318_s1 + $0x10] ss:$8 sps:$4 sm:$0xff]  }
   0x6   :  { %v205_v15 = vrot.slane %v203_v12, 1  ;;  %v219_v26 = vshll.u32 %v7847_v23, 16  ;;  %v7069_v28 = vld [vmem:[%s9318_s1 + $0x14] ss:$8 sps:$4 sm:$0xff]   ;;  %v7867_v31 = vld [vmem:[%s9319_s0 + $0x20] sm:$0xff]   ;;  %v223_v33 = vshrl.u32 %v7847_v23, 16 }
   0x7   :  { %438 = vmatpush1.bf16.msra.mxu0 %v7051_v4  ;;  %v200_v14 = vrot.slane %v198_v11, 1  ;;  %v213_v22 = vrot.slane %v211_v19, 1  ;;  %v227_v34 = vshll.u32 %v7867_v31, 16  ;;  %v7881_v37 = vld [vmem:[%s9319_s0 + $0x28] sm:$0xff]   ;;  %v231_v39 = vshrl.u32 %v7867_v31, 16  ;;  %v7895_v43 = vld [vmem:[%s9319_s0 + $0x30] sm:$0xff]  }
   0x8   :  { %728 = vmatprep.subr.bf16.mxu0 %v7056_v9  ;;  %v209_v21 = vor.u32 %v207_v18, %v205_v15  ;;  %v221_v30 = vrot.slane %v219_v26, 1  ;;  %v235_v40 = vshll.u32 %v7881_v37, 16  ;;  %v239_v45 = vshrl.u32 %v7881_v37, 16  ;;  %v7080_v47 = vld [vmem:[%s9318_s1 + $0x44] ss:$8 sps:$4 sm:$0xff]   ;;  %v7912_v50 = vld [vmem:[%s9319_s0 + $0x38] sm:$0xff]  }
   0x9   :  { %v201_v17 = vor.u32 %v200_v14, %v196_v10  ;;  %v217_v29 = vor.u32 %v215_v25, %v213_v22  ;;  %v229_v36 = vrot.slane %v227_v34, 1  ;;  %v243_v46 = vshll.u32 %v7895_v43, 16  ;;  %v7926_v56 = vld [vmem:[%s9319_s0 + $0x40] sm:$0xff]   ;;  %v7940_v62 = vld [vmem:[%s9319_s0 + $0x48] sm:$0xff]   ;;  %v7954_v5 = vld [vmem:[%s9319_s0 + $0x50] sm:$0xff]   ;;  %s7713_s25 = smov 112  }
   0xa   :  { %v214_v24 = vsel %vm194_vm0, %v209_v21, %v213_v22  ;;  %v225_v35 = vor.u32 %v223_v33, %v221_v30  ;;  %v237_v42 = vrot.slane %v235_v40, 1  ;;  %v247_v52 = vshrl.u32 %v7895_v43, 16  ;;  %s7715_s26 = smov 64  }
   0xb   :  { %v206_v20 = vsel %vm194_vm0, %v201_v17, %v205_v15  ;;  %v222_v32 = vsel %vm194_vm0, %v217_v29, %v221_v30  ;;  %v233_v41 = vor.u32 %v231_v39, %v229_v36  ;;  %v245_v49 = vrot.slane %v243_v46, 1 }
   0xc   :  { %5987 = vmatmul.mubr.msk.bf16.vlgmr.msra.gmra.mrb[0].mxu0 %vm374_vm1, %v206_v20  ;;  %v230_v38 = vsel %vm194_vm0, %v225_v35, %v229_v36  ;;  %v241_v48 = vor.u32 %v239_v45, %v237_v42  ;;  %v251_v53 = vshll.u32 %v7912_v50, 16  ;;  %v255_v58 = vshrl.u32 %v7912_v50, 16  ;;  %v7996_v36 = vld [vmem:[%s9319_s0 + $0x68] sm:$0xff]  }
   0xd   :  { %729 = vmatpush1.bf16.msra.mxu0 %v7054_v16  ;;  %477 = vmatprep.mubr.bf16.mxu0 %v7711_v1  ;;  %v238_v44 = vsel %vm194_vm0, %v233_v41, %v237_v42  ;;  %v249_v54 = vor.u32 %v247_v52, %v245_v49  ;;  %v259_v59 = vshll.u32 %v7926_v56, 16  ;;  %v263_v0 = vshrl.u32 %v7926_v56, 16  ;;  %v7968_v16 = vld [vmem:[%s9319_s0 + $0x58] sm:$0xff]  }
   0xe   :  { %730 = vmatprep.subr.bf16.mxu0 %v7069_v28  ;;  %v246_v51 = vsel %vm194_vm0, %v241_v48, %v245_v49  ;;  %v253_v55 = vrot.slane %v251_v53, 1  ;;  %v267_v2 = vshll.u32 %v7940_v62, 16  ;;  %v271_v10 = vshrl.u32 %v7940_v62, 16  ;;  %v8010_v48 = vld [vmem:[%s9319_s0 + $0x70] sm:$0xff]  }
   0xf   :  { %v261_v61 = vrot.slane %v259_v59, 1  ;;  %v275_v11 = vshll.u32 %v7954_v5, 16  ;;  %v279_v20 = vshrl.u32 %v7954_v5, 16  ;;  %v283_v21 = vshll.u32 %v7968_v16, 16 }
  0x10   :  { %v254_v57 = vsel %vm194_vm0, %v249_v54, %v253_v55  ;;  %v257_v60 = vor.u32 %v255_v58, %v253_v55  ;;  %v269_v4 = vrot.slane %v267_v2, 1  ;;  %v287_v29 = vshrl.u32 %v7968_v16, 16 }
  0x11   :  { %731 = vmatpush1.bf16.msra.mxu0 %v7067_v27  ;;  %v265_v3 = vor.u32 %v263_v0, %v261_v61  ;;  %v277_v15 = vrot.slane %v275_v11, 1  ;;  %v7982_v27 = vld [vmem:[%s9319_s0 + $0x60] sm:$0xff]   ;;  %v299_v42 = vshll.u32 %v7996_v36, 16  ;;  %v307_v54 = vshll.u32 %v8010_v48, 16 }
  0x12   :  { %1088 = vmatprep.subr.bf16.mxu0 %v7080_v47  ;;  %v262_v63 = vsel %vm194_vm0, %v257_v60, %v261_v61  ;;  %v273_v14 = vor.u32 %v271_v10, %v269_v4  ;;  %v291_v30 = vshll.u32 %v7982_v27, 16  ;;  %v295_v41 = vshrl.u32 %v7982_v27, 16  ;;  %v8024_v60 = vld [vmem:[%s9319_s0 + $0x78] sm:$0xff]  }
  0x13   :  { %v270_v9 = vsel %vm194_vm0, %v265_v3, %v269_v4  ;;  %v281_v22 = vor.u32 %v279_v20, %v277_v15  ;;  %v301_v47 = vrot.slane %v299_v42, 1  ;;  %v315_v3 = vshll.u32 %v8024_v60, 16 }
  0x14   :  { %5988 = vmatmul.mubr.msk.bf16.gmra.mrb[4].mxu0 %vm374_vm1, %v214_v24  ;;  %v278_v17 = vsel %vm194_vm0, %v273_v14, %v277_v15  ;;  %v285_v24 = vrot.slane %v283_v21, 1  ;;  %v293_v35 = vrot.slane %v291_v30, 1  ;;  %v8038_v14 = vld [vmem:[%s9319_s0 + $0x80] sm:$0xff]   ;;  %vm3066_vm5 = vcmask 1043456  }
  0x15   :  { %487 = vmatprep.mubr.bf16.mxu0 %v7711_v1  ;;  %vm3005_vm6 = vcmask 326656   ;;  %vm3588_vm7 = vcmask 1041408   ;;  %vm3262_vm8 = vcmask 687104   ;;  %vm3420_vm9 = vcmask 683008  }
  0x16   :  { %v286_v28 = vsel %vm194_vm0, %v281_v22, %v285_v24  ;;  %v9333_v22 = vshll.u32 %v8038_v14, 16  ;;  %vm5371_vm10 = vcmask 654336   ;;  %vm5433_vm11 = vcmask 916480  }
  0x17   :  { %vm5648_vm12 = vcmask 130048   ;;  %vm5435_vm13 = vcmask 523264   ;;  %vm7717_vm14 = vmmov 0   ;;  %vm5806_vm15 = vcmask 982016  }
  0x1c   :  { %5989 = vmatmul.mubr.msk.bf16.gmra.mrb[8].mxu0 %vm374_vm1, %v222_v32  ;;  %v289_v32 = vor.u32 %v287_v29, %v285_v24 }
  0x1d   :  { %497 = vmatprep.mubr.bf16.mxu0 %v7711_v1 }
  0x24   :  { %5990 = vmatmul.mubr.msk.bf16.gmra.mrb[12].mxu0 %vm374_vm1, %v230_v38  ;;  %v294_v38 = vsel %vm194_vm0, %v289_v32, %v293_v35  ;;  %v8052_v32 = vld [vmem:[%s9319_s0 + $0x88] sm:$0xff]  }
  0x25   :  { %507 = vmatprep.mubr.bf16.mxu0 %v7711_v1 }
  0x2c   :  { %5991 = vmatmul.mubr.msk.bf16.gmra.mrb[16].mxu0 %vm374_vm1, %v238_v44  ;;  %v297_v44 = vor.u32 %v295_v41, %v293_v35 }
  0x2d   :  { %517 = vmatprep.mubr.bf16.mxu0 %v7711_v1 }
  0x2e   :  { %v302_v49 = vsel %vm194_vm0, %v297_v44, %v301_v47  ;;  %v9332_v44 = vshll.u32 %v8052_v32, 16 }
  0x34   :  { %5992 = vmatmul.mubr.msk.bf16.gmra.mrb[20].mxu0 %vm374_vm1, %v246_v51  ;;  %v303_v51 = vshrl.u32 %v7996_v36, 16 }
  0x35   :  { %527 = vmatprep.mubr.bf16.mxu0 %v7711_v1 }
  0x36   :  { %v305_v55 = vor.u32 %v303_v51, %v301_v47 }
  0x3c   :  { %5993 = vmatmul.mubr.msk.bf16.gmra.mrb[24].mxu0 %vm374_vm1, %v254_v57  ;;  %v309_v57 = vrot.slane %v307_v54, 1 }
  0x3d   :  { %537 = vmatprep.mubr.bf16.mxu0 %v7711_v1 }
  0x3e   :  { %v310_v61 = vsel %vm194_vm0, %v305_v55, %v309_v57  ;;  %v8066_v55 = vld [vmem:[%s9319_s0 + $0x90] sm:$0xff]  }
  0x44   :  { %5994 = vmatmul.mubr.msk.bf16.gmra.mrb[28].mxu0 %vm374_vm1, %v262_v63  ;;  %v311_v63 = vshrl.u32 %v8010_v48, 16 }
  0x45   :  { %547 = vmatprep.mubr.bf16.mxu0 %v7711_v1 }
  0x46   :  { %v313_v4 = vor.u32 %v311_v63, %v309_v57 }
  0x4c   :  { %5995 = vmatmul.mubr.msk.bf16.gmra.mrb[32].mxu0 %vm374_vm1, %v270_v9  ;;  %v317_v9 = vrot.slane %v315_v3, 1 }
  0x4d   :  { %557 = vmatprep.mubr.bf16.mxu0 %v7711_v1 }
  0x4e   :  { %v318_v15 = vsel %vm194_vm0, %v313_v4, %v317_v9  ;;  %v9335_v4 = vshll.u32 %v8066_v55, 16 }
  0x54   :  { %5996 = vmatmul.mubr.msk.bf16.gmra.mrb[36].mxu0 %vm374_vm1, %v278_v17  ;;  %v319_v17 = vshrl.u32 %v8024_v60, 16 }
  0x55   :  { %567 = vmatprep.mubr.bf16.mxu0 %v7711_v1 }
  0x56   :  { %v321_v24 = vor.u32 %v319_v17, %v317_v9  ;;  %v8074_v9 = vld [vmem:[%s9319_s0 + $0x98] sm:$0xf] }
  0x5c   :  { %5997 = vmatmul.mubr.msk.bf16.gmra.mrb[40].mxu0 %vm374_vm1, %v286_v28  ;;  %v325_v28 = vrot.slane %v9333_v22, 1 }
  0x5d   :  { %577 = vmatprep.mubr.bf16.mxu0 %v7711_v1 }
  0x5e   :  { %v326_v35 = vsel %vm194_vm0, %v321_v24, %v325_v28 }
  0x64   :  { %5998 = vmatmul.mubr.msk.bf16.gmra.mrb[44].mxu0 %vm374_vm1, %v294_v38  ;;  %v327_v38 = vshrl.u32 %v8038_v14, 16 }
  0x65   :  { %587 = vmatprep.mubr.bf16.mxu0 %v7711_v1 }
  0x66   :  { %v329_v47 = vor.u32 %v327_v38, %v325_v28  ;;  %v341_v28 = vrot.slane %v9335_v4, 1 }
  0x6c   :  { %5999 = vmatmul.mubr.msk.bf16.gmra.mrb[48].mxu0 %vm374_vm1, %v302_v49  ;;  %v333_v49 = vrot.slane %v9332_v44, 1  ;;  %v9336_v44 = vshrl.u32 %v8066_v55, 16 }
  0x6d   :  { %597 = vmatprep.mubr.bf16.mxu0 %v7711_v1 }
  0x6e   :  { %v334_v57 = vsel %vm194_vm0, %v329_v47, %v333_v49 }
  0x74   :  { %6000 = vmatmul.mubr.msk.bf16.gmra.mrb[52].mxu0 %vm374_vm1, %v310_v61  ;;  %v9334_v61 = vshrl.u32 %v8052_v32, 16 }
  0x75   :  { %607 = vmatprep.mubr.bf16.mxu0 %v7711_v1 }
  0x76   :  { %v337_v24 = vor.u32 %v9334_v61, %v333_v49 }
  0x78   :  { %v342_v47 = vsel %vm194_vm0, %v337_v24, %v341_v28 }
  0x7c   :  { %6001 = vmatmul.mubr.msk.bf16.gmra.mrb[56].mxu0 %vm374_vm1, %v318_v15  ;;  %v88_v15 = vld [vmem:[%s9319_s0 + $0x9c] sm:$0x1] }
  0x7d   :  { %617 = vmatprep.mubr.bf16.mxu0 %v7711_v1 }
  0x84   :  { %6002 = vmatmul.mubr.msk.bf16.gmra.mrb[60].mxu0 %vm374_vm1, %v326_v35  ;;  %v8086_v35 = vcombine.low %v8074_v9, %v88_v15 }
  0x85   :  { %627 = vmatprep.mubr.bf16.mxu0 %v7711_v1 }
  0x86   :  { %v347_v22 = vshll.u32 %v8086_v35, 16  ;;  %v351_v15 = vshrl.u32 %v8086_v35, 16 }
  0x88   :  { %v349_v49 = vrot.slane %v347_v22, 1  ;;  %v7083_v22 = vld [vmem:[%s9318_s1 + $0x54] ss:$8 sps:$4 sm:$0xff]  }
  0x8a   :  { %v353_v24 = vor.u32 %v351_v15, %v349_v49 }
  0x8c   :  { %6003 = vmatmul.mubr.msk.bf16.gmra.mrb[64].mxu0 %vm374_vm1, %v334_v57  ;;  %v345_v57 = vor.u32 %v9336_v44, %v341_v28  ;;  %v959_v28 = vld [vmem:[%s9319_s0] sm:$0xe] }
  0x8d   :  { %637 = vmatprep.mubr.bf16.mxu0 %v7711_v1 }
  0x8e   :  { %v350_v61 = vsel %vm194_vm0, %v345_v57, %v349_v49  ;;  %v6007_v57 = vcombine.low %v8074_v9, %v8074_v9  ;;  %v8176_v49 = vcombine.low %v959_v28, %v7809_v6  ;;  %v7089_v28 = vld [vmem:[%s9318_s1 + $0x70] ss:$8 sps:$4 sm:$0xff]   ;;  %vm5953_vm0 = vcmask 80896  }
  0x90   :  { %v969_v15 = vrot.slane %v8176_v49, 1 }
  0x94   :  { %6004 = vmatmul.mubr.msk.bf16.gmra.mrb[68].mxu0 %vm374_vm1, %v342_v47  ;;  %v7078_v47 = vld [vmem:[%s9318_s1 + $0x40] ss:$8 sps:$4 sm:$0xff]  }
  0x95   :  { %647 = vmatprep.mubr.bf16.mxu0 %v7711_v1 }
  0x9c   :  { %6005 = vmatmul.mubr.msk.bf16.gmra.mrb[72].mxu0 %vm374_vm1, %v350_v61  ;;  %v7081_v61 = vld [vmem:[%s9318_s1 + $0x50] ss:$8 sps:$4 sm:$0xff]  }
  0x9d   :  { %657 = vmatprep.mubr.bf16.mxu0 %v7711_v1 }
  0xa4   :  { %6006 = vmatmul.mubr.msk.bf16.gmra.mrb[76].mxu0 %vm374_vm1, %v353_v24  ;;  %v970_v24 = vrot.slane %v7817_v8, 1 }
  0xa5   :  { %760 = vmatprep.mubr.bf16.mxu0 %v7711_v1 }
  0xac   :  { %6012 = vmatmul.mubr.msk.bf16.vlgmr.msra.gmra.mrb[0].mxu0 %vm374_vm1, %v7812_v7  ;;  %v7088_v7 = vld [vmem:[%s9318_s1 + $0x64] ss:$8 sps:$4 sm:$0xff]  }
  0xad   :  { %1089 = vmatpush1.bf16.msra.mxu0 %v7078_v47  ;;  %770 = vmatprep.mubr.bf16.mxu0 %v7711_v1  ;;  %v971_v47 = vsel %vm968_vm2, %v969_v15, %v970_v24  ;;  %v974_v15 = vrot.slane %v7847_v23, 1 }
  0xae   :  { %1090 = vmatprep.subr.bf16.mxu0 %v7083_v22  ;;  %v7086_v22 = vld [vmem:[%s9318_s1 + $0x60] ss:$8 sps:$4 sm:$0xff]  }
  0xb1   :  { %1091 = vmatpush1.bf16.msra.mxu0 %v7081_v61  ;;  %v7091_v61 = vld [vmem:[%s9318_s1 + $0x74] ss:$8 sps:$4 sm:$0xff]  }
  0xb2   :  { %1576 = vmatprep.subr.bf16.mxu0 %v7088_v7  ;;  %v972_v7 = vrot.slane %v7828_v13, 1 }
  0xb4   :  { %6013 = vmatmul.mubr.msk.bf16.gmra.mrb[4].mxu0 %vm374_vm1, %v7817_v8 }
  0xb5   :  { %780 = vmatprep.mubr.bf16.mxu0 %v7711_v1 }
  0xbc   :  { %6014 = vmatmul.mubr.msk.bf16.gmra.mrb[8].mxu0 %vm374_vm1, %v7828_v13 }
  0xbd   :  { %790 = vmatprep.mubr.bf16.mxu0 %v7711_v1 }
  0xc4   :  { %6015 = vmatmul.mubr.msk.bf16.gmra.mrb[12].mxu0 %vm374_vm1, %v7847_v23 }
  0xc5   :  { %800 = vmatprep.mubr.bf16.mxu0 %v7711_v1 }
  0xcc   :  { %6016 = vmatmul.mubr.msk.bf16.gmra.mrb[16].mxu0 %vm374_vm1, %v7867_v31 }
  0xcd   :  { %810 = vmatprep.mubr.bf16.mxu0 %v7711_v1 }
  0xd4   :  { %6017 = vmatmul.mubr.msk.bf16.gmra.mrb[20].mxu0 %vm374_vm1, %v7881_v37 }
  0xd5   :  { %820 = vmatprep.mubr.bf16.mxu0 %v7711_v1 }
  0xdc   :  { %6018 = vmatmul.mubr.msk.bf16.gmra.mrb[24].mxu0 %vm374_vm1, %v7895_v43 }
  0xdd   :  { %830 = vmatprep.mubr.bf16.mxu0 %v7711_v1 }
  0xe4   :  { %6019 = vmatmul.mubr.msk.bf16.gmra.mrb[28].mxu0 %vm374_vm1, %v7912_v50 }
  0xe5   :  { %840 = vmatprep.mubr.bf16.mxu0 %v7711_v1 }
  0xec   :  { %6020 = vmatmul.mubr.msk.bf16.gmra.mrb[32].mxu0 %vm374_vm1, %v7926_v56 }
  0xed   :  { %850 = vmatprep.mubr.bf16.mxu0 %v7711_v1 }
  0xf4   :  { %6021 = vmatmul.mubr.msk.bf16.gmra.mrb[36].mxu0 %vm374_vm1, %v7940_v62 }
  0xf5   :  { %860 = vmatprep.mubr.bf16.mxu0 %v7711_v1 }
  0xfc   :  { %6022 = vmatmul.mubr.msk.bf16.gmra.mrb[40].mxu0 %vm374_vm1, %v7954_v5 }
  0xfd   :  { %870 = vmatprep.mubr.bf16.mxu0 %v7711_v1 }
 0x104   :  { %6023 = vmatmul.mubr.msk.bf16.gmra.mrb[44].mxu0 %vm374_vm1, %v7968_v16 }
 0x105   :  { %880 = vmatprep.mubr.bf16.mxu0 %v7711_v1 }
 0x10c   :  { %6024 = vmatmul.mubr.msk.bf16.gmra.mrb[48].mxu0 %vm374_vm1, %v7982_v27 }
 0x10d   :  { %890 = vmatprep.mubr.bf16.mxu0 %v7711_v1 }
 0x114   :  { %6025 = vmatmul.mubr.msk.bf16.gmra.mrb[52].mxu0 %vm374_vm1, %v7996_v36 }
 0x115   :  { %900 = vmatprep.mubr.bf16.mxu0 %v7711_v1 }
 0x11c   :  { %6026 = vmatmul.mubr.msk.bf16.gmra.mrb[56].mxu0 %vm374_vm1, %v8010_v48 }
 0x11d   :  { %910 = vmatprep.mubr.bf16.mxu0 %v7711_v1 }
 0x124   :  { %6027 = vmatmul.mubr.msk.bf16.gmra.mrb[60].mxu0 %vm374_vm1, %v8024_v60 }
 0x125   :  { %920 = vmatprep.mubr.bf16.mxu0 %v7711_v1 }
 0x12c   :  { %6028 = vmatmul.mubr.msk.bf16.gmra.mrb[64].mxu0 %vm374_vm1, %v8038_v14 }
 0x12d   :  { %930 = vmatprep.mubr.bf16.mxu0 %v7711_v1 }
 0x134   :  { %6029 = vmatmul.mubr.msk.bf16.gmra.mrb[68].mxu0 %vm374_vm1, %v8052_v32 }
 0x135   :  { %940 = vmatprep.mubr.bf16.mxu0 %v7711_v1 }
 0x13c   :  { %6030 = vmatmul.mubr.msk.bf16.gmra.mrb[72].mxu0 %vm374_vm1, %v8066_v55 }
 0x13d   :  { %950 = vmatprep.mubr.bf16.mxu0 %v7711_v1 }
 0x144   :  { %6031 = vmatmul.mubr.msk.bf16.gmra.mrb[80].mxu0 %vm374_vm1, %v6007_v57  ;;  %v973_v57 = vsel %vm968_vm2, %v970_v24, %v972_v7  ;;  %v1415_v24 = vrot.slane %v207_v18, 1  ;;  %v980_v18 = vrot.slane %v7895_v43, 1 }
 0x145   :  { %1120 = vmatprep.mubr.bf16.mxu0 %v7711_v1 }
 0x14c   :  { %6041 = vmatmul.mubr.msk.bf16.vlgmr.msra.gmra.mrb[0].mxu0 %vm374_vm1, %v971_v47  ;;  %v975_v47 = vsel %vm968_vm2, %v972_v7, %v974_v15  ;;  %v978_v7 = vrot.slane %v7881_v37, 1 }
 0x14d   :  { %1577 = vmatpush1.bf16.msra.mxu0 %v7086_v22  ;;  %1130 = vmatprep.mubr.bf16.mxu0 %v7711_v1  ;;  %v976_v22 = vrot.slane %v7867_v31, 1 }
 0x14e   :  { %1578 = vmatprep.subr.bf16.mxu0 %v7091_v61  ;;  %v1416_v61 = vrot.slane %v203_v12, 2  ;;  %v7094_v12 = vld [vmem:[%s9318_s1 + $0x84] ss:$8 sps:$4 sm:$0xff]  }
 0x151   :  { %1579 = vmatpush1.bf16.msra.mxu0 %v7089_v28  ;;  %v977_v28 = vsel %vm968_vm2, %v974_v15, %v976_v22  ;;  %v981_v15 = vsel %vm968_vm2, %v978_v7, %v980_v18 }
 0x152   :  { %2014 = vmatprep.subr.bf16.mxu0 %v7094_v12 }
 0x154   :  { %6042 = vmatmul.mubr.msk.bf16.gmra.mrb[4].mxu0 %vm374_vm1, %v973_v57  ;;  %v8211_v57 = vor.u32 %v1416_v61, %v1415_v24  ;;  %v982_v61 = vrot.slane %v7912_v50, 1 }
 0x155   :  { %1140 = vmatprep.mubr.bf16.mxu0 %v7711_v1 }
 0x15c   :  { %6043 = vmatmul.mubr.msk.bf16.gmra.mrb[8].mxu0 %vm374_vm1, %v975_v47  ;;  %v979_v47 = vsel %vm968_vm2, %v976_v22, %v978_v7  ;;  %v984_v7 = vrot.slane %v7926_v56, 1 }
 0x15d   :  { %1150 = vmatprep.mubr.bf16.mxu0 %v7711_v1 }
 0x15e   :  { %v985_v12 = vsel %vm968_vm2, %v982_v61, %v984_v7 }
 0x164   :  { %6044 = vmatmul.mubr.msk.bf16.gmra.mrb[12].mxu0 %vm374_vm1, %v977_v28 }
 0x165   :  { %1160 = vmatprep.mubr.bf16.mxu0 %v7711_v1 }
 0x16c   :  { %6045 = vmatmul.mubr.msk.bf16.gmra.mrb[16].mxu0 %vm374_vm1, %v979_v47  ;;  %v983_v47 = vsel %vm968_vm2, %v980_v18, %v982_v61  ;;  %v990_v61 = vrot.slane %v7968_v16, 1 }
 0x16d   :  { %1170 = vmatprep.mubr.bf16.mxu0 %v7711_v1 }
 0x174   :  { %6046 = vmatmul.mubr.msk.bf16.gmra.mrb[20].mxu0 %vm374_vm1, %v981_v15  ;;  %v986_v15 = vrot.slane %v7940_v62, 1 }
 0x175   :  { %1180 = vmatprep.mubr.bf16.mxu0 %v7711_v1 }
 0x176   :  { %v987_v44 = vsel %vm968_vm2, %v984_v7, %v986_v15  ;;  %v994_v7 = vrot.slane %v7996_v36, 1 }
 0x177   :  { %v8224_v22 = vpop.f32.mrb[76].mxu0 }
 0x178   :  { %v8226_v24 = vpop.f32.mrb[77].mxu0 }
 0x179   :  { %v663_v28 = vpop.f32.mrb[78].mxu0 }
 0x17a   :  { %v664_v4 = vpop.f32.mrb[79].mxu0 }
 0x17b   :  { %v988_v4 = vrot.slane %v7954_v5, 1 }
 0x17c   :  { %6047 = vmatmul.mubr.msk.bf16.gmra.mrb[24].mxu0 %vm374_vm1, %v983_v47 }
 0x17d   :  { %1190 = vmatprep.mubr.bf16.mxu0 %v7711_v1  ;;  %v989_v18 = vsel %vm968_vm2, %v986_v15, %v988_v4  ;;  %v991_v28 = vsel %vm968_vm2, %v988_v4, %v990_v61  ;;  %v996_v15 = vrot.slane %v8010_v48, 1 }
 0x17f   :  { %v997_v4 = vsel %vm968_vm2, %v994_v7, %v996_v15 }
 0x184   :  { %6048 = vmatmul.mubr.msk.bf16.gmra.mrb[28].mxu0 %vm374_vm1, %v985_v12 }
 0x185   :  { %1200 = vmatprep.mubr.bf16.mxu0 %v7711_v1 }
 0x18c   :  { %6049 = vmatmul.mubr.msk.bf16.gmra.mrb[32].mxu0 %vm374_vm1, %v987_v44  ;;  %v992_v44 = vrot.slane %v7982_v27, 1 }
 0x18d   :  { %1210 = vmatprep.mubr.bf16.mxu0 %v7711_v1 }
 0x18e   :  { %v993_v47 = vsel %vm968_vm2, %v990_v61, %v992_v44  ;;  %v995_v12 = vsel %vm968_vm2, %v992_v44, %v994_v7 }
 0x194   :  { %6050 = vmatmul.mubr.msk.bf16.gmra.mrb[36].mxu0 %vm374_vm1, %v989_v18  ;;  %v998_v18 = vrot.slane %v8024_v60, 1 }
 0x195   :  { %1220 = vmatprep.mubr.bf16.mxu0 %v7711_v1 }
 0x196   :  { %v999_v61 = vsel %vm968_vm2, %v996_v15, %v998_v18 }
 0x19c   :  { %6051 = vmatmul.mubr.msk.bf16.gmra.mrb[40].mxu0 %vm374_vm1, %v991_v28  ;;  %v1000_v28 = vrot.slane %v8038_v14, 1 }
 0x19d   :  { %1230 = vmatprep.mubr.bf16.mxu0 %v7711_v1 }
 0x19e   :  { %v1001_v44 = vsel %vm968_vm2, %v998_v18, %v1000_v28 }
 0x1a4   :  { %6052 = vmatmul.mubr.msk.bf16.gmra.mrb[44].mxu0 %vm374_vm1, %v993_v47  ;;  %v1002_v47 = vrot.slane %v8052_v32, 1 }
 0x1a5   :  { %1240 = vmatprep.mubr.bf16.mxu0 %v7711_v1 }
 0x1a6   :  { %v1003_v7 = vsel %vm968_vm2, %v1000_v28, %v1002_v47  ;;  %v1411_v28 = vshll.u32 %v8176_v49, 16 }
 0x1ac   :  { %6053 = vmatmul.mubr.msk.bf16.gmra.mrb[48].mxu0 %vm374_vm1, %v995_v12  ;;  %v1004_v12 = vrot.slane %v8066_v55, 1 }
 0x1ad   :  { %1250 = vmatprep.mubr.bf16.mxu0 %v7711_v1 }
 0x1ae   :  { %v1005_v15 = vsel %vm968_vm2, %v1002_v47, %v1004_v12 }
 0x1b4   :  { %6054 = vmatmul.mubr.msk.bf16.gmra.mrb[52].mxu0 %vm374_vm1, %v997_v4  ;;  %v1006_v4 = vrot.slane %v8086_v35, 1 }
 0x1b5   :  { %1260 = vmatprep.mubr.bf16.mxu0 %v7711_v1 }
 0x1b6   :  { %v1007_v18 = vsel %vm968_vm2, %v1004_v12, %v1006_v4  ;;  %v7092_v12 = vld [vmem:[%s9318_s1 + $0x80] ss:$8 sps:$4 sm:$0xff]  }
 0x1bc   :  { %6055 = vmatmul.mubr.msk.bf16.gmra.mrb[56].mxu0 %vm374_vm1, %v999_v61  ;;  %v1408_v61 = vshrl.u32 %v8176_v49, 16  ;;  %v1420_v49 = vrot.slane %v211_v19, 2  ;;  %v1423_v19 = vrot.slane %v223_v33, 1 }
 0x1bd   :  { %1270 = vmatprep.mubr.bf16.mxu0 %v7711_v1 }
 0x1c4   :  { %6056 = vmatmul.mubr.msk.bf16.gmra.mrb[60].mxu0 %vm374_vm1, %v1001_v44  ;;  %v1410_v44 = vrot.slane %v1408_v61, 1  ;;  %v7095_v61 = vld [vmem:[%s9318_s1 + $0x90] ss:$8 sps:$4 sm:$0xff]  }
 0x1c5   :  { %1280 = vmatprep.mubr.bf16.mxu0 %v7711_v1 }
 0x1cc   :  { %6057 = vmatmul.mubr.msk.bf16.gmra.mrb[64].mxu0 %vm374_vm1, %v1003_v7  ;;  %v1413_v7 = vrot.slane %v1411_v28, 2  ;;  %v1424_v28 = vrot.slane %v219_v26, 2 }
 0x1cd   :  { %1290 = vmatprep.mubr.bf16.mxu0 %v7711_v1 }
 0x1ce   :  { %v1414_v47 = vor.u32 %v1413_v7, %v1410_v44  ;;  %v1425_v44 = vor.u32 %v1424_v28, %v1423_v19 }
 0x1d0   :  { %v1418_v35 = vsel %vm1406_vm3, %v1414_v47, %v8211_v57  ;;  %v1427_v47 = vrot.slane %v231_v39, 1 }
 0x1d4   :  { %6058 = vmatmul.mubr.msk.bf16.gmra.mrb[68].mxu0 %vm374_vm1, %v1005_v15  ;;  %v1419_v15 = vrot.slane %v215_v25, 1 }
 0x1d5   :  { %1300 = vmatprep.mubr.bf16.mxu0 %v7711_v1 }
 0x1dc   :  { %6059 = vmatmul.mubr.msk.bf16.gmra.mrb[72].mxu0 %vm374_vm1, %v1007_v18  ;;  %v1421_v18 = vor.u32 %v1420_v49, %v1419_v15  ;;  %v1435_v15 = vrot.slane %v247_v52, 1  ;;  %v1436_v49 = vrot.slane %v243_v46, 2 }
 0x1dd   :  { %1310 = vmatprep.mubr.bf16.mxu0 %v7711_v1 }
 0x1de   :  { %v1422_v25 = vsel %vm1406_vm3, %v8211_v57, %v1421_v18  ;;  %v1426_v7 = vsel %vm1406_vm3, %v1421_v18, %v1425_v44  ;;  %v1428_v57 = vrot.slane %v227_v34, 2  ;;  %v1440_v18 = vrot.slane %v251_v53, 2 }
 0x1df   :  { %v1444_v53 = vrot.slane %v259_v59, 2 }
 0x1e0   :  { %v1429_v33 = vor.u32 %v1428_v57, %v1427_v47  ;;  %v1448_v57 = vrot.slane %v267_v2, 2 }
 0x1e2   :  { %v1430_v26 = vsel %vm1406_vm3, %v1425_v44, %v1429_v33 }
 0x1e4   :  { %6060 = vmatmul.mubr.msk.bf16.gmra.mrb[84].mxu0 %vm374_vm1, %v1006_v4  ;;  %v7097_v4 = vld [vmem:[%s9318_s1 + $0x94] ss:$8 sps:$4 sm:$0xff]   ;;  %s7714_s1 = smov 32  }
 0x1e5   :  { %1608 = vmatprep.mubr.bf16.mxu0 %v7711_v1 }
 0x1ec   :  { %6070 = vmatmul.mubr.msk.bf16.vlgmr.msra.gmra.mrb[0].mxu0 %vm374_vm1, %v1418_v35  ;;  %v1431_v35 = vrot.slane %v239_v45, 1  ;;  %v1437_v45 = vor.u32 %v1436_v49, %v1435_v15  ;;  %v1463_v15 = vrot.slane %v303_v51, 1  ;;  %v1464_v49 = vrot.slane %v299_v42, 2 }
 0x1ed   :  { %2015 = vmatpush1.bf16.msra.mxu0 %v7092_v12  ;;  %1618 = vmatprep.mubr.bf16.mxu0 %v7711_v1  ;;  %v1432_v12 = vrot.slane %v235_v40, 2 }
 0x1ee   :  { %2016 = vmatprep.subr.bf16.mxu0 %v7097_v4  ;;  %v1439_v4 = vrot.slane %v255_v58, 1  ;;  %v1443_v58 = vrot.slane %v263_v0, 1 }
 0x1ef   :  { %v1433_v39 = vor.u32 %v1432_v12, %v1431_v35  ;;  %v1455_v35 = vrot.slane %v287_v29, 1  ;;  %v1456_v12 = vrot.slane %v283_v21, 2 }
 0x1f0   :  { %v1441_v52 = vor.u32 %v1440_v18, %v1439_v4  ;;  %v1471_v4 = vrot.slane %v319_v17, 1  ;;  %v1472_v18 = vrot.slane %v315_v3, 2 }
 0x1f1   :  { %2017 = vmatpush1.bf16.msra.mxu0 %v7095_v61  ;;  %v1434_v34 = vsel %vm1406_vm3, %v1429_v33, %v1433_v39  ;;  %v1438_v40 = vsel %vm1406_vm3, %v1433_v39, %v1437_v45  ;;  %v1451_v33 = vrot.slane %v279_v20, 1  ;;  %v1457_v20 = vor.u32 %v1456_v12, %v1455_v35 }
 0x1f2   :  { %v1442_v44 = vsel %vm1406_vm3, %v1437_v45, %v1441_v52  ;;  %v1459_v39 = vrot.slane %v295_v41, 1  ;;  %v1465_v41 = vor.u32 %v1464_v49, %v1463_v15  ;;  %v1467_v45 = vrot.slane %v311_v63, 1 }
 0x1f3   :  { %v1473_v63 = vor.u32 %v1472_v18, %v1471_v4  ;;  %v1898_v15 = vrot.slane %v7828_v13, 2  ;;  %v1904_v13 = vrot.slane %v7881_v37, 2 }
 0x1f4   :  { %6071 = vmatmul.mubr.msk.bf16.gmra.mrb[4].mxu0 %vm374_vm1, %v1422_v25 }
 0x1f5   :  { %1628 = vmatprep.mubr.bf16.mxu0 %v7711_v1 }
 0x1fc   :  { %6072 = vmatmul.mubr.msk.bf16.gmra.mrb[8].mxu0 %vm374_vm1, %v1426_v7 }
 0x1fd   :  { %1638 = vmatprep.mubr.bf16.mxu0 %v7711_v1 }
 0x204   :  { %6073 = vmatmul.mubr.msk.bf16.gmra.mrb[12].mxu0 %vm374_vm1, %v1430_v26  ;;  %v1452_v26 = vrot.slane %v275_v11, 2 }
 0x205   :  { %1648 = vmatprep.mubr.bf16.mxu0 %v7711_v1 }
 0x20c   :  { %6074 = vmatmul.mubr.msk.bf16.gmra.mrb[16].mxu0 %vm374_vm1, %v1434_v34  ;;  %v1460_v34 = vrot.slane %v291_v30, 2 }
 0x20d   :  { %1658 = vmatprep.mubr.bf16.mxu0 %v7711_v1 }
 0x20e   :  { %v1461_v29 = vor.u32 %v1460_v34, %v1459_v39 }
 0x210   :  { %v1462_v21 = vsel %vm1406_vm3, %v1457_v20, %v1461_v29  ;;  %v1466_v30 = vsel %vm1406_vm3, %v1461_v29, %v1465_v41  ;;  %v1896_v29 = vrot.slane %v7817_v8, 2  ;;  %v1902_v8 = vrot.slane %v7867_v31, 2 }
 0x211   :  { %v1908_v31 = vrot.slane %v7912_v50, 2 }
 0x212   :  { %v1899_v49 = vsel %vm1894_vm4, %v1896_v29, %v1898_v15 }
 0x214   :  { %6075 = vmatmul.mubr.msk.bf16.gmra.mrb[20].mxu0 %vm374_vm1, %v1438_v40  ;;  %v1468_v40 = vrot.slane %v307_v54, 2 }
 0x215   :  { %1668 = vmatprep.mubr.bf16.mxu0 %v7711_v1 }
 0x216   :  { %v1469_v51 = vor.u32 %v1468_v40, %v1467_v45  ;;  %v1905_v45 = vsel %vm1894_vm4, %v1902_v8, %v1904_v13 }
 0x217   :  { %v952_v61 = vpop.f32.mrb[80].mxu0 }
 0x218   :  { %v8337_v46 = vadd.f32 %v952_v61, %v8224_v22  ;;  %v954_v25 = vpop.f32.mrb[81].mxu0  ;;  %v1445_v22 = vor.u32 %v1444_v53, %v1443_v58  ;;  %v1470_v42 = vsel %vm1406_vm3, %v1465_v41, %v1469_v51  ;;  %v1474_v54 = vsel %vm1406_vm3, %v1469_v51, %v1473_v63 }
 0x219   :  { %v8340_v19 = vadd.f32 %v954_v25, %v8226_v24  ;;  %v956_v28 = vpop.f32.mrb[82].mxu0  ;;  %v1447_v24 = vrot.slane %v271_v10, 1  ;;  %v1453_v10 = vor.u32 %v1452_v26, %v1451_v33  ;;  %v9337_v61 = vshll.u32 %v8038_v14, 16 }
 0x21a   :  { %v957_v7 = vpop.f32.mrb[83].mxu0  ;;  %v1446_v47 = vsel %vm1406_vm3, %v1441_v52, %v1445_v22  ;;  %v1475_v52 = vrot.slane %v327_v38, 1  ;;  %v9338_v28 = vshrl.u32 %v8052_v32, 16  ;;  %v9339_v58 = vshll.u32 %v8052_v32, 16 }
 0x21b   :  { %v1449_v0 = vor.u32 %v1448_v57, %v1447_v24  ;;  %v1458_v11 = vsel %vm1406_vm3, %v1453_v10, %v1457_v20  ;;  %v1476_v25 = vrot.slane %v9337_v61, 2  ;;  %v1397_v7 = vld [vmem:[%s9319_s0 + $0x9c] sm:$0x3]  ;;  %v9341_v57 = vshll.u32 %v8066_v55, 16 }
 0x21c   :  { %6076 = vmatmul.mubr.msk.bf16.gmra.mrb[24].mxu0 %vm374_vm1, %v1442_v44  ;;  %v1479_v44 = vrot.slane %v9338_v28, 1  ;;  %v1480_v53 = vrot.slane %v9339_v58, 2  ;;  %v7103_v28 = vld [vmem:[%s9320_s3 + $0x18] sm:$0xff]  }
 0x21d   :  { %1678 = vmatprep.mubr.bf16.mxu0 %v7711_v1  ;;  %v1450_v59 = vsel %vm1406_vm3, %v1445_v22, %v1449_v0  ;;  %v1454_v2 = vsel %vm1406_vm3, %v1449_v0, %v1453_v10  ;;  %v1477_v17 = vor.u32 %v1476_v25, %v1475_v52  ;;  %v1484_v0 = vrot.slane %v9341_v57, 2  ;;  %v7109_v57 = vld [vmem:[%s9320_s3 + $0x48] sm:$0xff]  }
 0x21e   :  { %v1481_v38 = vor.u32 %v1480_v53, %v1479_v44  ;;  %v1914_v52 = vrot.slane %v7954_v5, 2  ;;  %v7101_v5 = vld [vmem:[%s9320_s3 + $0x8] sm:$0xff]   ;;  %v7104_v44 = vld [vmem:[%s9320_s3 + $0x20] sm:$0xff]  }
 0x21f   :  { %v1478_v3 = vsel %vm1406_vm3, %v1473_v63, %v1477_v17  ;;  %v7105_v53 = vld [vmem:[%s9320_s3 + $0x28] sm:$0xff]  }
 0x220   :  { %v1482_v22 = vsel %vm1406_vm3, %v1477_v17, %v1481_v38  ;;  %v7102_v17 = vld [vmem:[%s9320_s3 + $0x10] sm:$0xff]  }
 0x224   :  { %6077 = vmatmul.mubr.msk.bf16.gmra.mrb[28].mxu0 %vm374_vm1, %v1446_v47  ;;  %v9340_v47 = vshrl.u32 %v8066_v55, 16 }
 0x225   :  { %1688 = vmatprep.mubr.bf16.mxu0 %v7711_v1 }
 0x226   :  { %v1483_v24 = vrot.slane %v9340_v47, 1  ;;  %v7108_v47 = vld [vmem:[%s9320_s3 + $0x40] sm:$0xff]  }
 0x228   :  { %v1485_v33 = vor.u32 %v1484_v0, %v1483_v24  ;;  %v7110_v0 = vld [vmem:[%s9320_s3 + $0x50] ss:$0 sps:$4 sm:$0xff]  }
 0x22c   :  { %6078 = vmatmul.mubr.msk.bf16.gmra.mrb[32].mxu0 %vm374_vm1, %v1450_v59  ;;  %v8421_v59 = vcombine.low %v8074_v9, %v1397_v7 }
 0x22d   :  { %1698 = vmatprep.mubr.bf16.mxu0 %v7711_v1 }
 0x22e   :  { %v1488_v26 = vshrl.u32 %v8421_v59, 16  ;;  %v1491_v10 = vshll.u32 %v8421_v59, 16 }
 0x230   :  { %v1490_v35 = vrot.slane %v1488_v26, 1  ;;  %v1493_v12 = vrot.slane %v1491_v10, 2  ;;  %v1928_v10 = vrot.slane %v8052_v32, 2  ;;  %v2325_v32 = vlaneseq }
 0x232   :  { %v1494_v20 = vor.u32 %v1493_v12, %v1490_v35  ;;  %v1932_v12 = vrot.slane %v8421_v59, 2 }
 0x234   :  { %6079 = vmatmul.mubr.msk.bf16.gmra.mrb[36].mxu0 %vm374_vm1, %v1454_v2  ;;  %v1486_v2 = vsel %vm1406_vm3, %v1481_v38, %v1485_v33  ;;  %v1495_v9 = vsel %vm1406_vm3, %v1485_v33, %v1494_v20  ;;  %v7106_v38 = vld [vmem:[%s9320_s3 + $0x30] sm:$0xff]   ;;  %v3068_v33 = vsel %vm3066_vm5, %v7110_v0, 0 }
 0x235   :  { %1708 = vmatprep.mubr.bf16.mxu0 %v7711_v1 }
 0x23c   :  { %6080 = vmatmul.mubr.msk.bf16.gmra.mrb[40].mxu0 %vm374_vm1, %v1458_v11  ;;  %v1885_v11 = vld [vmem:[%s9319_s0] sm:$0xc] }
 0x23d   :  { %1718 = vmatprep.mubr.bf16.mxu0 %v7711_v1  ;;  %v6094_v39 = vcombine.low %v1885_v11, %v7809_v6  ;;  %v1900_v6 = vrot.slane %v7847_v23, 2  ;;  %v1906_v23 = vrot.slane %v7895_v43, 2 }
 0x23f   :  { %v1895_v34 = vrot.slane %v6094_v39, 2  ;;  %v1901_v41 = vsel %vm1894_vm4, %v1898_v15, %v1900_v6  ;;  %v1907_v40 = vsel %vm1894_vm4, %v1904_v13, %v1906_v23  ;;  %v1909_v63 = vsel %vm1894_vm4, %v1906_v23, %v1908_v31 }
 0x244   :  { %6081 = vmatmul.mubr.msk.bf16.gmra.mrb[44].mxu0 %vm374_vm1, %v1462_v21  ;;  %v1897_v21 = vsel %vm1894_vm4, %v1895_v34, %v1896_v29 }
 0x245   :  { %1728 = vmatprep.mubr.bf16.mxu0 %v7711_v1 }
 0x24c   :  { %6082 = vmatmul.mubr.msk.bf16.gmra.mrb[48].mxu0 %vm374_vm1, %v1466_v30  ;;  %v1903_v30 = vsel %vm1894_vm4, %v1900_v6, %v1902_v8 }
 0x24d   :  { %1738 = vmatprep.mubr.bf16.mxu0 %v7711_v1 }
 0x254   :  { %6083 = vmatmul.mubr.msk.bf16.gmra.mrb[52].mxu0 %vm374_vm1, %v1470_v42 }
 0x255   :  { %1748 = vmatprep.mubr.bf16.mxu0 %v7711_v1 }
 0x25c   :  { %6084 = vmatmul.mubr.msk.bf16.gmra.mrb[56].mxu0 %vm374_vm1, %v1474_v54  ;;  %v1910_v54 = vrot.slane %v7926_v56, 2  ;;  %v1916_v56 = vrot.slane %v7968_v16, 2  ;;  %v1918_v16 = vrot.slane %v7982_v27, 2  ;;  %v1920_v27 = vrot.slane %v7996_v36, 2 }
 0x25d   :  { %1758 = vmatprep.mubr.bf16.mxu0 %v7711_v1  ;;  %v1922_v36 = vrot.slane %v8010_v48, 2  ;;  %v1924_v48 = vrot.slane %v8024_v60, 2  ;;  %v1926_v60 = vrot.slane %v8038_v14, 2 }
 0x25e   :  { %v1911_v50 = vsel %vm1894_vm4, %v1908_v31, %v1910_v54  ;;  %v1917_v25 = vsel %vm1894_vm4, %v1914_v52, %v1916_v56  ;;  %v1921_v58 = vsel %vm1894_vm4, %v1918_v16, %v1920_v27 }
 0x25f   :  { %v1923_v7 = vsel %vm1894_vm4, %v1920_v27, %v1922_v36  ;;  %v1925_v24 = vsel %vm1894_vm4, %v1922_v36, %v1924_v48  ;;  %v1927_v26 = vsel %vm1894_vm4, %v1924_v48, %v1926_v60  ;;  %v1929_v14 = vsel %vm1894_vm4, %v1926_v60, %v1928_v10 }
 0x264   :  { %6085 = vmatmul.mubr.msk.bf16.gmra.mrb[60].mxu0 %vm374_vm1, %v1478_v3  ;;  %v1919_v3 = vsel %vm1894_vm4, %v1916_v56, %v1918_v16 }
 0x265   :  { %1768 = vmatprep.mubr.bf16.mxu0 %v7711_v1 }
 0x26c   :  { %6086 = vmatmul.mubr.msk.bf16.gmra.mrb[64].mxu0 %vm374_vm1, %v1482_v22  ;;  %v7107_v22 = vld [vmem:[%s9320_s3 + $0x38] sm:$0xff]  }
 0x26d   :  { %1778 = vmatprep.mubr.bf16.mxu0 %v7711_v1 }
 0x274   :  { %6087 = vmatmul.mubr.msk.bf16.gmra.mrb[68].mxu0 %vm374_vm1, %v1486_v2  ;;  %v1930_v2 = vrot.slane %v8066_v55, 2 }
 0x275   :  { %1788 = vmatprep.mubr.bf16.mxu0 %v7711_v1 }
 0x276   :  { %v1931_v35 = vsel %vm1894_vm4, %v1928_v10, %v1930_v2 }
 0x27c   :  { %6088 = vmatmul.mubr.msk.bf16.gmra.mrb[72].mxu0 %vm374_vm1, %v1495_v9  ;;  %v8566_v9 = vshrl.u32 %v2325_v32, 7 }
 0x27d   :  { %1798 = vmatprep.mubr.bf16.mxu0 %v7711_v1 }
 0x27e   :  { %v2327_v34 = vsub.s32 0, %v8566_v9  ;;  %v2331_v15 = vsub.s32 1, %v8566_v9 }
 0x284   :  { %6089 = vmatmul.mubr.msk.bf16.gmra.mrb[88].mxu0 %vm374_vm1, %v1494_v20  ;;  %v1933_v20 = vsel %vm1894_vm4, %v1930_v2, %v1932_v12 }
 0x285   :  { %2046 = vmatprep.mubr.bf16.mxu0 %v7711_v1 }
 0x28c   :  { %6099 = vmatmul.mubr.msk.bf16.vlgmr.msra.gmra.mrb[0].mxu0 %vm374_vm1, %v1897_v21  ;;  %v2323_v21 = vld [vmem:[%s9321_s2] sm:$0x3] }
 0x28d   :  { %2056 = vmatprep.mubr.bf16.mxu0 %v7711_v1  ;;  %v8581_v6 = vrot.slane %v2323_v21, %v2327_v34 }
 0x294   :  { %6100 = vmatmul.mubr.msk.bf16.gmra.mrb[4].mxu0 %vm374_vm1, %v1899_v49 }
 0x295   :  { %2066 = vmatprep.mubr.bf16.mxu0 %v7711_v1 }
 0x29c   :  { %6101 = vmatmul.mubr.msk.bf16.gmra.mrb[8].mxu0 %vm374_vm1, %v1901_v41  ;;  %v8585_v41 = vrot.slane %v2323_v21, %v2331_v15 }
 0x29d   :  { %2076 = vmatprep.mubr.bf16.mxu0 %v7711_v1 }
 0x2a4   :  { %6102 = vmatmul.mubr.msk.bf16.gmra.mrb[12].mxu0 %vm374_vm1, %v1903_v30 }
 0x2a5   :  { %2086 = vmatprep.mubr.bf16.mxu0 %v7711_v1 }
 0x2ac   :  { %6103 = vmatmul.mubr.msk.bf16.gmra.mrb[16].mxu0 %vm374_vm1, %v1905_v45 }
 0x2ad   :  { %2096 = vmatprep.mubr.bf16.mxu0 %v7711_v1 }
 0x2b4   :  { %6104 = vmatmul.mubr.msk.bf16.gmra.mrb[20].mxu0 %vm374_vm1, %v1907_v40 }
 0x2b5   :  { %2106 = vmatprep.mubr.bf16.mxu0 %v7711_v1 }
 0x2b7   :  { %v1312_v51 = vpop.f32.mrb[84].mxu0 }
 0x2b8   :  { %v8465_v42 = vadd.f32 %v1312_v51, %v8337_v46  ;;  %v1314_v37 = vpop.f32.mrb[85].mxu0  ;;  %v1912_v46 = vrot.slane %v7940_v62, 2  ;;  %v7100_v62 = vld [vmem:[%s9320_s3] sm:$0xff]  }
 0x2b9   :  { %v8468_v4 = vadd.f32 %v1314_v37, %v8340_v19  ;;  %v1316_v18 = vpop.f32.mrb[86].mxu0  ;;  %3071 = vmatpush1.bf16.msra.mxu1 %v7100_v62 }
 0x2ba   :  { %v1317_v43 = vpop.f32.mrb[87].mxu0  ;;  %v1913_v19 = vsel %vm1894_vm4, %v1910_v54, %v1912_v46  ;;  %v1915_v61 = vsel %vm1894_vm4, %v1912_v46, %v1914_v52  ;;  %3072 = vmatprep.subr.bf16.mxu1 %v7711_v1 }
 0x2bc   :  { %6105 = vmatmul.mubr.msk.bf16.gmra.mrb[24].mxu0 %vm374_vm1, %v1909_v63 }
 0x2bd   :  { %2116 = vmatprep.mubr.bf16.mxu0 %v7711_v1  ;;  %3073 = vmatpush1.bf16.msra.mxu1 %v7101_v5 }
 0x2be   :  { %3074 = vmatprep.subr.bf16.mxu1 %v7711_v1 }
 0x2c1   :  { %3075 = vmatpush1.bf16.msra.mxu1 %v7102_v17 }
 0x2c2   :  { %3076 = vmatprep.subr.bf16.mxu1 %v7711_v1 }
 0x2c4   :  { %6106 = vmatmul.mubr.msk.bf16.gmra.mrb[28].mxu0 %vm374_vm1, %v1911_v50 }
 0x2c5   :  { %2126 = vmatprep.mubr.bf16.mxu0 %v7711_v1  ;;  %3077 = vmatpush1.bf16.msra.mxu1 %v7103_v28 }
 0x2c6   :  { %3078 = vmatprep.subr.bf16.mxu1 %v7711_v1 }
 0x2c9   :  { %3079 = vmatpush1.bf16.msra.mxu1 %v7104_v44 }
 0x2ca   :  { %3080 = vmatprep.subr.bf16.mxu1 %v7711_v1 }
 0x2cc   :  { %6107 = vmatmul.mubr.msk.bf16.gmra.mrb[32].mxu0 %vm374_vm1, %v1913_v19 }
 0x2cd   :  { %2136 = vmatprep.mubr.bf16.mxu0 %v7711_v1  ;;  %3081 = vmatpush1.bf16.msra.mxu1 %v7105_v53 }
 0x2ce   :  { %3082 = vmatprep.subr.bf16.mxu1 %v7711_v1 }
 0x2d1   :  { %3083 = vmatpush1.bf16.msra.mxu1 %v7106_v38 }
 0x2d2   :  { %3084 = vmatprep.subr.bf16.mxu1 %v7711_v1 }
 0x2d4   :  { %6108 = vmatmul.mubr.msk.bf16.gmra.mrb[36].mxu0 %vm374_vm1, %v1915_v61 }
 0x2d5   :  { %2146 = vmatprep.mubr.bf16.mxu0 %v7711_v1  ;;  %3085 = vmatpush1.bf16.msra.mxu1 %v7107_v22 }
 0x2d6   :  { %3086 = vmatprep.subr.bf16.mxu1 %v7711_v1 }
 0x2d9   :  { %3087 = vmatpush1.bf16.msra.mxu1 %v7108_v47 }
 0x2da   :  { %3088 = vmatprep.subr.bf16.mxu1 %v7711_v1 }
 0x2dc   :  { %6109 = vmatmul.mubr.msk.bf16.gmra.mrb[40].mxu0 %vm374_vm1, %v1917_v25 }
 0x2dd   :  { %2156 = vmatprep.mubr.bf16.mxu0 %v7711_v1  ;;  %3089 = vmatpush1.bf16.msra.mxu1 %v7109_v57 }
 0x2de   :  { %3090 = vmatprep.subr.bf16.mxu1 %v7711_v1 }
 0x2e1   :  { %3091 = vmatpush1.bf16.msra.mxu1 %v3068_v33 }
 0x2e4   :  { %6110 = vmatmul.mubr.msk.bf16.gmra.mrb[44].mxu0 %vm374_vm1, %v1919_v3 }
 0x2e5   :  { %2166 = vmatprep.mubr.bf16.mxu0 %v7711_v1 }
 0x2ec   :  { %6111 = vmatmul.mubr.msk.bf16.gmra.mrb[48].mxu0 %vm374_vm1, %v1921_v58 }
 0x2ed   :  { %2176 = vmatprep.mubr.bf16.mxu0 %v7711_v1 }
 0x2f4   :  { %6112 = vmatmul.mubr.msk.bf16.gmra.mrb[52].mxu0 %vm374_vm1, %v1923_v7 }
 0x2f5   :  { %2186 = vmatprep.mubr.bf16.mxu0 %v7711_v1 }
 0x2fc   :  { %6113 = vmatmul.mubr.msk.bf16.gmra.mrb[56].mxu0 %vm374_vm1, %v1925_v24 }
 0x2fd   :  { %2196 = vmatprep.mubr.bf16.mxu0 %v7711_v1 }
 0x304   :  { %6114 = vmatmul.mubr.msk.bf16.gmra.mrb[60].mxu0 %vm374_vm1, %v1927_v26 }
 0x305   :  { %2206 = vmatprep.mubr.bf16.mxu0 %v7711_v1 }
 0x30c   :  { %6115 = vmatmul.mubr.msk.bf16.gmra.mrb[64].mxu0 %vm374_vm1, %v1929_v14 }
 0x30d   :  { %2216 = vmatprep.mubr.bf16.mxu0 %v7711_v1 }
 0x314   :  { %6116 = vmatmul.mubr.msk.bf16.gmra.mrb[68].mxu0 %vm374_vm1, %v1931_v35 }
 0x315   :  { %2226 = vmatprep.mubr.bf16.mxu0 %v7711_v1 }
 0x31c   :  { %6117 = vmatmul.mubr.msk.bf16.gmra.mrb[72].mxu0 %vm374_vm1, %v1933_v20 }
 0x31d   :  { %2236 = vmatprep.mubr.bf16.mxu0 %v7711_v1 }
 0x324   :  { %6118 = vmatmul.mubr.msk.bf16.gmra.mrb[92].mxu0 %vm374_vm1, %v1932_v12 }
 0x357   :  { %v1800_v55 = vpop.f32.mrb[88].mxu0 }
 0x358   :  { %v8569_v11 = vadd.f32 %v1800_v55, %v8465_v42  ;;  %v1802_v39 = vpop.f32.mrb[89].mxu0 }
 0x359   :  { %v8573_v59 = vadd.f32 %v1802_v39, %v8468_v4  ;;  %v1804_v29 = vpop.f32.mrb[90].mxu0 }
 0x35a   :  { %v1805_v49 = vpop.f32.mrb[91].mxu0 }
 0x35f   :  { %v2048_v8 = vpop.f32.mrb[0].mxu0 }
 0x360   :  { %v2335_v30 = vadd.f32 %v8581_v6, %v2048_v8  ;;  %v2050_v13 = vpop.f32.mrb[1].mxu0 }
 0x361   :  { %v2336_v45 = vadd.f32 %v8585_v41, %v2050_v13  ;;  %v2052_v23 = vpop.f32.mrb[2].mxu0 }
 0x362   :  { %v6119_v40 = vmul.f32 -1.442695, %v2335_v30  ;;  %v2337_v31 = vadd.f32 %v8581_v6, %v2052_v23  ;;  %v2054_v51 = vpop.f32.mrb[3].mxu0 }
 0x363   :  { %v6120_v42 = vmul.f32 -1.442695, %v2336_v45  ;;  %v2338_v37 = vadd.f32 %v8585_v41, %v2054_v51 }
 0x364   :  { %7239 = vpow2.f32 %v6119_v40  ;;  %v6121_v4 = vmul.f32 -1.442695, %v2337_v31 }
 0x365   :  { %7241 = vpow2.f32 %v6120_v42  ;;  %v6122_v18 = vmul.f32 -1.442695, %v2338_v37 }
 0x366   :  { %7243 = vpow2.f32 %v6121_v4 }
 0x367   :  { %7245 = vpow2.f32 %v6122_v18  ;;  %v2058_v63 = vpop.f32.mrb[4].mxu0 }
 0x368   :  { %v2339_v43 = vadd.f32 %v8581_v6, %v2058_v63  ;;  %v2060_v54 = vpop.f32.mrb[5].mxu0 }
 0x369   :  { %v2340_v50 = vadd.f32 %v8585_v41, %v2060_v54  ;;  %v2062_v46 = vpop.f32.mrb[6].mxu0 }
 0x36a   :  { %v6123_v19 = vmul.f32 -1.442695, %v2339_v43  ;;  %v2341_v52 = vadd.f32 %v8581_v6, %v2062_v46  ;;  %v2064_v61 = vpop.f32.mrb[7].mxu0 }
 0x36b   :  { %v6124_v56 = vmul.f32 -1.442695, %v2340_v50  ;;  %v2342_v62 = vadd.f32 %v8585_v41, %v2064_v61 }
 0x36c   :  { %7247 = vpow2.f32 %v6123_v19  ;;  %v6125_v25 = vmul.f32 -1.442695, %v2341_v52 }
 0x36d   :  { %7249 = vpow2.f32 %v6124_v56  ;;  %v6126_v5 = vmul.f32 -1.442695, %v2342_v62 }
 0x36e   :  { %v7240_v16 = vpop.eup %7239  ;;  %7251 = vpow2.f32 %v6125_v25 }
 0x36f   :  { %v7242_v17 = vpop.eup %7241  ;;  %v2647_v3 = vadd.f32 1.0, %v7240_v16  ;;  %7253 = vpow2.f32 %v6126_v5  ;;  %v2068_v28 = vpop.f32.mrb[8].mxu0 }
 0x370   :  { %v7244_v27 = vpop.eup %7243  ;;  %v2648_v44 = vadd.f32 1.0, %v7242_v17  ;;  %v2343_v58 = vadd.f32 %v8581_v6, %v2068_v28  ;;  %v2070_v53 = vpop.f32.mrb[9].mxu0 }
 0x371   :  { %v7246_v36 = vpop.eup %7245  ;;  %7255 = vrcp.f32 %v2647_v3  ;;  %v2649_v38 = vadd.f32 1.0, %v7244_v27  ;;  %v2344_v7 = vadd.f32 %v8585_v41, %v2070_v53  ;;  %v2072_v22 = vpop.f32.mrb[10].mxu0 }
 0x372   :  { %7257 = vrcp.f32 %v2648_v44  ;;  %v2650_v48 = vadd.f32 1.0, %v7246_v36  ;;  %v6127_v47 = vmul.f32 -1.442695, %v2343_v58  ;;  %v2345_v24 = vadd.f32 %v8581_v6, %v2072_v22  ;;  %v2074_v57 = vpop.f32.mrb[11].mxu0 }
 0x373   :  { %7259 = vrcp.f32 %v2649_v38  ;;  %v6128_v60 = vmul.f32 -1.442695, %v2344_v7  ;;  %v2346_v0 = vadd.f32 %v8585_v41, %v2074_v57 }
 0x374   :  { %7261 = vrcp.f32 %v2650_v48  ;;  %v6129_v33 = vmul.f32 -1.442695, %v2345_v24 }
 0x375   :  { %7263 = vpow2.f32 %v6127_v47  ;;  %v6130_v26 = vmul.f32 -1.442695, %v2346_v0 }
 0x376   :  { %v7248_v10 = vpop.eup %7247  ;;  %7265 = vpow2.f32 %v6128_v60 }
 0x377   :  { %v7250_v14 = vpop.eup %7249  ;;  %v2651_v2 = vadd.f32 1.0, %v7248_v10  ;;  %7267 = vpow2.f32 %v6129_v33  ;;  %v2078_v35 = vpop.f32.mrb[12].mxu0 }
 0x378   :  { %v7252_v12 = vpop.eup %7251  ;;  %v2652_v20 = vadd.f32 1.0, %v7250_v14  ;;  %7269 = vpow2.f32 %v6130_v26  ;;  %v2347_v32 = vadd.f32 %v8581_v6, %v2078_v35  ;;  %v2080_v55 = vpop.f32.mrb[13].mxu0 }
 0x379   :  { %v7254_v39 = vpop.eup %7253  ;;  %7271 = vrcp.f32 %v2651_v2  ;;  %v2653_v29 = vadd.f32 1.0, %v7252_v12  ;;  %v2348_v21 = vadd.f32 %v8585_v41, %v2080_v55  ;;  %v2082_v49 = vpop.f32.mrb[14].mxu0 }
 0x37a   :  { %7273 = vrcp.f32 %v2652_v20  ;;  %v2654_v8 = vadd.f32 1.0, %v7254_v39  ;;  %v6131_v30 = vmul.f32 -1.442695, %v2347_v32  ;;  %v2349_v13 = vadd.f32 %v8581_v6, %v2082_v49  ;;  %v2084_v45 = vpop.f32.mrb[15].mxu0 }
 0x37b   :  { %v7256_v23 = vpop.eup %7255  ;;  %7275 = vrcp.f32 %v2653_v29  ;;  %v6132_v40 = vmul.f32 -1.442695, %v2348_v21  ;;  %v2350_v31 = vadd.f32 %v8585_v41, %v2084_v45 }
 0x37c   :  { %v7258_v51 = vpop.eup %7257  ;;  %7277 = vrcp.f32 %v2654_v8  ;;  %v6133_v42 = vmul.f32 -1.442695, %v2349_v13 }
 0x37d   :  { %v7260_v37 = vpop.eup %7259  ;;  %7279 = vpow2.f32 %v6131_v30  ;;  %v6134_v4 = vmul.f32 -1.442695, %v2350_v31 }
 0x37e   :  { %v7262_v18 = vpop.eup %7261  ;;  %7281 = vpow2.f32 %v6132_v40  ;;  %v2881_v63 = vpack.c.bf16 %v7260_v37, %v7256_v23 }
 0x37f   :  { %v7264_v43 = vpop.eup %7263  ;;  %7283 = vpow2.f32 %v6133_v42  ;;  %v2088_v54 = vpop.f32.mrb[16].mxu0  ;;  %v2882_v50 = vpack.c.bf16 %v7262_v18, %v7258_v51 }
 0x380   :  { %v7266_v46 = vpop.eup %7265  ;;  %v2655_v19 = vadd.f32 1.0, %v7264_v43  ;;  %7285 = vpow2.f32 %v6134_v4  ;;  %v2351_v52 = vadd.f32 %v8581_v6, %v2088_v54  ;;  %v2090_v61 = vpop.f32.mrb[17].mxu0 }
 0x381   :  { %v7268_v56 = vpop.eup %7267  ;;  %v2656_v62 = vadd.f32 1.0, %v7266_v46  ;;  %v2352_v25 = vadd.f32 %v8585_v41, %v2090_v61  ;;  %v2092_v5 = vpop.f32.mrb[18].mxu0  ;;  %6208 = vmatprep.mubr.msk.bf16.mxu1 %vm3005_vm6, %v2882_v50 }
 0x382   :  { %v7270_v16 = vpop.eup %7269  ;;  %7287 = vrcp.f32 %v2655_v19  ;;  %v2657_v17 = vadd.f32 1.0, %v7268_v56  ;;  %v6135_v3 = vmul.f32 -1.442695, %v2351_v52  ;;  %v2353_v28 = vadd.f32 %v8581_v6, %v2092_v5  ;;  %v2094_v27 = vpop.f32.mrb[19].mxu0  ;;  %3103 = vmatmul.mubr.bf16.vlgmr.msra.gmra.mrb[0].mxu1 %v2881_v63 }
 0x383   :  { %v7272_v44 = vpop.eup %7271  ;;  %7289 = vrcp.f32 %v2656_v62  ;;  %v2658_v58 = vadd.f32 1.0, %v7270_v16  ;;  %v6136_v53 = vmul.f32 -1.442695, %v2352_v25  ;;  %v2354_v36 = vadd.f32 %v8585_v41, %v2094_v27 }
 0x384   :  { %v7274_v38 = vpop.eup %7273  ;;  %7291 = vrcp.f32 %v2657_v17  ;;  %v6137_v7 = vmul.f32 -1.442695, %v2353_v28 }
 0x385   :  { %v7276_v22 = vpop.eup %7275  ;;  %7293 = vrcp.f32 %v2658_v58  ;;  %v6138_v48 = vmul.f32 -1.442695, %v2354_v36 }
 0x386   :  { %v7278_v47 = vpop.eup %7277  ;;  %7295 = vpow2.f32 %v6135_v3  ;;  %v2883_v24 = vpack.c.bf16 %v7276_v22, %v7272_v44 }
 0x387   :  { %v7280_v57 = vpop.eup %7279  ;;  %7297 = vpow2.f32 %v6136_v53  ;;  %v2098_v60 = vpop.f32.mrb[20].mxu0  ;;  %v2884_v0 = vpack.c.bf16 %v7278_v47, %v7274_v38 }
 0x388   :  { %v7282_v33 = vpop.eup %7281  ;;  %v2659_v26 = vadd.f32 1.0, %v7280_v57  ;;  %7299 = vpow2.f32 %v6137_v7  ;;  %v2355_v10 = vadd.f32 %v8581_v6, %v2098_v60  ;;  %v2100_v14 = vpop.f32.mrb[21].mxu0 }
 0x389   :  { %v7284_v2 = vpop.eup %7283  ;;  %v2660_v35 = vadd.f32 1.0, %v7282_v33  ;;  %7301 = vpow2.f32 %v6138_v48  ;;  %v2356_v12 = vadd.f32 %v8585_v41, %v2100_v14  ;;  %v2102_v20 = vpop.f32.mrb[22].mxu0  ;;  %6209 = vmatprep.mubr.msk.bf16.mxu1 %vm3005_vm6, %v2884_v0 }
 0x38a   :  { %v7286_v32 = vpop.eup %7285  ;;  %7303 = vrcp.f32 %v2659_v26  ;;  %v2661_v55 = vadd.f32 1.0, %v7284_v2  ;;  %v6139_v39 = vmul.f32 -1.442695, %v2355_v10  ;;  %v2357_v29 = vadd.f32 %v8581_v6, %v2102_v20  ;;  %v2104_v21 = vpop.f32.mrb[23].mxu0  ;;  %3111 = vmatmul.mubr.bf16.gmra.mrb[4].mxu1 %v2883_v24 }
 0x38b   :  { %7305 = vrcp.f32 %v2660_v35  ;;  %v2662_v49 = vadd.f32 1.0, %v7286_v32  ;;  %v6140_v8 = vmul.f32 -1.442695, %v2356_v12  ;;  %v2358_v30 = vadd.f32 %v8585_v41, %v2104_v21 }
 0x38c   :  { %v7288_v13 = vpop.eup %7287  ;;  %7307 = vrcp.f32 %v2661_v55  ;;  %v6141_v45 = vmul.f32 -1.442695, %v2357_v29 }
 0x38d   :  { %v7290_v23 = vpop.eup %7289  ;;  %7309 = vrcp.f32 %v2662_v49  ;;  %v6142_v40 = vmul.f32 -1.442695, %v2358_v30 }
 0x38e   :  { %v7292_v31 = vpop.eup %7291  ;;  %7311 = vpow2.f32 %v6139_v39 }
 0x38f   :  { %v7294_v51 = vpop.eup %7293  ;;  %7313 = vpow2.f32 %v6140_v8  ;;  %v2108_v42 = vpop.f32.mrb[24].mxu0  ;;  %v2885_v37 = vpack.c.bf16 %v7292_v31, %v7288_v13 }
 0x390   :  { %v7296_v4 = vpop.eup %7295  ;;  %7315 = vpow2.f32 %v6141_v45  ;;  %v2359_v18 = vadd.f32 %v8581_v6, %v2108_v42  ;;  %v2110_v63 = vpop.f32.mrb[25].mxu0  ;;  %v2886_v43 = vpack.c.bf16 %v7294_v51, %v7290_v23 }
 0x391   :  { %v7298_v54 = vpop.eup %7297  ;;  %v2663_v50 = vadd.f32 1.0, %v7296_v4  ;;  %7317 = vpow2.f32 %v6142_v40  ;;  %v2360_v46 = vadd.f32 %v8585_v41, %v2110_v63  ;;  %v2112_v19 = vpop.f32.mrb[26].mxu0 }
 0x392   :  { %v7300_v52 = vpop.eup %7299  ;;  %v2664_v61 = vadd.f32 1.0, %v7298_v54  ;;  %v2361_v56 = vadd.f32 %v8581_v6, %v2112_v19  ;;  %6210 = vmatprep.mubr.msk.bf16.mxu1 %vm3005_vm6, %v2886_v43  ;;  %v2114_v62 = vpop.f32.mrb[27].mxu0  ;;  %v6143_v16 = vmul.f32 -1.442695, %v2359_v18 }
 0x393   :  { %v7302_v25 = vpop.eup %7301  ;;  %7319 = vrcp.f32 %v2663_v50  ;;  %v2665_v5 = vadd.f32 1.0, %v7300_v52  ;;  %v2362_v17 = vadd.f32 %v8585_v41, %v2114_v62  ;;  %3119 = vmatmul.mubr.bf16.gmra.mrb[8].mxu1 %v2885_v37  ;;  %v6144_v27 = vmul.f32 -1.442695, %v2360_v46 }
 0x394   :  { %v7304_v3 = vpop.eup %7303  ;;  %7321 = vrcp.f32 %v2664_v61  ;;  %v2666_v28 = vadd.f32 1.0, %v7302_v25  ;;  %v6145_v58 = vmul.f32 -1.442695, %v2361_v56  ;;  %v7111_v56 = vld [vmem:[%s9322_s4 + $0x58] ss:$8 sps:$4 sm:$0xff]  }
 0x395   :  { %v7306_v44 = vpop.eup %7305  ;;  %7323 = vrcp.f32 %v2665_v5  ;;  %v6146_v36 = vmul.f32 -1.442695, %v2362_v17 }
 0x396   :  { %v7308_v53 = vpop.eup %7307  ;;  %7325 = vrcp.f32 %v2666_v28 }
 0x397   :  { %v7310_v38 = vpop.eup %7309  ;;  %7327 = vpow2.f32 %v6143_v16  ;;  %v2118_v7 = vpop.f32.mrb[28].mxu0  ;;  %v2887_v22 = vpack.c.bf16 %v7308_v53, %v7304_v3  ;;  %v7113_v16 = vld [vmem:[%s9322_s4 + $0x5c] ss:$8 sps:$4 sm:$0xff]   ;;  %v7116_v53 = vld [vmem:[%s9322_s4 + $0x6c] ss:$8 sps:$4 sm:$0xff]  }
 0x398   :  { %v7312_v48 = vpop.eup %7311  ;;  %7329 = vpow2.f32 %v6144_v27  ;;  %v2363_v47 = vadd.f32 %v8581_v6, %v2118_v7  ;;  %v2120_v24 = vpop.f32.mrb[29].mxu0  ;;  %v2888_v57 = vpack.c.bf16 %v7310_v38, %v7306_v44  ;;  %3595 = vmatprep.subr.bf16.mxu1 %v7113_v16  ;;  %v7119_v7 = vld [vmem:[%s9322_s4 + $0x7c] ss:$8 sps:$4 sm:$0xff]  }
 0x399   :  { %v7314_v60 = vpop.eup %7313  ;;  %v2667_v0 = vadd.f32 1.0, %v7312_v48  ;;  %7331 = vpow2.f32 %v6145_v58  ;;  %v2364_v33 = vadd.f32 %v8585_v41, %v2120_v24  ;;  %v2122_v26 = vpop.f32.mrb[30].mxu0  ;;  %v7114_v58 = vld [vmem:[%s9322_s4 + $0x68] ss:$8 sps:$4 sm:$0xff]   ;;  %3596 = vmatpush1.bf16.msra.mxu1 %v7111_v56 }
 0x39a   :  { %v7316_v10 = vpop.eup %7315  ;;  %v2668_v14 = vadd.f32 1.0, %v7314_v60  ;;  %7333 = vpow2.f32 %v6146_v36  ;;  %v2365_v2 = vadd.f32 %v8581_v6, %v2122_v26  ;;  %6211 = vmatprep.mubr.msk.bf16.mxu1 %vm3005_vm6, %v2888_v57  ;;  %v2124_v35 = vpop.f32.mrb[31].mxu0  ;;  %v6147_v32 = vmul.f32 -1.442695, %v2363_v47  ;;  %3597 = vmatprep.subr.bf16.mxu1 %v7116_v53 }
 0x39b   :  { %v7318_v12 = vpop.eup %7317  ;;  %7335 = vrcp.f32 %v2667_v0  ;;  %v2669_v20 = vadd.f32 1.0, %v7316_v10  ;;  %v2366_v55 = vadd.f32 %v8585_v41, %v2124_v35  ;;  %3127 = vmatmul.mubr.bf16.gmra.mrb[12].mxu1 %v2887_v22  ;;  %v6148_v29 = vmul.f32 -1.442695, %v2364_v33  ;;  %v7117_v35 = vld [vmem:[%s9322_s4 + $0x78] ss:$8 sps:$4 sm:$0xff]  }
 0x39c   :  { %7337 = vrcp.f32 %v2668_v14  ;;  %v2670_v39 = vadd.f32 1.0, %v7318_v12  ;;  %v6149_v49 = vmul.f32 -1.442695, %v2365_v2 }
 0x39d   :  { %v7320_v21 = vpop.eup %7319  ;;  %7339 = vrcp.f32 %v2669_v20  ;;  %v6150_v30 = vmul.f32 -1.442695, %v2366_v55  ;;  %3598 = vmatpush1.bf16.msra.mxu1 %v7114_v58 }
 0x39e   :  { %v7322_v8 = vpop.eup %7321  ;;  %7341 = vrcp.f32 %v2670_v39  ;;  %3599 = vmatprep.subr.bf16.mxu1 %v7119_v7 }
 0x39f   :  { %v7324_v13 = vpop.eup %7323  ;;  %7343 = vpow2.f32 %v6147_v32  ;;  %v2128_v45 = vpop.f32.mrb[32].mxu0 }
 0x3a0   :  { %v7326_v23 = vpop.eup %7325  ;;  %7345 = vpow2.f32 %v6148_v29  ;;  %v2367_v40 = vadd.f32 %v8581_v6, %v2128_v45  ;;  %v2130_v31 = vpop.f32.mrb[33].mxu0  ;;  %v2889_v51 = vpack.c.bf16 %v7324_v13, %v7320_v21 }
 0x3a1   :  { %v7328_v42 = vpop.eup %7327  ;;  %7347 = vpow2.f32 %v6149_v49  ;;  %v2368_v37 = vadd.f32 %v8585_v41, %v2130_v31  ;;  %v2132_v4 = vpop.f32.mrb[34].mxu0  ;;  %v2890_v18 = vpack.c.bf16 %v7326_v23, %v7322_v8  ;;  %3600 = vmatpush1.bf16.msra.mxu1 %v7117_v35 }
 0x3a2   :  { %v7330_v63 = vpop.eup %7329  ;;  %v2671_v43 = vadd.f32 1.0, %v7328_v42  ;;  %7349 = vpow2.f32 %v6150_v30  ;;  %v2369_v54 = vadd.f32 %v8581_v6, %v2132_v4  ;;  %v2134_v50 = vpop.f32.mrb[35].mxu0  ;;  %v6151_v52 = vmul.f32 -1.442695, %v2367_v40 }
 0x3a3   :  { %v7332_v46 = vpop.eup %7331  ;;  %v2672_v19 = vadd.f32 1.0, %v7330_v63  ;;  %6212 = vmatprep.mubr.msk.bf16.mxu1 %vm3005_vm6, %v2890_v18  ;;  %v2370_v61 = vadd.f32 %v8585_v41, %v2134_v50  ;;  %v6152_v5 = vmul.f32 -1.442695, %v2368_v37 }
 0x3a4   :  { %v7334_v62 = vpop.eup %7333  ;;  %7351 = vrcp.f32 %v2671_v43  ;;  %v2673_v25 = vadd.f32 1.0, %v7332_v46  ;;  %3135 = vmatmul.mubr.bf16.gmra.mrb[16].mxu1 %v2889_v51  ;;  %v6153_v28 = vmul.f32 -1.442695, %v2369_v54 }
 0x3a5   :  { %v7336_v17 = vpop.eup %7335  ;;  %7353 = vrcp.f32 %v2672_v19  ;;  %v2674_v3 = vadd.f32 1.0, %v7334_v62  ;;  %v6154_v27 = vmul.f32 -1.442695, %v2370_v61 }
 0x3a6   :  { %v7338_v44 = vpop.eup %7337  ;;  %7355 = vrcp.f32 %v2673_v25 }
 0x3a7   :  { %v7340_v36 = vpop.eup %7339  ;;  %7357 = vrcp.f32 %v2674_v3  ;;  %v2138_v38 = vpop.f32.mrb[36].mxu0 }
 0x3a8   :  { %v7342_v22 = vpop.eup %7341  ;;  %7359 = vpow2.f32 %v6151_v52  ;;  %v2371_v48 = vadd.f32 %v8581_v6, %v2138_v38  ;;  %v2140_v47 = vpop.f32.mrb[37].mxu0  ;;  %v2891_v24 = vpack.c.bf16 %v7340_v36, %v7336_v17 }
 0x3a9   :  { %v7344_v57 = vpop.eup %7343  ;;  %7361 = vpow2.f32 %v6152_v5  ;;  %v2372_v60 = vadd.f32 %v8585_v41, %v2140_v47  ;;  %v2142_v0 = vpop.f32.mrb[38].mxu0  ;;  %v2892_v33 = vpack.c.bf16 %v7342_v22, %v7338_v44 }
 0x3aa   :  { %v7346_v26 = vpop.eup %7345  ;;  %v2675_v10 = vadd.f32 1.0, %v7344_v57  ;;  %7363 = vpow2.f32 %v6153_v28  ;;  %v2373_v14 = vadd.f32 %v8581_v6, %v2142_v0  ;;  %v2144_v2 = vpop.f32.mrb[39].mxu0  ;;  %v6155_v29 = vmul.f32 -1.442695, %v2371_v48 }
 0x3ab   :  { %v7348_v12 = vpop.eup %7347  ;;  %v2676_v20 = vadd.f32 1.0, %v7346_v26  ;;  %7365 = vpow2.f32 %v6154_v27  ;;  %6213 = vmatprep.mubr.msk.bf16.mxu1 %vm3005_vm6, %v2892_v33  ;;  %v2374_v32 = vadd.f32 %v8585_v41, %v2144_v2  ;;  %v6156_v49 = vmul.f32 -1.442695, %v2372_v60 }
 0x3ac   :  { %v7350_v55 = vpop.eup %7349  ;;  %7367 = vrcp.f32 %v2675_v10  ;;  %v2677_v39 = vadd.f32 1.0, %v7348_v12  ;;  %3143 = vmatmul.mubr.bf16.gmra.mrb[20].mxu1 %v2891_v24  ;;  %v6157_v30 = vmul.f32 -1.442695, %v2373_v14 }
 0x3ad   :  { %7369 = vrcp.f32 %v2676_v20  ;;  %v2678_v21 = vadd.f32 1.0, %v7350_v55  ;;  %v6158_v45 = vmul.f32 -1.442695, %v2374_v32 }
 0x3ae   :  { %v7352_v8 = vpop.eup %7351  ;;  %7371 = vrcp.f32 %v2677_v39 }
 0x3af   :  { %v7354_v13 = vpop.eup %7353  ;;  %7373 = vrcp.f32 %v2678_v21  ;;  %v2148_v23 = vpop.f32.mrb[40].mxu0 }
 0x3b0   :  { %v7356_v40 = vpop.eup %7355  ;;  %7375 = vpow2.f32 %v6155_v29  ;;  %v2375_v31 = vadd.f32 %v8581_v6, %v2148_v23  ;;  %v2150_v51 = vpop.f32.mrb[41].mxu0 }
 0x3b1   :  { %v7358_v42 = vpop.eup %7357  ;;  %7377 = vpow2.f32 %v6156_v49  ;;  %v2376_v37 = vadd.f32 %v8585_v41, %v2150_v51  ;;  %v2152_v4 = vpop.f32.mrb[42].mxu0  ;;  %v2893_v18 = vpack.c.bf16 %v7356_v40, %v7352_v8 }
 0x3b2   :  { %v7360_v63 = vpop.eup %7359  ;;  %7379 = vpow2.f32 %v6157_v30  ;;  %v6159_v43 = vmul.f32 -1.442695, %v2375_v31  ;;  %v2377_v54 = vadd.f32 %v8581_v6, %v2152_v4  ;;  %v2894_v50 = vpack.c.bf16 %v7358_v42, %v7354_v13  ;;  %v2154_v46 = vpop.f32.mrb[43].mxu0 }
 0x3b3   :  { %v7362_v19 = vpop.eup %7361  ;;  %v2679_v52 = vadd.f32 1.0, %v7360_v63  ;;  %7381 = vpow2.f32 %v6158_v45  ;;  %v2378_v61 = vadd.f32 %v8585_v41, %v2154_v46  ;;  %v6160_v16 = vmul.f32 -1.442695, %v2376_v37 }
 0x3b4   :  { %v7364_v56 = vpop.eup %7363  ;;  %v2680_v62 = vadd.f32 1.0, %v7362_v19  ;;  %7383 = vpow2.f32 %v6159_v43  ;;  %6214 = vmatprep.mubr.msk.bf16.mxu1 %vm3005_vm6, %v2894_v50  ;;  %v6161_v28 = vmul.f32 -1.442695, %v2377_v54 }
 0x3b5   :  { %v7366_v25 = vpop.eup %7365  ;;  %7385 = vrcp.f32 %v2679_v52  ;;  %v2681_v5 = vadd.f32 1.0, %v7364_v56  ;;  %3151 = vmatmul.mubr.bf16.gmra.mrb[24].mxu1 %v2893_v18  ;;  %v6162_v44 = vmul.f32 -1.442695, %v2378_v61 }
 0x3b6   :  { %v7368_v17 = vpop.eup %7367  ;;  %7387 = vrcp.f32 %v2680_v62  ;;  %v2682_v3 = vadd.f32 1.0, %v7366_v25 }
 0x3b7   :  { %v7370_v27 = vpop.eup %7369  ;;  %7389 = vrcp.f32 %v2681_v5  ;;  %v2158_v58 = vpop.f32.mrb[44].mxu0 }
 0x3b8   :  { %v7372_v53 = vpop.eup %7371  ;;  %7391 = vrcp.f32 %v2682_v3  ;;  %v2379_v36 = vadd.f32 %v8581_v6, %v2158_v58  ;;  %v2160_v38 = vpop.f32.mrb[45].mxu0 }
 0x3b9   :  { %v7374_v7 = vpop.eup %7373  ;;  %7393 = vpow2.f32 %v6160_v16  ;;  %v2162_v22 = vpop.f32.mrb[46].mxu0  ;;  %v2895_v48 = vpack.c.bf16 %v7372_v53, %v7368_v17  ;;  %v2380_v57 = vadd.f32 %v8585_v41, %v2160_v38 }
 0x3ba   :  { %v7376_v47 = vpop.eup %7375  ;;  %7395 = vpow2.f32 %v6161_v28  ;;  %v6163_v24 = vmul.f32 -1.442695, %v2379_v36  ;;  %v2896_v60 = vpack.c.bf16 %v7374_v7, %v7370_v27  ;;  %v2164_v0 = vpop.f32.mrb[47].mxu0  ;;  %v2381_v10 = vadd.f32 %v8581_v6, %v2162_v22 }
 0x3bb   :  { %v7378_v33 = vpop.eup %7377  ;;  %v2683_v26 = vadd.f32 1.0, %v7376_v47  ;;  %7397 = vpow2.f32 %v6162_v44  ;;  %v2382_v35 = vadd.f32 %v8585_v41, %v2164_v0  ;;  %v6164_v39 = vmul.f32 -1.442695, %v2380_v57 }
 0x3bc   :  { %v7380_v14 = vpop.eup %7379  ;;  %v2684_v2 = vadd.f32 1.0, %v7378_v33  ;;  %7399 = vpow2.f32 %v6163_v24  ;;  %6215 = vmatprep.mubr.msk.bf16.mxu1 %vm3005_vm6, %v2896_v60  ;;  %v6165_v49 = vmul.f32 -1.442695, %v2381_v10 }
 0x3bd   :  { %v7382_v12 = vpop.eup %7381  ;;  %7401 = vrcp.f32 %v2683_v26  ;;  %v2685_v20 = vadd.f32 1.0, %v7380_v14  ;;  %3159 = vmatmul.mubr.bf16.gmra.mrb[28].mxu1 %v2895_v48  ;;  %v6166_v13 = vmul.f32 -1.442695, %v2382_v35 }
 0x3be   :  { %v7384_v32 = vpop.eup %7383  ;;  %7403 = vrcp.f32 %v2684_v2  ;;  %v2686_v55 = vadd.f32 1.0, %v7382_v12 }
 0x3bf   :  { %v7386_v29 = vpop.eup %7385  ;;  %7405 = vrcp.f32 %v2685_v20  ;;  %v2687_v21 = vadd.f32 1.0, %v7384_v32  ;;  %v2168_v8 = vpop.f32.mrb[48].mxu0 }
 0x3c0   :  { %v7388_v30 = vpop.eup %7387  ;;  %7407 = vrcp.f32 %v2686_v55  ;;  %v2383_v45 = vadd.f32 %v8581_v6, %v2168_v8  ;;  %v2170_v23 = vpop.f32.mrb[49].mxu0 }
 0x3c1   :  { %v7390_v40 = vpop.eup %7389  ;;  %7409 = vrcp.f32 %v2687_v21  ;;  %v2172_v31 = vpop.f32.mrb[50].mxu0  ;;  %v2384_v37 = vadd.f32 %v8585_v41, %v2170_v23 }
 0x3c2   :  { %v7392_v51 = vpop.eup %7391  ;;  %7411 = vpow2.f32 %v6164_v39  ;;  %v6167_v42 = vmul.f32 -1.442695, %v2383_v45  ;;  %v2174_v4 = vpop.f32.mrb[51].mxu0  ;;  %v2897_v18 = vpack.c.bf16 %v7390_v40, %v7386_v29  ;;  %v2385_v43 = vadd.f32 %v8581_v6, %v2172_v31 }
 0x3c3   :  { %v7394_v63 = vpop.eup %7393  ;;  %7413 = vpow2.f32 %v6165_v49  ;;  %v2898_v54 = vpack.c.bf16 %v7392_v51, %v7388_v30  ;;  %v2386_v19 = vadd.f32 %v8585_v41, %v2174_v4  ;;  %v6168_v25 = vmul.f32 -1.442695, %v2384_v37 }
 0x3c4   :  { %v7396_v50 = vpop.eup %7395  ;;  %v2688_v46 = vadd.f32 1.0, %v7394_v63  ;;  %7415 = vpow2.f32 %v6166_v13  ;;  %v6169_v17 = vmul.f32 -1.442695, %v2385_v43 }
 0x3c5   :  { %v7398_v52 = vpop.eup %7397  ;;  %v2689_v61 = vadd.f32 1.0, %v7396_v50  ;;  %7417 = vpow2.f32 %v6167_v42  ;;  %6216 = vmatprep.mubr.msk.bf16.mxu1 %vm3005_vm6, %v2898_v54  ;;  %v6170_v27 = vmul.f32 -1.442695, %v2386_v19 }
 0x3c6   :  { %v7400_v56 = vpop.eup %7399  ;;  %7419 = vrcp.f32 %v2688_v46  ;;  %v2690_v62 = vadd.f32 1.0, %v7398_v52  ;;  %3167 = vmatmul.mubr.bf16.gmra.mrb[32].mxu1 %v2897_v18 }
 0x3c7   :  { %v7402_v5 = vpop.eup %7401  ;;  %7421 = vrcp.f32 %v2689_v61  ;;  %v2691_v16 = vadd.f32 1.0, %v7400_v56  ;;  %v2178_v3 = vpop.f32.mrb[52].mxu0 }
 0x3c8   :  { %v7404_v28 = vpop.eup %7403  ;;  %7423 = vrcp.f32 %v2690_v62  ;;  %v2387_v44 = vadd.f32 %v8581_v6, %v2178_v3  ;;  %v2180_v58 = vpop.f32.mrb[53].mxu0 }
 0x3c9   :  { %v7406_v53 = vpop.eup %7405  ;;  %7425 = vrcp.f32 %v2691_v16  ;;  %v2388_v36 = vadd.f32 %v8585_v41, %v2180_v58  ;;  %v2182_v38 = vpop.f32.mrb[54].mxu0 }
 0x3ca   :  { %v7408_v7 = vpop.eup %7407  ;;  %7427 = vpow2.f32 %v6168_v25  ;;  %v6171_v22 = vmul.f32 -1.442695, %v2387_v44  ;;  %v2184_v48 = vpop.f32.mrb[55].mxu0  ;;  %v2899_v47 = vpack.c.bf16 %v7406_v53, %v7402_v5  ;;  %v2389_v60 = vadd.f32 %v8581_v6, %v2182_v38 }
 0x3cb   :  { %v7410_v24 = vpop.eup %7409  ;;  %7429 = vpow2.f32 %v6169_v17  ;;  %v6172_v57 = vmul.f32 -1.442695, %v2388_v36  ;;  %v2900_v0 = vpack.c.bf16 %v7408_v7, %v7404_v28  ;;  %v2390_v26 = vadd.f32 %v8585_v41, %v2184_v48 }
 0x3cc   :  { %v7412_v33 = vpop.eup %7411  ;;  %7431 = vpow2.f32 %v6170_v27  ;;  %v6173_v32 = vmul.f32 -1.442695, %v2389_v60 }
 0x3cd   :  { %v7414_v10 = vpop.eup %7413  ;;  %v2692_v14 = vadd.f32 1.0, %v7412_v33  ;;  %7433 = vpow2.f32 %v6171_v22  ;;  %6217 = vmatprep.mubr.msk.bf16.mxu1 %vm3005_vm6, %v2900_v0  ;;  %v6174_v21 = vmul.f32 -1.442695, %v2390_v26 }
 0x3ce   :  { %v7416_v2 = vpop.eup %7415  ;;  %v2693_v35 = vadd.f32 1.0, %v7414_v10  ;;  %7435 = vpow2.f32 %v6172_v57  ;;  %3175 = vmatmul.mubr.bf16.gmra.mrb[36].mxu1 %v2899_v47 }
 0x3cf   :  { %v7418_v12 = vpop.eup %7417  ;;  %7437 = vrcp.f32 %v2692_v14  ;;  %v2694_v20 = vadd.f32 1.0, %v7416_v2  ;;  %v2188_v55 = vpop.f32.mrb[56].mxu0 }
 0x3d0   :  { %v7420_v39 = vpop.eup %7419  ;;  %7439 = vrcp.f32 %v2693_v35  ;;  %v2695_v29 = vadd.f32 1.0, %v7418_v12  ;;  %v2391_v49 = vadd.f32 %v8581_v6, %v2188_v55  ;;  %v2190_v8 = vpop.f32.mrb[57].mxu0 }
 0x3d1   :  { %v7422_v30 = vpop.eup %7421  ;;  %7441 = vrcp.f32 %v2694_v20  ;;  %v2392_v13 = vadd.f32 %v8585_v41, %v2190_v8  ;;  %v2192_v45 = vpop.f32.mrb[58].mxu0 }
 0x3d2   :  { %v7424_v23 = vpop.eup %7423  ;;  %7443 = vrcp.f32 %v2695_v29  ;;  %v6175_v40 = vmul.f32 -1.442695, %v2391_v49  ;;  %v2194_v31 = vpop.f32.mrb[59].mxu0  ;;  %v2901_v51 = vpack.c.bf16 %v7422_v30, %v7410_v24  ;;  %v2393_v63 = vadd.f32 %v8581_v6, %v2192_v45 }
 0x3d3   :  { %v7426_v42 = vpop.eup %7425  ;;  %7445 = vpow2.f32 %v6173_v32  ;;  %v6176_v37 = vmul.f32 -1.442695, %v2392_v13  ;;  %v2902_v4 = vpack.c.bf16 %v7424_v23, %v7420_v39  ;;  %v2394_v50 = vadd.f32 %v8585_v41, %v2194_v31 }
 0x3d4   :  { %v7428_v18 = vpop.eup %7427  ;;  %7447 = vpow2.f32 %v6174_v21  ;;  %v6177_v5 = vmul.f32 -1.442695, %v2393_v63 }
 0x3d5   :  { %v7430_v43 = vpop.eup %7429  ;;  %v2696_v54 = vadd.f32 1.0, %v7428_v18  ;;  %7449 = vpow2.f32 %v6175_v40  ;;  %6218 = vmatprep.mubr.msk.bf16.mxu1 %vm3005_vm6, %v2902_v4  ;;  %v6178_v27 = vmul.f32 -1.442695, %v2394_v50 }
 0x3d6   :  { %v7432_v46 = vpop.eup %7431  ;;  %v2697_v19 = vadd.f32 1.0, %v7430_v43  ;;  %7451 = vpow2.f32 %v6176_v37  ;;  %3183 = vmatmul.mubr.bf16.gmra.mrb[40].mxu1 %v2901_v51 }
 0x3d7   :  { %v7434_v52 = vpop.eup %7433  ;;  %7453 = vrcp.f32 %v2696_v54  ;;  %v2698_v61 = vadd.f32 1.0, %v7432_v46  ;;  %v2198_v56 = vpop.f32.mrb[60].mxu0 }
 0x3d8   :  { %v7436_v62 = vpop.eup %7435  ;;  %7455 = vrcp.f32 %v2697_v19  ;;  %v2699_v25 = vadd.f32 1.0, %v7434_v52  ;;  %v2395_v16 = vadd.f32 %v8581_v6, %v2198_v56  ;;  %v2200_v17 = vpop.f32.mrb[61].mxu0 }
 0x3d9   :  { %v7438_v3 = vpop.eup %7437  ;;  %7457 = vrcp.f32 %v2698_v61  ;;  %v2700_v28 = vadd.f32 1.0, %v7436_v62  ;;  %v2396_v44 = vadd.f32 %v8585_v41, %v2200_v17  ;;  %v2202_v58 = vpop.f32.mrb[62].mxu0 }
 0x3da   :  { %v7440_v53 = vpop.eup %7439  ;;  %7459 = vrcp.f32 %v2699_v25  ;;  %v6179_v36 = vmul.f32 -1.442695, %v2395_v16  ;;  %v2204_v38 = vpop.f32.mrb[63].mxu0  ;;  %v2397_v24 = vadd.f32 %v8581_v6, %v2202_v58 }
 0x3db   :  { %v7442_v7 = vpop.eup %7441  ;;  %7461 = vrcp.f32 %v2700_v28  ;;  %v6180_v22 = vmul.f32 -1.442695, %v2396_v44  ;;  %v2903_v48 = vpack.c.bf16 %v7440_v53, %v7426_v42  ;;  %v2398_v0 = vadd.f32 %v8585_v41, %v2204_v38 }
 0x3dc   :  { %v7444_v47 = vpop.eup %7443  ;;  %7463 = vpow2.f32 %v6177_v5  ;;  %v2904_v57 = vpack.c.bf16 %v7442_v7, %v7438_v3  ;;  %v6181_v20 = vmul.f32 -1.442695, %v2397_v24 }
 0x3dd   :  { %v7446_v60 = vpop.eup %7445  ;;  %7465 = vpow2.f32 %v6178_v27  ;;  %v6182_v21 = vmul.f32 -1.442695, %v2398_v0 }
 0x3de   :  { %v7448_v33 = vpop.eup %7447  ;;  %v2701_v26 = vadd.f32 1.0, %v7446_v60  ;;  %7467 = vpow2.f32 %v6179_v36  ;;  %6219 = vmatprep.mubr.msk.bf16.mxu1 %vm3005_vm6, %v2904_v57 }
 0x3df   :  { %v7450_v10 = vpop.eup %7449  ;;  %v2702_v14 = vadd.f32 1.0, %v7448_v33  ;;  %7469 = vpow2.f32 %v6180_v22  ;;  %3191 = vmatmul.mubr.bf16.gmra.mrb[44].mxu1 %v2903_v48  ;;  %v2208_v2 = vpop.f32.mrb[64].mxu0 }
 0x3e0   :  { %v7452_v35 = vpop.eup %7451  ;;  %7471 = vrcp.f32 %v2701_v26  ;;  %v2703_v12 = vadd.f32 1.0, %v7450_v10  ;;  %v2399_v32 = vadd.f32 %v8581_v6, %v2208_v2  ;;  %v2210_v55 = vpop.f32.mrb[65].mxu0 }
 0x3e1   :  { %v7454_v39 = vpop.eup %7453  ;;  %7473 = vrcp.f32 %v2702_v14  ;;  %v2704_v29 = vadd.f32 1.0, %v7452_v35  ;;  %v2400_v49 = vadd.f32 %v8585_v41, %v2210_v55  ;;  %v2212_v8 = vpop.f32.mrb[66].mxu0 }
 0x3e2   :  { %v7456_v30 = vpop.eup %7455  ;;  %7475 = vrcp.f32 %v2703_v12  ;;  %v6183_v13 = vmul.f32 -1.442695, %v2399_v32  ;;  %v2401_v45 = vadd.f32 %v8581_v6, %v2212_v8  ;;  %v2214_v23 = vpop.f32.mrb[67].mxu0 }
 0x3e3   :  { %v7458_v40 = vpop.eup %7457  ;;  %7477 = vrcp.f32 %v2704_v29  ;;  %v6184_v31 = vmul.f32 -1.442695, %v2400_v49  ;;  %v2905_v51 = vpack.c.bf16 %v7456_v30, %v7444_v47  ;;  %v2402_v63 = vadd.f32 %v8585_v41, %v2214_v23 }
 0x3e4   :  { %v7460_v42 = vpop.eup %7459  ;;  %7479 = vpow2.f32 %v6181_v20  ;;  %v6185_v37 = vmul.f32 -1.442695, %v2401_v45  ;;  %v2906_v4 = vpack.c.bf16 %v7458_v40, %v7454_v39  ;;  %v7120_v45 = vld [vmem:[%s9322_s4 + $0x88] ss:$8 sps:$4 sm:$0xff]  }
 0x3e5   :  { %v7462_v18 = vpop.eup %7461  ;;  %7481 = vpow2.f32 %v6182_v21  ;;  %v6186_v5 = vmul.f32 -1.442695, %v2402_v63 }
 0x3e6   :  { %v7464_v43 = vpop.eup %7463  ;;  %7483 = vpow2.f32 %v6183_v13  ;;  %6220 = vmatprep.mubr.msk.bf16.mxu1 %vm3005_vm6, %v2906_v4 }
 0x3e7   :  { %v7466_v54 = vpop.eup %7465  ;;  %v2705_v50 = vadd.f32 1.0, %v7464_v43  ;;  %7485 = vpow2.f32 %v6184_v31  ;;  %3199 = vmatmul.mubr.bf16.gmra.mrb[48].mxu1 %v2905_v51  ;;  %v2218_v46 = vpop.f32.mrb[68].mxu0  ;;  %v7122_v51 = vld [vmem:[%s9322_s4 + $0x8c] ss:$8 sps:$4 sm:$0xff]  }
 0x3e8   :  { %v7468_v19 = vpop.eup %7467  ;;  %v2706_v52 = vadd.f32 1.0, %v7466_v54  ;;  %7487 = vpow2.f32 %v6185_v37  ;;  %v2403_v61 = vadd.f32 %v8581_v6, %v2218_v46  ;;  %v2220_v56 = vpop.f32.mrb[69].mxu0  ;;  %3601 = vmatprep.subr.bf16.mxu1 %v7122_v51 }
 0x3e9   :  { %v7470_v62 = vpop.eup %7469  ;;  %7489 = vrcp.f32 %v2705_v50  ;;  %v2707_v25 = vadd.f32 1.0, %v7468_v19  ;;  %v2404_v16 = vadd.f32 %v8585_v41, %v2220_v56  ;;  %v2222_v17 = vpop.f32.mrb[70].mxu0  ;;  %3602 = vmatpush1.bf16.msra.mxu1 %v7120_v45 }
 0x3ea   :  { %v7472_v3 = vpop.eup %7471  ;;  %7491 = vrcp.f32 %v2706_v52  ;;  %v2708_v28 = vadd.f32 1.0, %v7470_v62  ;;  %v6187_v27 = vmul.f32 -1.442695, %v2403_v61  ;;  %v2405_v44 = vadd.f32 %v8581_v6, %v2222_v17  ;;  %v2224_v58 = vpop.f32.mrb[71].mxu0 }
 0x3eb   :  { %v7474_v53 = vpop.eup %7473  ;;  %7493 = vrcp.f32 %v2707_v25  ;;  %v6188_v36 = vmul.f32 -1.442695, %v2404_v16  ;;  %v2907_v38 = vpack.c.bf16 %v7472_v3, %v7460_v42  ;;  %v2406_v57 = vadd.f32 %v8585_v41, %v2224_v58 }
 0x3ec   :  { %v7476_v7 = vpop.eup %7475  ;;  %7495 = vrcp.f32 %v2708_v28  ;;  %v6189_v22 = vmul.f32 -1.442695, %v2405_v44  ;;  %v2908_v48 = vpack.c.bf16 %v7474_v53, %v7462_v18 }
 0x3ed   :  { %v7478_v47 = vpop.eup %7477  ;;  %7497 = vpow2.f32 %v6186_v5  ;;  %v6190_v29 = vmul.f32 -1.442695, %v2406_v57  ;;  %v7125_v5 = vld [vmem:[%s9322_s4 + $0x9c] ss:$8 sps:$4 sm:$0xff]  }
 0x3ee   :  { %v7480_v24 = vpop.eup %7479  ;;  %7499 = vpow2.f32 %v6187_v27  ;;  %6221 = vmatprep.mubr.msk.bf16.mxu1 %vm3005_vm6, %v2908_v48  ;;  %3603 = vmatprep.subr.bf16.mxu1 %v7125_v5 }
 0x3ef   :  { %v7482_v60 = vpop.eup %7481  ;;  %v2709_v0 = vadd.f32 1.0, %v7480_v24  ;;  %7501 = vpow2.f32 %v6188_v36  ;;  %3207 = vmatmul.mubr.bf16.gmra.mrb[52].mxu1 %v2907_v38  ;;  %v2228_v33 = vpop.f32.mrb[72].mxu0  ;;  %v6238_v38 = vld [vmem:[%s9322_s4 + $0xa8] sm:$0x33] }
 0x3f0   :  { %v7484_v26 = vpop.eup %7483  ;;  %v2710_v10 = vadd.f32 1.0, %v7482_v60  ;;  %7503 = vpow2.f32 %v6189_v22  ;;  %v2407_v14 = vadd.f32 %v8581_v6, %v2228_v33  ;;  %v2230_v2 = vpop.f32.mrb[73].mxu0  ;;  %v6250_v48 = vcombine.high %v6238_v38, %v6238_v38 }
 0x3f1   :  { %v7486_v35 = vpop.eup %7485  ;;  %7505 = vrcp.f32 %v2709_v0  ;;  %v2711_v12 = vadd.f32 1.0, %v7484_v26  ;;  %v2408_v20 = vadd.f32 %v8585_v41, %v2230_v2  ;;  %v2232_v32 = vpop.f32.mrb[74].mxu0 }
 0x3f2   :  { %v7488_v55 = vpop.eup %7487  ;;  %7507 = vrcp.f32 %v2710_v10  ;;  %v2712_v39 = vadd.f32 1.0, %v7486_v35  ;;  %v2409_v21 = vadd.f32 %v8581_v6, %v2232_v32  ;;  %v2234_v49 = vpop.f32.mrb[75].mxu0  ;;  %v6191_v13 = vmul.f32 -1.442695, %v2407_v14 }
 0x3f3   :  { %v7490_v8 = vpop.eup %7489  ;;  %7509 = vrcp.f32 %v2711_v12  ;;  %v2713_v30 = vadd.f32 1.0, %v7488_v55  ;;  %v6192_v40 = vmul.f32 -1.442695, %v2408_v20  ;;  %v2410_v63 = vadd.f32 %v8585_v41, %v2234_v49 }
 0x3f4   :  { %v7492_v23 = vpop.eup %7491  ;;  %7511 = vrcp.f32 %v2712_v39  ;;  %v2909_v31 = vpack.c.bf16 %v7490_v8, %v7476_v7  ;;  %v6193_v37 = vmul.f32 -1.442695, %v2409_v21 }
 0x3f5   :  { %v7494_v42 = vpop.eup %7493  ;;  %7513 = vrcp.f32 %v2713_v30  ;;  %v2910_v4 = vpack.c.bf16 %v7492_v23, %v7478_v47  ;;  %v6194_v17 = vmul.f32 -1.442695, %v2410_v63 }
 0x3f6   :  { %v7496_v18 = vpop.eup %7495  ;;  %7515 = vpow2.f32 %v6190_v29 }
 0x3f7   :  { %v7498_v43 = vpop.eup %7497  ;;  %7517 = vpow2.f32 %v6191_v13  ;;  %6222 = vmatprep.mubr.msk.bf16.mxu1 %vm3005_vm6, %v2910_v4  ;;  %v2238_v54 = vpop.f32.mrb[92].mxu0 }
 0x3f8   :  { %v7500_v50 = vpop.eup %7499  ;;  %v2714_v46 = vadd.f32 1.0, %v7498_v43  ;;  %7519 = vpow2.f32 %v6192_v40  ;;  %3215 = vmatmul.mubr.bf16.gmra.mrb[56].mxu1 %v2909_v31  ;;  %v2321_v19 = vadd.f32 %v2238_v54, %v8569_v11  ;;  %v2240_v52 = vpop.f32.mrb[93].mxu0  ;;  %v7123_v11 = vld [vmem:[%s9322_s4 + $0x98] ss:$8 sps:$4 sm:$0xff]  }
 0x3f9   :  { %v7502_v61 = vpop.eup %7501  ;;  %v2715_v56 = vadd.f32 1.0, %v7500_v50  ;;  %7521 = vpow2.f32 %v6193_v37  ;;  %v2322_v62 = vadd.f32 %v2240_v52, %v8573_v59  ;;  %v2242_v25 = vpop.f32.mrb[94].mxu0  ;;  %3604 = vmatpush1.bf16.msra.mxu1 %v7123_v11  ;;  %v7130_v52 = vld [vmem:[%s9322_s4 + $0x4] ss:$8 sps:$4 sm:$0xff]  }
 0x3fa   :  { %v7504_v16 = vpop.eup %7503  ;;  %7523 = vrcp.f32 %v2714_v46  ;;  %v2411_v3 = vadd.f32 %v8581_v6, %v2321_v19  ;;  %v2243_v28 = vpop.f32.mrb[95].mxu0  ;;  %v2716_v24 = vadd.f32 1.0, %v7502_v61  ;;  %6251 = vmatprep.subr.msk.bf16.mxu1 %vm3588_vm7, %v6250_v48 }
 0x3fb   :  { %v7506_v27 = vpop.eup %7505  ;;  %v2717_v44 = vadd.f32 1.0, %v7504_v16  ;;  %v2412_v58 = vadd.f32 %v8585_v41, %v2322_v62  ;;  %7525 = vrcp.f32 %v2715_v56  ;;  %v6249_v41 = vcombine.low %v6238_v38, %v6238_v38 }
 0x3fc   :  { %v7508_v59 = vpop.eup %7507  ;;  %v6195_v53 = vmul.f32 -1.442695, %v2411_v3  ;;  %v2911_v36 = vpack.c.bf16 %v7506_v27, %v7494_v42 }
 0x3fd   :  { %v7510_v6 = vpop.eup %7509  ;;  %7527 = vrcp.f32 %v2717_v44  ;;  %v6196_v7 = vmul.f32 -1.442695, %v2412_v58  ;;  %v2912_v22 = vpack.c.bf16 %v7508_v59, %v7496_v18  ;;  %v3590_v33 = vsel %vm3588_vm7, %v6249_v41, 0 }
 0x3fe   :  { %v7512_v47 = vpop.eup %7511  ;;  %7529 = vpow2.f32 %v6194_v17  ;;  %3606 = vmatpush1.bf16.msra.mxu1 %v3590_v33 }
 0x3ff   :  { %v7514_v57 = vpop.eup %7513  ;;  %6223 = vmatprep.mubr.msk.bf16.mxu1 %vm3005_vm6, %v2912_v22  ;;  %7531 = vpow2.f32 %v6196_v7  ;;  %3817 = vmatprep.subr.bf16.mxu1 %v7130_v52 }
 0x400   :  { %v7516_v60 = vpop.eup %7515  ;;  %3223 = vmatmul.mubr.bf16.gmra.mrb[60].mxu1 %v2911_v36  ;;  %v2913_v0 = vpack.c.bf16 %v7514_v57, %v7510_v6  ;;  %7533 = vpow2.f32 %v6195_v53 }
 0x401   :  { %v7518_v26 = vpop.eup %7517  ;;  %v2718_v10 = vadd.f32 1.0, %v7516_v60  ;;  %7535 = vrcp.f32 %v2716_v24 }
 0x402   :  { %v7520_v14 = vpop.eup %7519  ;;  %v2719_v2 = vadd.f32 1.0, %v7518_v26 }
 0x403   :  { %v7522_v35 = vpop.eup %7521  ;;  %7537 = vrcp.f32 %v2718_v10  ;;  %v2720_v39 = vadd.f32 1.0, %v7520_v14 }
 0x404   :  { %v7524_v12 = vpop.eup %7523  ;;  %v2721_v20 = vadd.f32 1.0, %v7522_v35  ;;  %7539 = vrcp.f32 %v2719_v2 }
 0x405   :  { %v2914_v32 = vpack.c.bf16 %v7524_v12, %v7512_v47  ;;  %v7526_v55 = vpop.eup %7525 }
 0x406   :  { %7541 = vrcp.f32 %v2721_v20  ;;  %v7128_v20 = vld [vmem:[%s9322_s4] ss:$8 sps:$4 sm:$0xff]  }
 0x407   :  { %v7528_v29 = vpop.eup %7527  ;;  %6224 = vmatprep.mubr.msk.bf16.mxu1 %vm3005_vm6, %v2914_v32  ;;  %7543 = vrcp.f32 %v2720_v39  ;;  %v7131_v39 = vld [vmem:[%s9322_s4 + $0x10] ss:$8 sps:$4 sm:$0xff]  }
 0x408   :  { %v7530_v21 = vpop.eup %7529  ;;  %3231 = vmatmul.mubr.bf16.gmra.mrb[64].mxu1 %v2913_v0  ;;  %v2915_v49 = vpack.c.bf16 %v7528_v29, %v7526_v55  ;;  %v7133_v55 = vld [vmem:[%s9322_s4 + $0x14] ss:$8 sps:$4 sm:$0xff]  }
 0x409   :  { %v2722_v8 = vadd.f32 1.0, %v7530_v21  ;;  %v7532_v30 = vpop.eup %7531  ;;  %v7136_v21 = vld [vmem:[%s9322_s4 + $0x24] ss:$8 sps:$4 sm:$0xff]  }
 0x40a   :  { %v7534_v13 = vpop.eup %7533  ;;  %v2724_v45 = vadd.f32 1.0, %v7532_v30 }
 0x40b   :  { %7545 = vrcp.f32 %v2722_v8  ;;  %v7536_v23 = vpop.eup %7535  ;;  %v2723_v31 = vadd.f32 1.0, %v7534_v13 }
 0x40c   :  { %7547 = vrcp.f32 %v2724_v45 }
 0x40d   :  { %v7538_v40 = vpop.eup %7537  ;;  %7549 = vrcp.f32 %v2723_v31  ;;  %v7139_v31 = vld [vmem:[%s9322_s4 + $0x34] ss:$8 sps:$4 sm:$0xff]  }
 0x40e   :  { %v2916_v51 = vpack.c.bf16 %v7538_v40, %v7536_v23  ;;  %v7540_v42 = vpop.eup %7539  ;;  %v7134_v40 = vld [vmem:[%s9322_s4 + $0x20] ss:$8 sps:$4 sm:$0xff]  }
 0x410   :  { %v7542_v37 = vpop.eup %7541  ;;  %6225 = vmatprep.mubr.msk.bf16.mxu1 %vm3005_vm6, %v2916_v51  ;;  %v7137_v51 = vld [vmem:[%s9322_s4 + $0x30] ss:$8 sps:$4 sm:$0xff]  }
 0x411   :  { %3239 = vmatmul.mubr.bf16.gmra.mrb[68].mxu1 %v2915_v49  ;;  %v2917_v4 = vpack.c.bf16 %v7542_v37, %v7540_v42  ;;  %v7544_v18 = vpop.eup %7543  ;;  %v7142_v42 = vld [vmem:[%s9322_s4 + $0x44] ss:$8 sps:$4 sm:$0xff]  }
 0x415   :  { %v7546_v63 = vpop.eup %7545 }
 0x416   :  { %v2918_v43 = vpack.c.bf16 %v7546_v63, %v7544_v18  ;;  %v7548_v54 = vpop.eup %7547 }
 0x417   :  { %v2920_v50 = vpack.c.bf16 %v7548_v54, %v7548_v54  ;;  %v7550_v46 = vpop.eup %7549 }
 0x418   :  { %6226 = vmatprep.mubr.msk.bf16.mxu1 %vm3005_vm6, %v2918_v43  ;;  %v2919_v19 = vpack.c.bf16 %v7550_v46, %v7550_v46 }
 0x419   :  { %3247 = vmatmul.mubr.bf16.gmra.mrb[72].mxu1 %v2917_v4  ;;  %v3461_v4 = vld [vmem:[%s9322_s4 + $0x50] sm:$0x33] }
 0x41a   :  { %6227 = vmatprep.mubr.msk.bf16.mxu1 %vm3005_vm6, %v2920_v50 }
 0x421   :  { %3255 = vmatmul.mubr.bf16.gmra.mrb[76].mxu1 %v2919_v19 }
 0x422   :  { %3627 = vmatprep.mubr.bf16.mxu1 %v7711_v1 }
 0x455   :  { %v3104_v61 = vpop.f32.mrb[0].mxu1 }
 0x456   :  { %3263 = vst.msk [vmem:[#allocation2] sm:$0xff] %vm3262_vm8, %v3104_v61  ;;  %v3106_v56 = vpop.f32.mrb[1].mxu1  ;;  %v7140_v61 = vld [vmem:[%s9322_s4 + $0x40] ss:$8 sps:$4 sm:$0xff]  }
 0x457   :  { %v3107_v62 = vpop.f32.mrb[2].mxu1 }
 0x458   :  { %3264 = vst.msk [vmem:[#allocation2 + $0x8] sm:$0xff] %vm3262_vm8, %v3107_v62  ;;  %v3109_v25 = vpop.f32.mrb[3].mxu1  ;;  %v6273_v62 = vcombine.high %v3461_v4, %v3461_v4 }
 0x459   :  { %v6272_v25 = vcombine.low %v3461_v4, %v3461_v4 }
 0x45d   :  { %v3112_v5 = vpop.f32.mrb[4].mxu1 }
 0x45e   :  { %3265 = vst.msk [vmem:[#allocation2 + $0x10] sm:$0xff] %vm3262_vm8, %v3112_v5  ;;  %v3114_v16 = vpop.f32.mrb[5].mxu1 }
 0x45f   :  { %v3302_v17 = vld [vmem:[#allocation2] ss:$2 sm:$0xff]  ;;  %v3342_v3 = vld [vmem:[#allocation2 + $0x1] ss:$2 sm:$0xff]  ;;  %v3115_v28 = vpop.f32.mrb[6].mxu1  ;;  %v3812_v16 = vsel %vm3588_vm7, %v6272_v25, 0 }
 0x460   :  { %v3381_v11 = vadd.f32 %v3342_v3, %v3302_v17  ;;  %3266 = vst.msk [vmem:[#allocation2 + $0x18] sm:$0xff] %vm3262_vm8, %v3115_v28  ;;  %v3117_v27 = vpop.f32.mrb[7].mxu1 }
 0x462   :  { %3401 = vst.msk [vmem:[#allocation3] sm:$0xff] %vm3262_vm8, %v3381_v11 }
 0x466   :  { %v3120_v44 = vpop.f32.mrb[8].mxu1 }
 0x467   :  { %v3304_v58 = vld [vmem:[#allocation2 + $0x10] ss:$2 sm:$0xff]  ;;  %v3344_v59 = vld [vmem:[#allocation2 + $0x11] ss:$2 sm:$0xff]  ;;  %3267 = vst.msk [vmem:[#allocation2 + $0x20] sm:$0xff] %vm3262_vm8, %v3120_v44  ;;  %v3122_v53 = vpop.f32.mrb[9].mxu1 }
 0x468   :  { %v3382_v36 = vadd.f32 %v3344_v59, %v3304_v58  ;;  %v3123_v38 = vpop.f32.mrb[10].mxu1  ;;  %v7147_v58 = vld [vmem:[%s9322_s4 + $0xb4] ss:$8 sps:$4 sm:$0xff]  }
 0x469   :  { %3268 = vst.msk [vmem:[#allocation2 + $0x28] sm:$0xff] %vm3262_vm8, %v3123_v38  ;;  %v3125_v6 = vpop.f32.mrb[11].mxu1 }
 0x46a   :  { %3402 = vst.msk [vmem:[#allocation3 + $0x8] sm:$0xff] %vm3262_vm8, %v3382_v36 }
 0x46e   :  { %v3128_v7 = vpop.f32.mrb[12].mxu1 }
 0x46f   :  { %3269 = vst.msk [vmem:[#allocation2 + $0x30] sm:$0xff] %vm3262_vm8, %v3128_v7  ;;  %v3130_v22 = vpop.f32.mrb[13].mxu1 }
 0x470   :  { %v3306_v48 = vld [vmem:[#allocation2 + $0x20] ss:$2 sm:$0xff]  ;;  %v3346_v47 = vld [vmem:[#allocation2 + $0x21] ss:$2 sm:$0xff]  ;;  %v3131_v24 = vpop.f32.mrb[14].mxu1 }
 0x471   :  { %v3383_v41 = vadd.f32 %v3346_v47, %v3306_v48  ;;  %3270 = vst.msk [vmem:[#allocation2 + $0x38] sm:$0xff] %vm3262_vm8, %v3131_v24  ;;  %v3133_v57 = vpop.f32.mrb[15].mxu1  ;;  %v3462_v35 = vld [vmem:[#allocation3 + $0x1] sm:$0xff] }
 0x473   :  { %3403 = vst.msk [vmem:[#allocation3 + $0x10] sm:$0xff] %vm3262_vm8, %v3383_v41 }
 0x477   :  { %v3136_v60 = vpop.f32.mrb[16].mxu1 }
 0x478   :  { %v3308_v0 = vld [vmem:[#allocation2 + $0x30] ss:$2 sm:$0xff]  ;;  %v3348_v33 = vld [vmem:[#allocation2 + $0x31] ss:$2 sm:$0xff]  ;;  %3271 = vst.msk [vmem:[#allocation2 + $0x40] sm:$0xff] %vm3262_vm8, %v3136_v60  ;;  %v3138_v26 = vpop.f32.mrb[17].mxu1 }
 0x479   :  { %v3384_v10 = vadd.f32 %v3348_v33, %v3308_v0  ;;  %v3139_v14 = vpop.f32.mrb[18].mxu1 }
 0x47a   :  { %3272 = vst.msk [vmem:[#allocation2 + $0x48] sm:$0xff] %vm3262_vm8, %v3139_v14  ;;  %v3141_v2 = vpop.f32.mrb[19].mxu1  ;;  %v3463_v12 = vld [vmem:[#allocation3 + $0x9] sm:$0xff] }
 0x47b   :  { %3404 = vst.msk [vmem:[#allocation3 + $0x18] sm:$0xff] %vm3262_vm8, %v3384_v10  ;;  %v3481_v32 = vpack.c.bf16 %v3463_v12, %v3462_v35 }
 0x47d   :  { %6252 = vmatmul.mubr.msk.bf16.vlgmr.msra.gmra.mrb[80].mxu1 %vm3262_vm8, %v3481_v32 }
 0x47e   :  { %3637 = vmatprep.mubr.bf16.mxu1 %v7711_v1  ;;  %3818 = vmatpush1.bf16.msra.mxu1 %v7128_v20 }
 0x47f   :  { %v3144_v29 = vpop.f32.mrb[20].mxu1  ;;  %3819 = vmatprep.subr.bf16.mxu1 %v7133_v55 }
 0x480   :  { %3273 = vst.msk [vmem:[#allocation2 + $0x50] sm:$0xff] %vm3262_vm8, %v3144_v29  ;;  %v3146_v49 = vpop.f32.mrb[21].mxu1 }
 0x481   :  { %v3310_v8 = vld [vmem:[#allocation2 + $0x40] ss:$2 sm:$0xff]  ;;  %v3350_v30 = vld [vmem:[#allocation2 + $0x41] ss:$2 sm:$0xff]  ;;  %v3147_v13 = vpop.f32.mrb[22].mxu1 }
 0x482   :  { %v3385_v45 = vadd.f32 %v3350_v30, %v3310_v8  ;;  %3274 = vst.msk [vmem:[#allocation2 + $0x58] sm:$0xff] %vm3262_vm8, %v3147_v13  ;;  %v3149_v23 = vpop.f32.mrb[23].mxu1  ;;  %3820 = vmatpush1.bf16.msra.mxu1 %v7131_v39  ;;  %v3464_v19 = vld [vmem:[#allocation3 + $0x11] sm:$0xff] }
 0x483   :  { %3821 = vmatprep.subr.bf16.mxu1 %v7136_v21 }
 0x484   :  { %3405 = vst.msk [vmem:[#allocation3 + $0x20] sm:$0xff] %vm3262_vm8, %v3385_v45 }
 0x486   :  { %3822 = vmatpush1.bf16.msra.mxu1 %v7134_v40 }
 0x487   :  { %3823 = vmatprep.subr.bf16.mxu1 %v7139_v31 }
 0x488   :  { %v3152_v37 = vpop.f32.mrb[24].mxu1 }
 0x489   :  { %v3312_v18 = vld [vmem:[#allocation2 + $0x50] ss:$2 sm:$0xff]  ;;  %v3352_v63 = vld [vmem:[#allocation2 + $0x51] ss:$2 sm:$0xff]  ;;  %3275 = vst.msk [vmem:[#allocation2 + $0x60] sm:$0xff] %vm3262_vm8, %v3152_v37  ;;  %v3154_v43 = vpop.f32.mrb[25].mxu1 }
 0x48a   :  { %v3386_v54 = vadd.f32 %v3352_v63, %v3312_v18  ;;  %v3155_v50 = vpop.f32.mrb[26].mxu1  ;;  %3824 = vmatpush1.bf16.msra.mxu1 %v7137_v51 }
 0x48b   :  { %3276 = vst.msk [vmem:[#allocation2 + $0x68] sm:$0xff] %vm3262_vm8, %v3155_v50  ;;  %v3157_v46 = vpop.f32.mrb[27].mxu1  ;;  %v3465_v52 = vld [vmem:[#allocation3 + $0x19] sm:$0xff]  ;;  %3825 = vmatprep.subr.bf16.mxu1 %v7142_v42 }
 0x48c   :  { %3406 = vst.msk [vmem:[#allocation3 + $0x28] sm:$0xff] %vm3262_vm8, %v3386_v54  ;;  %v3482_v56 = vpack.c.bf16 %v3465_v52, %v3464_v19 }
 0x48e   :  { %6253 = vmatmul.mubr.msk.bf16.gmra.mrb[84].mxu1 %vm3262_vm8, %v3482_v56 }
 0x48f   :  { %3647 = vmatprep.mubr.bf16.mxu1 %v7711_v1  ;;  %3826 = vmatpush1.bf16.msra.mxu1 %v7140_v61 }
 0x490   :  { %v3160_v5 = vpop.f32.mrb[28].mxu1  ;;  %6274 = vmatprep.subr.msk.bf16.mxu1 %vm3588_vm7, %v6273_v62 }
 0x491   :  { %3277 = vst.msk [vmem:[#allocation2 + $0x70] sm:$0xff] %vm3262_vm8, %v3160_v5  ;;  %v3162_v17 = vpop.f32.mrb[29].mxu1 }
 0x492   :  { %v3314_v3 = vld [vmem:[#allocation2 + $0x60] ss:$2 sm:$0xff]  ;;  %v3354_v28 = vld [vmem:[#allocation2 + $0x61] ss:$2 sm:$0xff]  ;;  %v3163_v11 = vpop.f32.mrb[30].mxu1 }
 0x493   :  { %v3387_v27 = vadd.f32 %v3354_v28, %v3314_v3  ;;  %3278 = vst.msk [vmem:[#allocation2 + $0x78] sm:$0xff] %vm3262_vm8, %v3163_v11  ;;  %v3165_v44 = vpop.f32.mrb[31].mxu1  ;;  %3828 = vmatpush1.bf16.msra.mxu1 %v3812_v16  ;;  %v3466_v48 = vld [vmem:[#allocation3 + $0x21] sm:$0xff] }
 0x494   :  { %4080 = vmatprep.subr.bf16.mxu1 %v7147_v58 }
 0x495   :  { %3407 = vst.msk [vmem:[#allocation3 + $0x30] sm:$0xff] %vm3262_vm8, %v3387_v27 }
 0x499   :  { %v3168_v59 = vpop.f32.mrb[32].mxu1 }
 0x49a   :  { %v3316_v53 = vld [vmem:[#allocation2 + $0x70] ss:$2 sm:$0xff]  ;;  %v3356_v36 = vld [vmem:[#allocation2 + $0x71] ss:$2 sm:$0xff]  ;;  %3279 = vst.msk [vmem:[#allocation2 + $0x80] sm:$0xff] %vm3262_vm8, %v3168_v59  ;;  %v3170_v38 = vpop.f32.mrb[33].mxu1 }
 0x49b   :  { %v3388_v6 = vadd.f32 %v3356_v36, %v3316_v53  ;;  %v3171_v7 = vpop.f32.mrb[34].mxu1 }
 0x49c   :  { %3280 = vst.msk [vmem:[#allocation2 + $0x88] sm:$0xff] %vm3262_vm8, %v3171_v7  ;;  %v3173_v22 = vpop.f32.mrb[35].mxu1  ;;  %v3467_v47 = vld [vmem:[#allocation3 + $0x29] sm:$0xff] }
 0x49d   :  { %3408 = vst.msk [vmem:[#allocation3 + $0x38] sm:$0xff] %vm3262_vm8, %v3388_v6  ;;  %v3483_v24 = vpack.c.bf16 %v3467_v47, %v3466_v48 }
 0x49f   :  { %6254 = vmatmul.mubr.msk.bf16.gmra.mrb[88].mxu1 %vm3262_vm8, %v3483_v24 }
 0x4a0   :  { %3657 = vmatprep.mubr.bf16.mxu1 %v7711_v1 }
 0x4a1   :  { %v3176_v41 = vpop.f32.mrb[36].mxu1 }
 0x4a2   :  { %3281 = vst.msk [vmem:[#allocation2 + $0x90] sm:$0xff] %vm3262_vm8, %v3176_v41  ;;  %v3178_v57 = vpop.f32.mrb[37].mxu1 }
 0x4a3   :  { %v3318_v60 = vld [vmem:[#allocation2 + $0x80] ss:$2 sm:$0xff]  ;;  %v3358_v0 = vld [vmem:[#allocation2 + $0x81] ss:$2 sm:$0xff]  ;;  %v3179_v33 = vpop.f32.mrb[38].mxu1 }
 0x4a4   :  { %v3389_v26 = vadd.f32 %v3358_v0, %v3318_v60  ;;  %3282 = vst.msk [vmem:[#allocation2 + $0x98] sm:$0xff] %vm3262_vm8, %v3179_v33  ;;  %v3181_v10 = vpop.f32.mrb[39].mxu1  ;;  %v3468_v39 = vld [vmem:[#allocation3 + $0x31] sm:$0xff] }
 0x4a6   :  { %3409 = vst.msk [vmem:[#allocation3 + $0x40] sm:$0xff] %vm3262_vm8, %v3389_v26 }
 0x4a9   :  { %v3184_v14 = vpop.f32.mrb[40].mxu1 }
 0x4aa   :  { %3283 = vst.msk [vmem:[#allocation2 + $0xa0] sm:$0xff] %vm3262_vm8, %v3184_v14  ;;  %v3186_v2 = vpop.f32.mrb[41].mxu1 }
 0x4ab   :  { %v3320_v35 = vld [vmem:[#allocation2 + $0x90] ss:$2 sm:$0xff]  ;;  %v3360_v12 = vld [vmem:[#allocation2 + $0x91] ss:$2 sm:$0xff]  ;;  %v3187_v20 = vpop.f32.mrb[42].mxu1 }
 0x4ac   :  { %v3390_v32 = vadd.f32 %v3360_v12, %v3320_v35  ;;  %3284 = vst.msk [vmem:[#allocation2 + $0xa8] sm:$0xff] %vm3262_vm8, %v3187_v20  ;;  %v3189_v55 = vpop.f32.mrb[43].mxu1 }
 0x4ad   :  { %v3469_v29 = vld [vmem:[#allocation3 + $0x39] sm:$0xff] }
 0x4ae   :  { %3410 = vst.msk [vmem:[#allocation3 + $0x48] sm:$0xff] %vm3262_vm8, %v3390_v32  ;;  %v3484_v21 = vpack.c.bf16 %v3469_v29, %v3468_v39 }
 0x4b0   :  { %6255 = vmatmul.mubr.msk.bf16.gmra.mrb[92].mxu1 %vm3262_vm8, %v3484_v21 }
 0x4b1   :  { %3667 = vmatprep.mubr.bf16.mxu1 %v7711_v1 }
 0x4b2   :  { %v3192_v49 = vpop.f32.mrb[44].mxu1 }
 0x4b3   :  { %v3322_v8 = vld [vmem:[#allocation2 + $0xa0] ss:$2 sm:$0xff]  ;;  %v3362_v30 = vld [vmem:[#allocation2 + $0xa1] ss:$2 sm:$0xff]  ;;  %3285 = vst.msk [vmem:[#allocation2 + $0xb0] sm:$0xff] %vm3262_vm8, %v3192_v49  ;;  %v3194_v13 = vpop.f32.mrb[45].mxu1 }
 0x4b4   :  { %v3391_v45 = vadd.f32 %v3362_v30, %v3322_v8  ;;  %v3195_v23 = vpop.f32.mrb[46].mxu1 }
 0x4b5   :  { %3286 = vst.msk [vmem:[#allocation2 + $0xb8] sm:$0xff] %vm3262_vm8, %v3195_v23  ;;  %v3197_v40 = vpop.f32.mrb[47].mxu1  ;;  %v3470_v43 = vld [vmem:[#allocation3 + $0x41] sm:$0xff] }
 0x4b6   :  { %3411 = vst.msk [vmem:[#allocation3 + $0x50] sm:$0xff] %vm3262_vm8, %v3391_v45 }
 0x4ba   :  { %v3200_v31 = vpop.f32.mrb[48].mxu1 }
 0x4bb   :  { %3287 = vst.msk [vmem:[#allocation2 + $0xc0] sm:$0xff] %vm3262_vm8, %v3200_v31  ;;  %v3202_v51 = vpop.f32.mrb[49].mxu1 }
 0x4bc   :  { %v3324_v42 = vld [vmem:[#allocation2 + $0xb0] ss:$2 sm:$0xff]  ;;  %v3364_v37 = vld [vmem:[#allocation2 + $0xb1] ss:$2 sm:$0xff]  ;;  %v3203_v4 = vpop.f32.mrb[50].mxu1 }
 0x4bd   :  { %v3392_v18 = vadd.f32 %v3364_v37, %v3324_v42  ;;  %3288 = vst.msk [vmem:[#allocation2 + $0xc8] sm:$0xff] %vm3262_vm8, %v3203_v4  ;;  %v3205_v63 = vpop.f32.mrb[51].mxu1  ;;  %v3471_v54 = vld [vmem:[#allocation3 + $0x49] sm:$0xff] }
 0x4be   :  { %v3485_v50 = vpack.c.bf16 %v3471_v54, %v3470_v43 }
 0x4bf   :  { %3412 = vst.msk [vmem:[#allocation3 + $0x58] sm:$0xff] %vm3262_vm8, %v3392_v18 }
 0x4c0   :  { %6256 = vmatmul.mubr.msk.bf16.gmra.mrb[96].mxu1 %vm3262_vm8, %v3485_v50 }
 0x4c1   :  { %3677 = vmatprep.mubr.bf16.mxu1 %v7711_v1 }
 0x4c2   :  { %v3208_v46 = vpop.f32.mrb[52].mxu1 }
 0x4c3   :  { %3289 = vst.msk [vmem:[#allocation2 + $0xd0] sm:$0xff] %vm3262_vm8, %v3208_v46  ;;  %v3210_v19 = vpop.f32.mrb[53].mxu1 }
 0x4c4   :  { %v3326_v52 = vld [vmem:[#allocation2 + $0xc0] ss:$2 sm:$0xff]  ;;  %v3366_v61 = vld [vmem:[#allocation2 + $0xc1] ss:$2 sm:$0xff]  ;;  %v3211_v56 = vpop.f32.mrb[54].mxu1 }
 0x4c5   :  { %v3393_v62 = vadd.f32 %v3366_v61, %v3326_v52  ;;  %3290 = vst.msk [vmem:[#allocation2 + $0xd8] sm:$0xff] %vm3262_vm8, %v3211_v56  ;;  %v3213_v25 = vpop.f32.mrb[55].mxu1 }
 0x4c6   :  { %v3472_v44 = vld [vmem:[#allocation3 + $0x51] sm:$0xff]  ;;  %v3423_v25 = vld [vmem:[#allocation3 + $0x8] sm:$0xff] }
 0x4c7   :  { %3413 = vst.msk [vmem:[#allocation3 + $0x60] sm:$0xff] %vm3262_vm8, %v3393_v62 }
 0x4cb   :  { %v3216_v5 = vpop.f32.mrb[56].mxu1 }
 0x4cc   :  { %v3328_v16 = vld [vmem:[#allocation2 + $0xd0] ss:$2 sm:$0xff]  ;;  %v3368_v17 = vld [vmem:[#allocation2 + $0xd1] ss:$2 sm:$0xff]  ;;  %3291 = vst.msk [vmem:[#allocation2 + $0xe0] sm:$0xff] %vm3262_vm8, %v3216_v5  ;;  %v3218_v3 = vpop.f32.mrb[57].mxu1 }
 0x4cd   :  { %v3394_v28 = vadd.f32 %v3368_v17, %v3328_v16  ;;  %v3219_v11 = vpop.f32.mrb[58].mxu1  ;;  %v3422_v5 = vld [vmem:[#allocation3] sm:$0xff]  ;;  %v7150_v3 = vld [vmem:[%s9322_s4 + $0xc4] ss:$8 sps:$4 sm:$0xff]  }
 0x4ce   :  { %3292 = vst.msk [vmem:[#allocation2 + $0xe8] sm:$0xff] %vm3262_vm8, %v3219_v11  ;;  %v3221_v27 = vpop.f32.mrb[59].mxu1  ;;  %v3473_v58 = vld [vmem:[#allocation3 + $0x59] sm:$0xff]  ;;  %v3441_v17 = vpack.c.bf16 %v3423_v25, %v3422_v5 }
 0x4cf   :  { %3414 = vst.msk [vmem:[#allocation3 + $0x68] sm:$0xff] %vm3262_vm8, %v3394_v28  ;;  %v3486_v59 = vpack.c.bf16 %v3473_v58, %v3472_v44  ;;  %v7145_v16 = vld [vmem:[%s9322_s4 + $0xb0] ss:$8 sps:$4 sm:$0xff]   ;;  %v7148_v28 = vld [vmem:[%s9322_s4 + $0xc0] ss:$8 sps:$4 sm:$0xff]  }
 0x4d0   :  { %v7153_v11 = vld [vmem:[%s9322_s4 + $0xd4] ss:$8 sps:$4 sm:$0xff]   ;;  %v3424_v44 = vld [vmem:[#allocation3 + $0x10] sm:$0xff]  ;;  %v7151_v58 = vld [vmem:[%s9322_s4 + $0xd0] ss:$8 sps:$4 sm:$0xff]  }
 0x4d1   :  { %6257 = vmatmul.mubr.msk.bf16.gmra.mrb[100].mxu1 %vm3262_vm8, %v3486_v59  ;;  %v3425_v27 = vld [vmem:[#allocation3 + $0x18] sm:$0xff] }
 0x4d2   :  { %3687 = vmatprep.mubr.bf16.mxu1 %v7711_v1  ;;  %v3442_v59 = vpack.c.bf16 %v3425_v27, %v3424_v44  ;;  %v7174_v25 = vld [vmem:[%s9322_s4 + $0x148] ss:$8 sps:$4 sm:$0xff]  }
 0x4d3   :  { %v3224_v53 = vpop.f32.mrb[60].mxu1  ;;  %v3954_v27 = vld [vmem:[#allocation3 + $0x32] sm:$0xff] }
 0x4d4   :  { %3293 = vst.msk [vmem:[#allocation2 + $0xf0] sm:$0xff] %vm3262_vm8, %v3224_v53  ;;  %v3226_v36 = vpop.f32.mrb[61].mxu1  ;;  %v7156_v53 = vld [vmem:[%s9322_s4 + $0xe4] ss:$8 sps:$4 sm:$0xff]  }
 0x4d5   :  { %v3330_v38 = vld [vmem:[#allocation2 + $0xe0] ss:$2 sm:$0xff]  ;;  %v3370_v6 = vld [vmem:[#allocation2 + $0xe1] ss:$2 sm:$0xff]  ;;  %v3227_v7 = vpop.f32.mrb[62].mxu1 }
 0x4d6   :  { %v3395_v22 = vadd.f32 %v3370_v6, %v3330_v38  ;;  %3294 = vst.msk [vmem:[#allocation2 + $0xf8] sm:$0xff] %vm3262_vm8, %v3227_v7  ;;  %v3229_v48 = vpop.f32.mrb[63].mxu1  ;;  %v3474_v26 = vld [vmem:[#allocation3 + $0x61] sm:$0xff] }
 0x4d7   :  { %v7154_v36 = vld [vmem:[%s9322_s4 + $0xe0] ss:$8 sps:$4 sm:$0xff]   ;;  %v7159_v38 = vld [vmem:[%s9322_s4 + $0xf4] ss:$8 sps:$4 sm:$0xff]   ;;  %v7157_v48 = vld [vmem:[%s9322_s4 + $0xf0] ss:$8 sps:$4 sm:$0xff]  }
 0x4d8   :  { %3415 = vst.msk [vmem:[#allocation3 + $0x70] sm:$0xff] %vm3262_vm8, %v3395_v22  ;;  %v3427_v6 = vld [vmem:[#allocation3 + $0x28] sm:$0xff]  ;;  %v3426_v22 = vld [vmem:[#allocation3 + $0x20] sm:$0xff] }
 0x4d9   :  { %v6295_v7 = vld [vmem:[%s9322_s4 + $0x100] sm:$0x33] }
 0x4db   :  { %v3232_v47 = vpop.f32.mrb[64].mxu1 }
 0x4dc   :  { %3295 = vst.msk [vmem:[#allocation2 + $0x100] sm:$0xff] %vm3262_vm8, %v3232_v47  ;;  %v3234_v24 = vpop.f32.mrb[65].mxu1  ;;  %v3443_v47 = vpack.c.bf16 %v3427_v6, %v3426_v22  ;;  %v3960_v22 = vld [vmem:[#allocation3 + $0x62] sm:$0xff] }
 0x4dd   :  { %v3332_v41 = vld [vmem:[#allocation2 + $0xf0] ss:$2 sm:$0xff]  ;;  %v3372_v57 = vld [vmem:[#allocation2 + $0xf1] ss:$2 sm:$0xff]  ;;  %v3235_v60 = vpop.f32.mrb[66].mxu1  ;;  %v6307_v24 = vcombine.high %v6295_v7, %v6295_v7 }
 0x4de   :  { %v3396_v0 = vadd.f32 %v3372_v57, %v3332_v41  ;;  %3296 = vst.msk [vmem:[#allocation2 + $0x108] sm:$0xff] %vm3262_vm8, %v3235_v60  ;;  %v3237_v33 = vpop.f32.mrb[67].mxu1  ;;  %v6306_v41 = vcombine.low %v6295_v7, %v6295_v7  ;;  %v7164_v60 = vld [vmem:[%s9322_s4 + $0x10c] ss:$8 sps:$4 sm:$0xff]  }
 0x4df   :  { %v3475_v10 = vld [vmem:[#allocation3 + $0x69] sm:$0xff] }
 0x4e0   :  { %3416 = vst.msk [vmem:[#allocation3 + $0x78] sm:$0xff] %vm3262_vm8, %v3396_v0  ;;  %v3487_v14 = vpack.c.bf16 %v3475_v10, %v3474_v26  ;;  %v4075_v57 = vsel %vm3588_vm7, %v6306_v41, 0  ;;  %v3429_v0 = vld [vmem:[#allocation3 + $0x38] sm:$0xff]  ;;  %v3428_v33 = vld [vmem:[#allocation3 + $0x30] sm:$0xff]  ;;  %v3431_v10 = vld [vmem:[#allocation3 + $0x48] sm:$0xff] }
 0x4e1   :  { %v3444_v26 = vpack.c.bf16 %v3429_v0, %v3428_v33  ;;  %v3961_v7 = vld [vmem:[#allocation3 + $0x6a] sm:$0xff] }
 0x4e2   :  { %6258 = vmatmul.mubr.msk.bf16.gmra.mrb[104].mxu1 %vm3262_vm8, %v3487_v14  ;;  %v3430_v14 = vld [vmem:[#allocation3 + $0x40] sm:$0xff] }
 0x4e3   :  { %3697 = vmatprep.mubr.bf16.mxu1 %v7711_v1 }
 0x4e4   :  { %v3240_v2 = vpop.f32.mrb[68].mxu1 }
 0x4e5   :  { %v3334_v35 = vld [vmem:[#allocation2 + $0x100] ss:$2 sm:$0xff]  ;;  %v3374_v12 = vld [vmem:[#allocation2 + $0x101] ss:$2 sm:$0xff]  ;;  %3297 = vst.msk [vmem:[#allocation2 + $0x110] sm:$0xff] %vm3262_vm8, %v3240_v2  ;;  %v3242_v20 = vpop.f32.mrb[69].mxu1  ;;  %v3445_v2 = vpack.c.bf16 %v3431_v10, %v3430_v14 }
 0x4e6   :  { %v3397_v32 = vadd.f32 %v3374_v12, %v3334_v35  ;;  %v3243_v55 = vpop.f32.mrb[70].mxu1  ;;  %v3433_v35 = vld [vmem:[#allocation3 + $0x58] sm:$0xff]  ;;  %v3432_v12 = vld [vmem:[#allocation3 + $0x50] sm:$0xff]  ;;  %v4249_v14 = vld [vmem:[#allocation3 + $0x3] sm:$0xff] }
 0x4e7   :  { %3298 = vst.msk [vmem:[#allocation2 + $0x118] sm:$0xff] %vm3262_vm8, %v3243_v55  ;;  %v3245_v39 = vpop.f32.mrb[71].mxu1  ;;  %v3476_v23 = vld [vmem:[#allocation3 + $0x71] sm:$0xff]  ;;  %v3446_v20 = vpack.c.bf16 %v3433_v35, %v3432_v12  ;;  %v3434_v55 = vld [vmem:[#allocation3 + $0x60] sm:$0xff] }
 0x4e8   :  { %3417 = vst.msk [vmem:[#allocation3 + $0x80] sm:$0xff] %vm3262_vm8, %v3397_v32  ;;  %v3435_v32 = vld [vmem:[#allocation3 + $0x68] sm:$0xff]  ;;  %v7184_v12 = vld [vmem:[%s9322_s4 + $0x174] ss:$8 sps:$4 sm:$0xff]  }
 0x4e9   :  { %v3447_v39 = vpack.c.bf16 %v3435_v32, %v3434_v55  ;;  %v4250_v10 = vld [vmem:[#allocation3 + $0xb] sm:$0xff]  ;;  %v4252_v55 = vld [vmem:[#allocation3 + $0x1b] sm:$0xff] }
 0x4ea   :  { %v4268_v35 = vpack.c.bf16 %v4250_v10, %v4249_v14  ;;  %v7187_v32 = vld [vmem:[%s9322_s4 + $0x184] ss:$8 sps:$4 sm:$0xff]   ;;  %v4557_v10 = vld [vmem:[#allocation3 + $0x3c] sm:$0xff] }
 0x4eb   :  { %v4556_v14 = vld [vmem:[#allocation3 + $0x34] sm:$0xff] }
 0x4ec   :  { %v3248_v29 = vpop.f32.mrb[72].mxu1 }
 0x4ed   :  { %3299 = vst.msk [vmem:[#allocation2 + $0x120] sm:$0xff] %vm3262_vm8, %v3248_v29  ;;  %v3250_v21 = vpop.f32.mrb[73].mxu1  ;;  %v3437_v29 = vld [vmem:[#allocation3 + $0x78] sm:$0xff] }
 0x4ee   :  { %v3336_v49 = vld [vmem:[#allocation2 + $0x110] ss:$2 sm:$0xff]  ;;  %v3376_v8 = vld [vmem:[#allocation2 + $0x111] ss:$2 sm:$0xff]  ;;  %v3251_v30 = vpop.f32.mrb[74].mxu1  ;;  %v3436_v21 = vld [vmem:[#allocation3 + $0x70] sm:$0xff] }
 0x4ef   :  { %v3398_v13 = vadd.f32 %v3376_v8, %v3336_v49  ;;  %3300 = vst.msk [vmem:[#allocation2 + $0x128] sm:$0xff] %vm3262_vm8, %v3251_v30  ;;  %v3253_v45 = vpop.f32.mrb[75].mxu1  ;;  %v3477_v40 = vld [vmem:[#allocation3 + $0x79] sm:$0xff]  ;;  %v3448_v49 = vpack.c.bf16 %v3437_v29, %v3436_v21  ;;  %v7185_v29 = vld [vmem:[%s9322_s4 + $0x180] ss:$8 sps:$4 sm:$0xff]  }
 0x4f0   :  { %v3488_v31 = vpack.c.bf16 %v3477_v40, %v3476_v23  ;;  %v3438_v30 = vld [vmem:[#allocation3 + $0x80] sm:$0xff]  ;;  %v3949_v40 = vld [vmem:[#allocation3 + $0xa] sm:$0xff] }
 0x4f1   :  { %3418 = vst.msk [vmem:[#allocation3 + $0x88] sm:$0xff] %vm3262_vm8, %v3398_v13 }
 0x4f2   :  { %6259 = vmatmul.mubr.msk.bf16.gmra.mrb[108].mxu1 %vm3262_vm8, %v3488_v31  ;;  %v3948_v31 = vld [vmem:[#allocation3 + $0x2] sm:$0xff] }
 0x4f3   :  { %3707 = vmatprep.mubr.bf16.mxu1 %v7711_v1 }
 0x4f4   :  { %v3256_v51 = vpop.f32.mrb[76].mxu1 }
 0x4f5   :  { %3301 = vst.msk [vmem:[#allocation2 + $0x130] sm:$0xff] %vm3262_vm8, %v3256_v51  ;;  %v3258_v42 = vpop.f32.mrb[77].mxu1  ;;  %v7162_v51 = vld [vmem:[%s9322_s4 + $0x108] ss:$8 sps:$4 sm:$0xff]  }
 0x4f6   :  { %v3338_v37 = vld [vmem:[#allocation2 + $0x120] ss:$2 sm:$0xff]  ;;  %v3378_v4 = vld [vmem:[#allocation2 + $0x121] ss:$2 sm:$0xff]  ;;  %v3259_v18 = vpop.f32.mrb[78].mxu1  ;;  %v3967_v42 = vpack.c.bf16 %v3949_v40, %v3948_v31 }
 0x4f7   :  { %v3399_v63 = vadd.f32 %v3378_v4, %v3338_v37  ;;  %v3260_v43 = vpop.f32.mrb[79].mxu1  ;;  %v7167_v37 = vld [vmem:[%s9322_s4 + $0x11c] ss:$8 sps:$4 sm:$0xff]   ;;  %v7165_v4 = vld [vmem:[%s9322_s4 + $0x118] ss:$8 sps:$4 sm:$0xff]  }
 0x4f8   :  { %v3478_v19 = vld [vmem:[#allocation3 + $0x81] sm:$0xff]  ;;  %v7170_v18 = vld [vmem:[%s9322_s4 + $0x12c] ss:$8 sps:$4 sm:$0xff]  }
 0x4f9   :  { %3419 = vst.msk [vmem:[#allocation3 + $0x90] sm:$0xff] %vm3262_vm8, %v3399_v63  ;;  %v3439_v8 = vld [vmem:[#allocation3 + $0x88] sm:$0xff]  ;;  %v3951_v63 = vld [vmem:[#allocation3 + $0x1a] sm:$0xff]  ;;  %v3950_v43 = vld [vmem:[#allocation3 + $0x12] sm:$0xff] }
 0x4fa   :  { %v3449_v13 = vpack.c.bf16 %v3439_v8, %v3438_v30  ;;  %v7188_v8 = vld [vmem:[%s9322_s4 + $0x190] ss:$8 sps:$4 sm:$0xff]   ;;  %v7193_v30 = vld [vmem:[%s9322_s4 + $0x1a4] ss:$8 sps:$4 sm:$0xff]   ;;  %v7191_v40 = vld [vmem:[%s9322_s4 + $0x1a0] ss:$8 sps:$4 sm:$0xff]  }
 0x4fc   :  { %v3340_v54 = vld [vmem:[#allocation2 + $0x130] ss:$2 sm:$0xf]  ;;  %v3380_v50 = vld [vmem:[#allocation2 + $0x131] ss:$2 sm:$0xf] }
 0x4fd   :  { %v3400_v46 = vadd.f32 %v3380_v50, %v3340_v54  ;;  %v7168_v54 = vld [vmem:[%s9322_s4 + $0x128] ss:$8 sps:$4 sm:$0xff]   ;;  %v3968_v50 = vpack.c.bf16 %v3951_v63, %v3950_v43 }
 0x4fe   :  { %v4258_v43 = vld [vmem:[#allocation3 + $0x4b] sm:$0xff] }
 0x4ff   :  { %3421 = vst.msk [vmem:[#allocation3 + $0x98] sm:$0xf] %vm3420_vm9, %v3400_v46  ;;  %v7173_v46 = vld [vmem:[%s9322_s4 + $0x13c] ss:$8 sps:$4 sm:$0xff]  }
 0x500   :  { %v3479_v52 = vld [vmem:[#allocation3 + $0x89] sm:$0xff] }
 0x501   :  { %v3489_v61 = vpack.c.bf16 %v3479_v52, %v3478_v19  ;;  %v3440_v45 = vld [vmem:[#allocation3 + $0x90] sm:$0xff]  ;;  %v7171_v19 = vld [vmem:[%s9322_s4 + $0x138] ss:$8 sps:$4 sm:$0xff]  }
 0x502   :  { %v3450_v23 = vpack.c.bf16 %v3440_v45, %v3440_v45  ;;  %v7176_v52 = vld [vmem:[%s9322_s4 + $0x14c] ss:$8 sps:$4 sm:$0xff]  }
 0x503   :  { %6260 = vmatmul.mubr.msk.bf16.gmra.mrb[112].mxu1 %vm3262_vm8, %v3489_v61  ;;  %v3953_v61 = vld [vmem:[#allocation3 + $0x2a] sm:$0xff]  ;;  %v6363_v45 = vld [vmem:[%s9322_s4 + $0x1b0] sm:$0x33] }
 0x504   :  { %3717 = vmatprep.mubr.bf16.mxu1 %v7711_v1 }
 0x506   :  { %v3480_v56 = vld [vmem:[#allocation3 + $0x91] sm:$0xff] }
 0x507   :  { %v3490_v62 = vpack.c.bf16 %v3480_v56, %v3480_v56  ;;  %v6329_v56 = vld [vmem:[%s9322_s4 + $0x158] sm:$0x33]  ;;  %v3966_v33 = vld [vmem:[#allocation3 + $0x92] sm:$0xff] }
 0x50b   :  { %6261 = vmatmul.mubr.msk.bf16.gmra.mrb[116].mxu1 %vm3262_vm8, %v3490_v62  ;;  %v3952_v62 = vld [vmem:[#allocation3 + $0x22] sm:$0xff] }
 0x50c   :  { %3849 = vmatprep.mubr.bf16.mxu1 %v7711_v1  ;;  %v3969_v5 = vpack.c.bf16 %v3953_v61, %v3952_v62 }
 0x513   :  { %6275 = vmatmul.mubr.msk.bf16.vlgmr.msra.gmra.mrb[80].mxu1 %vm3262_vm8, %v3441_v17  ;;  %v6340_v17 = vcombine.low %v6329_v56, %v6329_v56 }
 0x514   :  { %4081 = vmatpush1.bf16.msra.mxu1 %v7145_v16  ;;  %3859 = vmatprep.mubr.bf16.mxu1 %v7711_v1  ;;  %v6341_v16 = vcombine.high %v6329_v56, %v6329_v56  ;;  %v4262_v56 = vld [vmem:[#allocation3 + $0x6b] sm:$0xff] }
 0x515   :  { %4082 = vmatprep.subr.bf16.mxu1 %v7150_v3  ;;  %v4376_v3 = vsel %vm3588_vm7, %v6340_v17, 0 }
 0x518   :  { %4083 = vmatpush1.bf16.msra.mxu1 %v7148_v28  ;;  %v7181_v28 = vld [vmem:[%s9322_s4 + $0x164] ss:$8 sps:$4 sm:$0xff]  }
 0x519   :  { %4084 = vmatprep.subr.bf16.mxu1 %v7153_v11  ;;  %v3955_v11 = vld [vmem:[#allocation3 + $0x3a] sm:$0xff] }
 0x51a   :  { %v3970_v44 = vpack.c.bf16 %v3955_v11, %v3954_v27  ;;  %v4266_v27 = vld [vmem:[#allocation3 + $0x8b] sm:$0xff] }
 0x51b   :  { %6276 = vmatmul.mubr.msk.bf16.gmra.mrb[84].mxu1 %vm3262_vm8, %v3442_v59  ;;  %v3956_v59 = vld [vmem:[#allocation3 + $0x42] sm:$0xff] }
 0x51c   :  { %3869 = vmatprep.mubr.bf16.mxu1 %v7711_v1  ;;  %4085 = vmatpush1.bf16.msra.mxu1 %v7151_v58  ;;  %v3957_v58 = vld [vmem:[#allocation3 + $0x4a] sm:$0xff] }
 0x51d   :  { %4086 = vmatprep.subr.bf16.mxu1 %v7156_v53  ;;  %v3971_v53 = vpack.c.bf16 %v3957_v58, %v3956_v59  ;;  %v4267_v59 = vld [vmem:[#allocation3 + $0x93] sm:$0xff] }
 0x520   :  { %4087 = vmatpush1.bf16.msra.mxu1 %v7154_v36  ;;  %v3959_v36 = vld [vmem:[#allocation3 + $0x5a] sm:$0xff] }
 0x521   :  { %4088 = vmatprep.subr.bf16.mxu1 %v7159_v38  ;;  %v3958_v38 = vld [vmem:[#allocation3 + $0x52] sm:$0xff] }
 0x522   :  { %v3972_v6 = vpack.c.bf16 %v3959_v36, %v3958_v38  ;;  %v4551_v36 = vld [vmem:[#allocation3 + $0xc] sm:$0xff]  ;;  %v4550_v38 = vld [vmem:[#allocation3 + $0x4] sm:$0xff] }
 0x523   :  { %6277 = vmatmul.mubr.msk.bf16.gmra.mrb[88].mxu1 %vm3262_vm8, %v3443_v47  ;;  %v3963_v47 = vld [vmem:[#allocation3 + $0x7a] sm:$0xff] }
 0x524   :  { %3879 = vmatprep.mubr.bf16.mxu1 %v7711_v1  ;;  %4089 = vmatpush1.bf16.msra.mxu1 %v7157_v48  ;;  %v3973_v48 = vpack.c.bf16 %v3961_v7, %v3960_v22  ;;  %v7196_v7 = vld [vmem:[%s9323_s6] sm:$0xff]   ;;  %v7197_v22 = vld [vmem:[%s9323_s6 + $0x8] sm:$0xff]  }
 0x525   :  { %6308 = vmatprep.subr.msk.bf16.mxu1 %vm3588_vm7, %v6307_v24  ;;  %v3962_v24 = vld [vmem:[#allocation3 + $0x72] sm:$0xff] }
 0x526   :  { %v3974_v41 = vpack.c.bf16 %v3963_v47, %v3962_v24  ;;  %v4552_v47 = vld [vmem:[#allocation3 + $0x14] sm:$0xff] }
 0x527   :  { %v7198_v24 = vld [vmem:[%s9323_s6 + $0x10] sm:$0xff]  }
 0x528   :  { %4091 = vmatpush1.bf16.msra.mxu1 %v4075_v57  ;;  %v3965_v57 = vld [vmem:[#allocation3 + $0x8a] sm:$0xff] }
 0x529   :  { %4381 = vmatprep.subr.bf16.mxu1 %v7164_v60  ;;  %v3964_v60 = vld [vmem:[#allocation3 + $0x82] sm:$0xff] }
 0x52a   :  { %v3975_v0 = vpack.c.bf16 %v3965_v57, %v3964_v60  ;;  %v7199_v57 = vld [vmem:[%s9323_s6 + $0x18] sm:$0xff]   ;;  %v4555_v60 = vld [vmem:[#allocation3 + $0x2c] sm:$0xff] }
 0x52b   :  { %6278 = vmatmul.mubr.msk.bf16.gmra.mrb[92].mxu1 %vm3262_vm8, %v3444_v26  ;;  %v3976_v26 = vpack.c.bf16 %v3966_v33, %v3966_v33  ;;  %v7200_v33 = vld [vmem:[%s9323_s6 + $0x20] sm:$0xff]  }
 0x52c   :  { %3889 = vmatprep.mubr.bf16.mxu1 %v7711_v1 }
 0x533   :  { %6279 = vmatmul.mubr.msk.bf16.gmra.mrb[96].mxu1 %vm3262_vm8, %v3445_v2  ;;  %v7179_v2 = vld [vmem:[%s9322_s4 + $0x160] ss:$8 sps:$4 sm:$0xff]  }
 0x534   :  { %3899 = vmatprep.mubr.bf16.mxu1 %v7711_v1 }
 0x53b   :  { %6280 = vmatmul.mubr.msk.bf16.gmra.mrb[100].mxu1 %vm3262_vm8, %v3446_v20  ;;  %v7182_v20 = vld [vmem:[%s9322_s4 + $0x170] ss:$8 sps:$4 sm:$0xff]  }
 0x53c   :  { %3909 = vmatprep.mubr.bf16.mxu1 %v7711_v1 }
 0x543   :  { %6281 = vmatmul.mubr.msk.bf16.gmra.mrb[104].mxu1 %vm3262_vm8, %v3447_v39  ;;  %v4251_v39 = vld [vmem:[#allocation3 + $0x13] sm:$0xff] }
 0x544   :  { %3919 = vmatprep.mubr.bf16.mxu1 %v7711_v1  ;;  %v4269_v21 = vpack.c.bf16 %v4252_v55, %v4251_v39  ;;  %v4560_v55 = vld [vmem:[#allocation3 + $0x54] sm:$0xff] }
 0x54b   :  { %6282 = vmatmul.mubr.msk.bf16.gmra.mrb[108].mxu1 %vm3262_vm8, %v3448_v49  ;;  %v7190_v49 = vld [vmem:[%s9322_s4 + $0x194] ss:$8 sps:$4 sm:$0xff]  }
 0x54c   :  { %3929 = vmatprep.mubr.bf16.mxu1 %v7711_v1 }
 0x553   :  { %6283 = vmatmul.mubr.msk.bf16.gmra.mrb[112].mxu1 %vm3262_vm8, %v3449_v13  ;;  %v4254_v13 = vld [vmem:[#allocation3 + $0x2b] sm:$0xff] }
 0x554   :  { %3939 = vmatprep.mubr.bf16.mxu1 %v7711_v1 }
 0x55b   :  { %6284 = vmatmul.mubr.msk.bf16.gmra.mrb[120].mxu1 %vm3262_vm8, %v3450_v23  ;;  %v4253_v23 = vld [vmem:[#allocation3 + $0x23] sm:$0xff] }
 0x55c   :  { %4112 = vmatprep.mubr.bf16.mxu1 %v7711_v1  ;;  %v4270_v31 = vpack.c.bf16 %v4254_v13, %v4253_v23 }
 0x563   :  { %6309 = vmatmul.mubr.msk.bf16.vlgmr.msra.gmra.mrb[80].mxu1 %vm3262_vm8, %v3967_v42  ;;  %v6374_v42 = vcombine.low %v6363_v45, %v6363_v45 }
 0x564   :  { %4382 = vmatpush1.bf16.msra.mxu1 %v7162_v51  ;;  %4122 = vmatprep.mubr.bf16.mxu1 %v7711_v1  ;;  %v6375_v51 = vcombine.high %v6363_v45, %v6363_v45  ;;  %v4562_v45 = vld [vmem:[#allocation3 + $0x64] sm:$0xff] }
 0x565   :  { %4383 = vmatprep.subr.bf16.mxu1 %v7167_v37  ;;  %v4677_v37 = vsel %vm3588_vm7, %v6374_v42, 0 }
 0x568   :  { %4384 = vmatpush1.bf16.msra.mxu1 %v7165_v4  ;;  %v4256_v4 = vld [vmem:[#allocation3 + $0x3b] sm:$0xff] }
 0x569   :  { %4385 = vmatprep.subr.bf16.mxu1 %v7170_v18  ;;  %v4255_v18 = vld [vmem:[#allocation3 + $0x33] sm:$0xff] }
 0x56a   :  { %v4271_v63 = vpack.c.bf16 %v4256_v4, %v4255_v18  ;;  %v4566_v4 = vld [vmem:[#allocation3 + $0x84] sm:$0xff] }
 0x56b   :  { %6310 = vmatmul.mubr.msk.bf16.gmra.mrb[84].mxu1 %vm3262_vm8, %v3968_v50 }
 0x56c   :  { %4132 = vmatprep.mubr.bf16.mxu1 %v7711_v1  ;;  %4386 = vmatpush1.bf16.msra.mxu1 %v7168_v54  ;;  %v4257_v54 = vld [vmem:[#allocation3 + $0x43] sm:$0xff] }
 0x56d   :  { %4387 = vmatprep.subr.bf16.mxu1 %v7173_v46  ;;  %v4272_v50 = vpack.c.bf16 %v4258_v43, %v4257_v54  ;;  %v4260_v46 = vld [vmem:[#allocation3 + $0x5b] sm:$0xff]  ;;  %v7201_v54 = vld [vmem:[%s9323_s6 + $0x28] sm:$0xff]  }
 0x570   :  { %4388 = vmatpush1.bf16.msra.mxu1 %v7171_v19  ;;  %v4259_v19 = vld [vmem:[#allocation3 + $0x53] sm:$0xff] }
 0x571   :  { %4389 = vmatprep.subr.bf16.mxu1 %v7176_v52  ;;  %v4273_v52 = vpack.c.bf16 %v4260_v46, %v4259_v19  ;;  %v7203_v46 = vld [vmem:[%s9323_s6 + $0x38] sm:$0xff]   ;;  %v7204_v19 = vld [vmem:[%s9323_s6 + $0x40] sm:$0xff]  }
 0x573   :  { %6311 = vmatmul.mubr.msk.bf16.gmra.mrb[88].mxu1 %vm3262_vm8, %v3969_v5  ;;  %v4261_v5 = vld [vmem:[#allocation3 + $0x63] sm:$0xff] }
 0x574   :  { %4142 = vmatprep.mubr.bf16.mxu1 %v7711_v1  ;;  %4390 = vmatpush1.bf16.msra.mxu1 %v7174_v25  ;;  %v4274_v17 = vpack.c.bf16 %v4262_v56, %v4261_v5 }
 0x575   :  { %6342 = vmatprep.subr.msk.bf16.mxu1 %vm3588_vm7, %v6341_v16 }
 0x578   :  { %4392 = vmatpush1.bf16.msra.mxu1 %v4376_v3  ;;  %v4264_v3 = vld [vmem:[#allocation3 + $0x7b] sm:$0xff] }
 0x579   :  { %4682 = vmatprep.subr.bf16.mxu1 %v7181_v28  ;;  %v4263_v28 = vld [vmem:[#allocation3 + $0x73] sm:$0xff] }
 0x57a   :  { %v4275_v11 = vpack.c.bf16 %v4264_v3, %v4263_v28 }
 0x57b   :  { %6312 = vmatmul.mubr.msk.bf16.gmra.mrb[92].mxu1 %vm3262_vm8, %v3970_v44  ;;  %v4265_v44 = vld [vmem:[#allocation3 + $0x83] sm:$0xff] }
 0x57c   :  { %4152 = vmatprep.mubr.bf16.mxu1 %v7711_v1  ;;  %v4276_v58 = vpack.c.bf16 %v4266_v27, %v4265_v44  ;;  %v4851_v44 = vld [vmem:[%s9324_s5] sm:$0x3] }
 0x583   :  { %6313 = vmatmul.mubr.msk.bf16.gmra.mrb[96].mxu1 %vm3262_vm8, %v3971_v53  ;;  %v4277_v53 = vpack.c.bf16 %v4267_v59, %v4267_v59  ;;  %v9075_v59 = vrot.slane %v4851_v44, %v2327_v34 }
 0x584   :  { %4162 = vmatprep.mubr.bf16.mxu1 %v7711_v1 }
 0x58b   :  { %6314 = vmatmul.mubr.msk.bf16.gmra.mrb[100].mxu1 %vm3262_vm8, %v3972_v6  ;;  %v4569_v6 = vpack.c.bf16 %v4551_v36, %v4550_v38 }
 0x58c   :  { %4172 = vmatprep.mubr.bf16.mxu1 %v7711_v1 }
 0x593   :  { %6315 = vmatmul.mubr.msk.bf16.gmra.mrb[104].mxu1 %vm3262_vm8, %v3973_v48  ;;  %v4553_v48 = vld [vmem:[#allocation3 + $0x1c] sm:$0xff] }
 0x594   :  { %4182 = vmatprep.mubr.bf16.mxu1 %v7711_v1 }
 0x59b   :  { %6316 = vmatmul.mubr.msk.bf16.gmra.mrb[108].mxu1 %vm3262_vm8, %v3974_v41  ;;  %v4570_v41 = vpack.c.bf16 %v4553_v48, %v4552_v47 }
 0x59c   :  { %4192 = vmatprep.mubr.bf16.mxu1 %v7711_v1 }
 0x5a3   :  { %6317 = vmatmul.mubr.msk.bf16.gmra.mrb[112].mxu1 %vm3262_vm8, %v3975_v0  ;;  %v4554_v0 = vld [vmem:[#allocation3 + $0x24] sm:$0xff] }
 0x5a4   :  { %4202 = vmatprep.mubr.bf16.mxu1 %v7711_v1 }
 0x5ab   :  { %6318 = vmatmul.mubr.msk.bf16.gmra.mrb[124].mxu1 %vm3262_vm8, %v3976_v26  ;;  %v4571_v26 = vpack.c.bf16 %v4555_v60, %v4554_v0 }
 0x5ac   :  { %4413 = vmatprep.mubr.bf16.mxu1 %v7711_v1 }
 0x5b3   :  { %6343 = vmatmul.mubr.msk.bf16.vlgmr.msra.gmra.mrb[80].mxu1 %vm3262_vm8, %v4268_v35  ;;  %v4559_v35 = vld [vmem:[#allocation3 + $0x4c] sm:$0xff] }
 0x5b4   :  { %4683 = vmatpush1.bf16.msra.mxu1 %v7179_v2  ;;  %4423 = vmatprep.mubr.bf16.mxu1 %v7711_v1  ;;  %v4572_v2 = vpack.c.bf16 %v4557_v10, %v4556_v14 }
 0x5b5   :  { %4684 = vmatprep.subr.bf16.mxu1 %v7184_v12  ;;  %v4558_v12 = vld [vmem:[#allocation3 + $0x44] sm:$0xff] }
 0x5b8   :  { %4685 = vmatpush1.bf16.msra.mxu1 %v7182_v20  ;;  %v4573_v20 = vpack.c.bf16 %v4559_v35, %v4558_v12 }
 0x5b9   :  { %4686 = vmatprep.subr.bf16.mxu1 %v7187_v32  ;;  %v4561_v32 = vld [vmem:[#allocation3 + $0x5c] sm:$0xff] }
 0x5ba   :  { %v4574_v39 = vpack.c.bf16 %v4561_v32, %v4560_v55 }
 0x5bb   :  { %6344 = vmatmul.mubr.msk.bf16.gmra.mrb[84].mxu1 %vm3262_vm8, %v4269_v21  ;;  %v4563_v21 = vld [vmem:[#allocation3 + $0x6c] sm:$0xff] }
 0x5bc   :  { %4433 = vmatprep.mubr.bf16.mxu1 %v7711_v1  ;;  %4687 = vmatpush1.bf16.msra.mxu1 %v7185_v29 }
 0x5bd   :  { %4688 = vmatprep.subr.bf16.mxu1 %v7190_v49 }
 0x5c0   :  { %4689 = vmatpush1.bf16.msra.mxu1 %v7188_v8 }
 0x5c1   :  { %4690 = vmatprep.subr.bf16.mxu1 %v7193_v30 }
 0x5c3   :  { %6345 = vmatmul.mubr.msk.bf16.gmra.mrb[88].mxu1 %vm3262_vm8, %v4270_v31  ;;  %v4565_v31 = vld [vmem:[#allocation3 + $0x7c] sm:$0xff] }
 0x5c4   :  { %4443 = vmatprep.mubr.bf16.mxu1 %v7711_v1  ;;  %4691 = vmatpush1.bf16.msra.mxu1 %v7191_v40  ;;  %v4575_v40 = vpack.c.bf16 %v4563_v21, %v4562_v45 }
 0x5c5   :  { %6376 = vmatprep.subr.msk.bf16.mxu1 %vm3588_vm7, %v6375_v51  ;;  %v4564_v51 = vld [vmem:[#allocation3 + $0x74] sm:$0xff] }
 0x5c6   :  { %v4576_v42 = vpack.c.bf16 %v4565_v31, %v4564_v51 }
 0x5c8   :  { %4693 = vmatpush1.bf16.msra.mxu1 %v4677_v37  ;;  %v4567_v37 = vld [vmem:[#allocation3 + $0x8c] sm:$0xff] }
 0x5c9   :  { %5259 = vmatprep.subr.bf16.mxu1 %v7711_v1  ;;  %v4577_v18 = vpack.c.bf16 %v4567_v37, %v4566_v4 }
 0x5cb   :  { %6346 = vmatmul.mubr.msk.bf16.gmra.mrb[92].mxu1 %vm3262_vm8, %v4271_v63  ;;  %v4568_v63 = vld [vmem:[#allocation3 + $0x94] sm:$0xff] }
 0x5cc   :  { %4453 = vmatprep.mubr.bf16.mxu1 %v7711_v1  ;;  %v4578_v43 = vpack.c.bf16 %v4568_v63, %v4568_v63 }
 0x5d3   :  { %6347 = vmatmul.mubr.msk.bf16.gmra.mrb[96].mxu1 %vm3262_vm8, %v4272_v50  ;;  %v7202_v50 = vld [vmem:[%s9323_s6 + $0x30] sm:$0xff]  }
 0x5d4   :  { %4463 = vmatprep.mubr.bf16.mxu1 %v7711_v1 }
 0x5db   :  { %6348 = vmatmul.mubr.msk.bf16.gmra.mrb[100].mxu1 %vm3262_vm8, %v4273_v52  ;;  %v7205_v52 = vld [vmem:[%s9323_s6 + $0x48] sm:$0xff]  }
 0x5dc   :  { %4473 = vmatprep.mubr.bf16.mxu1 %v7711_v1 }
 0x5de   :  { %v8994_v61 = vpop.f32.mrb[116].mxu1 }
 0x5df   :  { %v8996_v62 = vpop.f32.mrb[117].mxu1 }
 0x5e0   :  { %v3723_v25 = vpop.f32.mrb[118].mxu1 }
 0x5e1   :  { %v3724_v16 = vpop.f32.mrb[119].mxu1 }
 0x5e3   :  { %6349 = vmatmul.mubr.msk.bf16.gmra.mrb[104].mxu1 %vm3262_vm8, %v4274_v17 }
 0x5e4   :  { %4483 = vmatprep.mubr.bf16.mxu1 %v7711_v1 }
 0x5eb   :  { %6350 = vmatmul.mubr.msk.bf16.gmra.mrb[108].mxu1 %vm3262_vm8, %v4275_v11 }
 0x5ec   :  { %4493 = vmatprep.mubr.bf16.mxu1 %v7711_v1 }
 0x5f3   :  { %6351 = vmatmul.mubr.msk.bf16.gmra.mrb[112].mxu1 %vm3262_vm8, %v4276_v58 }
 0x5f4   :  { %4503 = vmatprep.mubr.bf16.mxu1 %v7711_v1 }
 0x5fb   :  { %6352 = vmatmul.mubr.msk.bf16.gmra.mrb[128].mxu1 %vm3262_vm8, %v4277_v53  ;;  %v9079_v53 = vrot.slane %v4851_v44, %v2331_v15 }
 0x5fc   :  { %4714 = vmatprep.mubr.bf16.mxu1 %v7711_v1 }
 0x603   :  { %6377 = vmatmul.mubr.msk.bf16.vlgmr.msra.gmra.mrb[80].mxu1 %vm3262_vm8, %v4569_v6 }
 0x604   :  { %4724 = vmatprep.mubr.bf16.mxu1 %v7711_v1  ;;  %5260 = vmatpush1.bf16.msra.mxu1 %v7196_v7 }
 0x605   :  { %5261 = vmatprep.subr.bf16.mxu1 %v7711_v1 }
 0x608   :  { %5262 = vmatpush1.bf16.msra.mxu1 %v7197_v22 }
 0x609   :  { %5263 = vmatprep.subr.bf16.mxu1 %v7711_v1 }
 0x60b   :  { %6378 = vmatmul.mubr.msk.bf16.gmra.mrb[84].mxu1 %vm3262_vm8, %v4570_v41 }
 0x60c   :  { %4734 = vmatprep.mubr.bf16.mxu1 %v7711_v1  ;;  %5264 = vmatpush1.bf16.msra.mxu1 %v7198_v24 }
 0x60d   :  { %5265 = vmatprep.subr.bf16.mxu1 %v7711_v1 }
 0x610   :  { %5266 = vmatpush1.bf16.msra.mxu1 %v7199_v57 }
 0x611   :  { %5267 = vmatprep.subr.bf16.mxu1 %v7711_v1 }
 0x613   :  { %6379 = vmatmul.mubr.msk.bf16.gmra.mrb[88].mxu1 %vm3262_vm8, %v4571_v26 }
 0x614   :  { %4744 = vmatprep.mubr.bf16.mxu1 %v7711_v1  ;;  %5268 = vmatpush1.bf16.msra.mxu1 %v7200_v33 }
 0x615   :  { %5269 = vmatprep.subr.bf16.mxu1 %v7711_v1 }
 0x618   :  { %5270 = vmatpush1.bf16.msra.mxu1 %v7201_v54 }
 0x619   :  { %5271 = vmatprep.subr.bf16.mxu1 %v7711_v1 }
 0x61b   :  { %6380 = vmatmul.mubr.msk.bf16.gmra.mrb[92].mxu1 %vm3262_vm8, %v4572_v2 }
 0x61c   :  { %4754 = vmatprep.mubr.bf16.mxu1 %v7711_v1  ;;  %5272 = vmatpush1.bf16.msra.mxu1 %v7202_v50 }
 0x61d   :  { %5273 = vmatprep.subr.bf16.mxu1 %v7711_v1 }
 0x620   :  { %5274 = vmatpush1.bf16.msra.mxu1 %v7203_v46 }
 0x621   :  { %5275 = vmatprep.subr.bf16.mxu1 %v7711_v1 }
 0x623   :  { %6381 = vmatmul.mubr.msk.bf16.gmra.mrb[96].mxu1 %vm3262_vm8, %v4573_v20 }
 0x624   :  { %4764 = vmatprep.mubr.bf16.mxu1 %v7711_v1  ;;  %5276 = vmatpush1.bf16.msra.mxu1 %v7204_v19 }
 0x625   :  { %5277 = vmatprep.subr.bf16.mxu1 %v7711_v1 }
 0x628   :  { %5278 = vmatpush1.bf16.msra.mxu1 %v7205_v52 }
 0x62b   :  { %6382 = vmatmul.mubr.msk.bf16.gmra.mrb[100].mxu1 %vm3262_vm8, %v4574_v39 }
 0x62c   :  { %4774 = vmatprep.mubr.bf16.mxu1 %v7711_v1 }
 0x62e   :  { %v3941_v29 = vpop.f32.mrb[120].mxu1 }
 0x62f   :  { %v3942_v49 = vadd.f32 %v3941_v29, %v8994_v61  ;;  %v3943_v8 = vpop.f32.mrb[121].mxu1 }
 0x630   :  { %v3944_v30 = vadd.f32 %v3943_v8, %v8996_v62  ;;  %v3945_v13 = vpop.f32.mrb[122].mxu1 }
 0x631   :  { %v3946_v23 = vpop.f32.mrb[123].mxu1 }
 0x633   :  { %6383 = vmatmul.mubr.msk.bf16.gmra.mrb[104].mxu1 %vm3262_vm8, %v4575_v40 }
 0x634   :  { %4784 = vmatprep.mubr.bf16.mxu1 %v7711_v1 }
 0x63b   :  { %6384 = vmatmul.mubr.msk.bf16.gmra.mrb[108].mxu1 %vm3262_vm8, %v4576_v42 }
 0x63c   :  { %4794 = vmatprep.mubr.bf16.mxu1 %v7711_v1 }
 0x643   :  { %6385 = vmatmul.mubr.msk.bf16.gmra.mrb[112].mxu1 %vm3262_vm8, %v4577_v18 }
 0x644   :  { %4804 = vmatprep.mubr.bf16.mxu1 %v7711_v1 }
 0x64b   :  { %6386 = vmatmul.mubr.msk.bf16.gmra.mrb[132].mxu1 %vm3262_vm8, %v4578_v43 }
 0x67e   :  { %v4204_v61 = vpop.f32.mrb[124].mxu1 }
 0x67f   :  { %v4247_v56 = vadd.f32 %v4204_v61, %v3942_v49  ;;  %v4206_v62 = vpop.f32.mrb[125].mxu1 }
 0x680   :  { %v4248_v25 = vadd.f32 %v4206_v62, %v3944_v30  ;;  %v4208_v5 = vpop.f32.mrb[126].mxu1 }
 0x681   :  { %v4209_v16 = vpop.f32.mrb[127].mxu1 }
 0x6ce   :  { %v4505_v17 = vpop.f32.mrb[128].mxu1 }
 0x6cf   :  { %v9066_v3 = vadd.f32 %v4505_v17, %v4247_v56  ;;  %v4507_v28 = vpop.f32.mrb[129].mxu1 }
 0x6d0   :  { %v9068_v11 = vadd.f32 %v4507_v28, %v4248_v25  ;;  %v4509_v27 = vpop.f32.mrb[130].mxu1 }
 0x6d1   :  { %v4510_v58 = vpop.f32.mrb[131].mxu1 }
 0x6d6   :  { %v4716_v36 = vpop.f32.mrb[80].mxu1 }
 0x6d7   :  { %v4863_v38 = vadd.f32 %v9075_v59, %v4716_v36  ;;  %v4718_v6 = vpop.f32.mrb[81].mxu1 }
 0x6d8   :  { %v4864_v7 = vadd.f32 %v9079_v53, %v4718_v6  ;;  %v4720_v22 = vpop.f32.mrb[82].mxu1 }
 0x6d9   :  { %v6387_v48 = vmul.f32 -1.442695, %v4863_v38  ;;  %v4865_v47 = vadd.f32 %v9075_v59, %v4720_v22  ;;  %v4722_v24 = vpop.f32.mrb[83].mxu1 }
 0x6da   :  { %v6388_v41 = vmul.f32 -1.442695, %v4864_v7  ;;  %v4866_v57 = vadd.f32 %v9079_v53, %v4722_v24 }
 0x6db   :  { %7551 = vpow2.f32 %v6387_v48  ;;  %v6389_v34 = vmul.f32 -1.442695, %v4865_v47 }
 0x6dc   :  { %7553 = vpow2.f32 %v6388_v41  ;;  %v6390_v9 = vmul.f32 -1.442695, %v4866_v57 }
 0x6dd   :  { %7555 = vpow2.f32 %v6389_v34 }
 0x6de   :  { %7557 = vpow2.f32 %v6390_v9  ;;  %v4726_v15 = vpop.f32.mrb[84].mxu1 }
 0x6df   :  { %v4867_v60 = vadd.f32 %v9075_v59, %v4726_v15  ;;  %v4728_v0 = vpop.f32.mrb[85].mxu1 }
 0x6e0   :  { %v4868_v33 = vadd.f32 %v9079_v53, %v4728_v0  ;;  %v4730_v26 = vpop.f32.mrb[86].mxu1 }
 0x6e1   :  { %v6391_v10 = vmul.f32 -1.442695, %v4867_v60  ;;  %v4869_v14 = vadd.f32 %v9075_v59, %v4730_v26  ;;  %v4732_v2 = vpop.f32.mrb[87].mxu1 }
 0x6e2   :  { %v6392_v35 = vmul.f32 -1.442695, %v4868_v33  ;;  %v4870_v12 = vadd.f32 %v9079_v53, %v4732_v2 }
 0x6e3   :  { %7559 = vpow2.f32 %v6391_v10  ;;  %v6393_v20 = vmul.f32 -1.442695, %v4869_v14 }
 0x6e4   :  { %7561 = vpow2.f32 %v6392_v35  ;;  %v6394_v32 = vmul.f32 -1.442695, %v4870_v12 }
 0x6e5   :  { %v7552_v55 = vpop.eup %7551  ;;  %7563 = vpow2.f32 %v6393_v20 }
 0x6e6   :  { %v7554_v39 = vpop.eup %7553  ;;  %v5015_v29 = vadd.f32 1.0, %v7552_v55  ;;  %7565 = vpow2.f32 %v6394_v32  ;;  %v4736_v21 = vpop.f32.mrb[88].mxu1 }
 0x6e7   :  { %v7556_v49 = vpop.eup %7555  ;;  %v5016_v8 = vadd.f32 1.0, %v7554_v39  ;;  %v4871_v30 = vadd.f32 %v9075_v59, %v4736_v21  ;;  %v4738_v13 = vpop.f32.mrb[89].mxu1 }
 0x6e8   :  { %v7558_v45 = vpop.eup %7557  ;;  %7567 = vrcp.f32 %v5015_v29  ;;  %v5017_v23 = vadd.f32 1.0, %v7556_v49  ;;  %v4872_v40 = vadd.f32 %v9079_v53, %v4738_v13  ;;  %v4740_v31 = vpop.f32.mrb[90].mxu1 }
 0x6e9   :  { %7569 = vrcp.f32 %v5016_v8  ;;  %v5018_v51 = vadd.f32 1.0, %v7558_v45  ;;  %v6395_v42 = vmul.f32 -1.442695, %v4871_v30  ;;  %v4873_v37 = vadd.f32 %v9075_v59, %v4740_v31  ;;  %v4742_v4 = vpop.f32.mrb[91].mxu1 }
 0x6ea   :  { %7571 = vrcp.f32 %v5017_v23  ;;  %v6396_v18 = vmul.f32 -1.442695, %v4872_v40  ;;  %v4874_v63 = vadd.f32 %v9079_v53, %v4742_v4 }
 0x6eb   :  { %7573 = vrcp.f32 %v5018_v51  ;;  %v6397_v43 = vmul.f32 -1.442695, %v4873_v37 }
 0x6ec   :  { %7575 = vpow2.f32 %v6395_v42  ;;  %v6398_v54 = vmul.f32 -1.442695, %v4874_v63 }
 0x6ed   :  { %v7560_v50 = vpop.eup %7559  ;;  %7577 = vpow2.f32 %v6396_v18 }
 0x6ee   :  { %v7562_v46 = vpop.eup %7561  ;;  %v5019_v19 = vadd.f32 1.0, %v7560_v50  ;;  %7579 = vpow2.f32 %v6397_v43  ;;  %v4746_v52 = vpop.f32.mrb[92].mxu1 }
 0x6ef   :  { %v7564_v61 = vpop.eup %7563  ;;  %v5020_v56 = vadd.f32 1.0, %v7562_v46  ;;  %7581 = vpow2.f32 %v6398_v54  ;;  %v4875_v62 = vadd.f32 %v9075_v59, %v4746_v52  ;;  %v4748_v25 = vpop.f32.mrb[93].mxu1 }
 0x6f0   :  { %v7566_v5 = vpop.eup %7565  ;;  %7583 = vrcp.f32 %v5019_v19  ;;  %v5021_v16 = vadd.f32 1.0, %v7564_v61  ;;  %v4876_v17 = vadd.f32 %v9079_v53, %v4748_v25  ;;  %v4750_v28 = vpop.f32.mrb[94].mxu1 }
 0x6f1   :  { %7585 = vrcp.f32 %v5020_v56  ;;  %v5022_v27 = vadd.f32 1.0, %v7566_v5  ;;  %v6399_v44 = vmul.f32 -1.442695, %v4875_v62  ;;  %v4877_v58 = vadd.f32 %v9075_v59, %v4750_v28  ;;  %v4752_v36 = vpop.f32.mrb[95].mxu1 }
 0x6f2   :  { %v7568_v38 = vpop.eup %7567  ;;  %7587 = vrcp.f32 %v5021_v16  ;;  %v6400_v6 = vmul.f32 -1.442695, %v4876_v17  ;;  %v4878_v7 = vadd.f32 %v9079_v53, %v4752_v36 }
 0x6f3   :  { %v7570_v22 = vpop.eup %7569  ;;  %7589 = vrcp.f32 %v5022_v27  ;;  %v6401_v48 = vmul.f32 -1.442695, %v4877_v58 }
 0x6f4   :  { %v7572_v47 = vpop.eup %7571  ;;  %7591 = vpow2.f32 %v6399_v44  ;;  %v6402_v24 = vmul.f32 -1.442695, %v4878_v7 }
 0x6f5   :  { %v7574_v41 = vpop.eup %7573  ;;  %7593 = vpow2.f32 %v6400_v6  ;;  %v5129_v57 = vpack.c.bf16 %v7572_v47, %v7568_v38 }
 0x6f6   :  { %v7576_v34 = vpop.eup %7575  ;;  %7595 = vpow2.f32 %v6401_v48  ;;  %v4756_v9 = vpop.f32.mrb[96].mxu1  ;;  %v5130_v15 = vpack.c.bf16 %v7574_v41, %v7570_v22 }
 0x6f7   :  { %v7578_v60 = vpop.eup %7577  ;;  %v5023_v0 = vadd.f32 1.0, %v7576_v34  ;;  %7597 = vpow2.f32 %v6402_v24  ;;  %v4879_v33 = vadd.f32 %v9075_v59, %v4756_v9  ;;  %v4758_v26 = vpop.f32.mrb[97].mxu1 }
 0x6f8   :  { %v7580_v10 = vpop.eup %7579  ;;  %v5024_v14 = vadd.f32 1.0, %v7578_v60  ;;  %v4880_v2 = vadd.f32 %v9079_v53, %v4758_v26  ;;  %v4760_v35 = vpop.f32.mrb[98].mxu1  ;;  %6435 = vmatprep.mubr.msk.bf16.mxu1 %vm374_vm1, %v5130_v15 }
 0x6f9   :  { %v7582_v12 = vpop.eup %7581  ;;  %7599 = vrcp.f32 %v5023_v0  ;;  %v5025_v20 = vadd.f32 1.0, %v7580_v10  ;;  %v6403_v32 = vmul.f32 -1.442695, %v4879_v33  ;;  %v4881_v55 = vadd.f32 %v9075_v59, %v4760_v35  ;;  %v4762_v39 = vpop.f32.mrb[99].mxu1  ;;  %5292 = vmatmul.mubr.bf16.vlgmr.msra.gmra.mrb[136].mxu1 %v5129_v57 }
 0x6fa   :  { %v7584_v29 = vpop.eup %7583  ;;  %7601 = vrcp.f32 %v5024_v14  ;;  %v5026_v21 = vadd.f32 1.0, %v7582_v12  ;;  %v6404_v49 = vmul.f32 -1.442695, %v4880_v2  ;;  %v4882_v8 = vadd.f32 %v9079_v53, %v4762_v39 }
 0x6fb   :  { %v7586_v30 = vpop.eup %7585  ;;  %7603 = vrcp.f32 %v5025_v20  ;;  %v6405_v13 = vmul.f32 -1.442695, %v4881_v55 }
 0x6fc   :  { %v7588_v45 = vpop.eup %7587  ;;  %7605 = vrcp.f32 %v5026_v21  ;;  %v6406_v23 = vmul.f32 -1.442695, %v4882_v8 }
 0x6fd   :  { %v7590_v40 = vpop.eup %7589  ;;  %7607 = vpow2.f32 %v6403_v32  ;;  %v5131_v31 = vpack.c.bf16 %v7588_v45, %v7584_v29 }
 0x6fe   :  { %v7592_v51 = vpop.eup %7591  ;;  %7609 = vpow2.f32 %v6404_v49  ;;  %v4766_v42 = vpop.f32.mrb[100].mxu1  ;;  %v5132_v37 = vpack.c.bf16 %v7590_v40, %v7586_v30 }
 0x6ff   :  { %v7594_v4 = vpop.eup %7593  ;;  %v5027_v18 = vadd.f32 1.0, %v7592_v51  ;;  %7611 = vpow2.f32 %v6405_v13  ;;  %v4883_v63 = vadd.f32 %v9075_v59, %v4766_v42  ;;  %v4768_v43 = vpop.f32.mrb[101].mxu1 }
 0x700   :  { %v7596_v54 = vpop.eup %7595  ;;  %v5028_v50 = vadd.f32 1.0, %v7594_v4  ;;  %7613 = vpow2.f32 %v6406_v23  ;;  %v4884_v46 = vadd.f32 %v9079_v53, %v4768_v43  ;;  %v4770_v19 = vpop.f32.mrb[102].mxu1  ;;  %6436 = vmatprep.mubr.msk.bf16.mxu1 %vm374_vm1, %v5132_v37 }
 0x701   :  { %v7598_v52 = vpop.eup %7597  ;;  %7615 = vrcp.f32 %v5027_v18  ;;  %v5029_v61 = vadd.f32 1.0, %v7596_v54  ;;  %v6407_v56 = vmul.f32 -1.442695, %v4883_v63  ;;  %v4885_v62 = vadd.f32 %v9075_v59, %v4770_v19  ;;  %v4772_v25 = vpop.f32.mrb[103].mxu1  ;;  %5300 = vmatmul.mubr.bf16.gmra.mrb[140].mxu1 %v5131_v31 }
 0x702   :  { %7617 = vrcp.f32 %v5028_v50  ;;  %v5030_v5 = vadd.f32 1.0, %v7598_v52  ;;  %v6408_v16 = vmul.f32 -1.442695, %v4884_v46  ;;  %v4886_v17 = vadd.f32 %v9079_v53, %v4772_v25 }
 0x703   :  { %v7600_v28 = vpop.eup %7599  ;;  %7619 = vrcp.f32 %v5029_v61  ;;  %v6409_v27 = vmul.f32 -1.442695, %v4885_v62 }
 0x704   :  { %v7602_v44 = vpop.eup %7601  ;;  %7621 = vrcp.f32 %v5030_v5  ;;  %v6410_v58 = vmul.f32 -1.442695, %v4886_v17 }
 0x705   :  { %v7604_v36 = vpop.eup %7603  ;;  %7623 = vpow2.f32 %v6407_v56 }
 0x706   :  { %v7606_v38 = vpop.eup %7605  ;;  %7625 = vpow2.f32 %v6408_v16  ;;  %v4776_v6 = vpop.f32.mrb[104].mxu1  ;;  %v5133_v7 = vpack.c.bf16 %v7604_v36, %v7600_v28 }
 0x707   :  { %v7608_v22 = vpop.eup %7607  ;;  %7627 = vpow2.f32 %v6409_v27  ;;  %v4887_v48 = vadd.f32 %v9075_v59, %v4776_v6  ;;  %v4778_v47 = vpop.f32.mrb[105].mxu1  ;;  %v5134_v24 = vpack.c.bf16 %v7606_v38, %v7602_v44 }
 0x708   :  { %v7610_v41 = vpop.eup %7609  ;;  %v5031_v57 = vadd.f32 1.0, %v7608_v22  ;;  %7629 = vpow2.f32 %v6410_v58  ;;  %v4888_v34 = vadd.f32 %v9079_v53, %v4778_v47  ;;  %v4780_v9 = vpop.f32.mrb[106].mxu1 }
 0x709   :  { %v7612_v15 = vpop.eup %7611  ;;  %v5032_v60 = vadd.f32 1.0, %v7610_v41  ;;  %v4889_v0 = vadd.f32 %v9075_v59, %v4780_v9  ;;  %6437 = vmatprep.mubr.msk.bf16.mxu1 %vm374_vm1, %v5134_v24  ;;  %v4782_v33 = vpop.f32.mrb[107].mxu1  ;;  %v6411_v14 = vmul.f32 -1.442695, %v4887_v48 }
 0x70a   :  { %v7614_v26 = vpop.eup %7613  ;;  %7631 = vrcp.f32 %v5031_v57  ;;  %v5033_v10 = vadd.f32 1.0, %v7612_v15  ;;  %v4890_v2 = vadd.f32 %v9079_v53, %v4782_v33  ;;  %5308 = vmatmul.mubr.bf16.gmra.mrb[144].mxu1 %v5133_v7  ;;  %v6412_v20 = vmul.f32 -1.442695, %v4888_v34 }
 0x70b   :  { %v7616_v35 = vpop.eup %7615  ;;  %7633 = vrcp.f32 %v5032_v60  ;;  %v5034_v12 = vadd.f32 1.0, %v7614_v26  ;;  %v6413_v55 = vmul.f32 -1.442695, %v4889_v0 }
 0x70c   :  { %v7618_v32 = vpop.eup %7617  ;;  %7635 = vrcp.f32 %v5033_v10  ;;  %v6414_v29 = vmul.f32 -1.442695, %v4890_v2 }
 0x70d   :  { %v7620_v39 = vpop.eup %7619  ;;  %7637 = vrcp.f32 %v5034_v12 }
 0x70e   :  { %v7622_v21 = vpop.eup %7621  ;;  %7639 = vpow2.f32 %v6411_v14  ;;  %v4786_v49 = vpop.f32.mrb[108].mxu1  ;;  %v5135_v8 = vpack.c.bf16 %v7620_v39, %v7616_v35 }
 0x70f   :  { %v7624_v30 = vpop.eup %7623  ;;  %7641 = vpow2.f32 %v6412_v20  ;;  %v4891_v13 = vadd.f32 %v9075_v59, %v4786_v49  ;;  %v4788_v45 = vpop.f32.mrb[109].mxu1  ;;  %v5136_v23 = vpack.c.bf16 %v7622_v21, %v7618_v32 }
 0x710   :  { %v7626_v40 = vpop.eup %7625  ;;  %v5035_v31 = vadd.f32 1.0, %v7624_v30  ;;  %7643 = vpow2.f32 %v6413_v55  ;;  %v4892_v51 = vadd.f32 %v9079_v53, %v4788_v45  ;;  %v4790_v42 = vpop.f32.mrb[110].mxu1 }
 0x711   :  { %v7628_v37 = vpop.eup %7627  ;;  %v5036_v4 = vadd.f32 1.0, %v7626_v40  ;;  %7645 = vpow2.f32 %v6414_v29  ;;  %v4893_v18 = vadd.f32 %v9075_v59, %v4790_v42  ;;  %6438 = vmatprep.mubr.msk.bf16.mxu1 %vm374_vm1, %v5136_v23  ;;  %v4792_v63 = vpop.f32.mrb[111].mxu1  ;;  %v6415_v50 = vmul.f32 -1.442695, %v4891_v13 }
 0x712   :  { %v7630_v43 = vpop.eup %7629  ;;  %7647 = vrcp.f32 %v5035_v31  ;;  %v5037_v54 = vadd.f32 1.0, %v7628_v37  ;;  %v4894_v46 = vadd.f32 %v9079_v53, %v4792_v63  ;;  %5316 = vmatmul.mubr.bf16.gmra.mrb[148].mxu1 %v5135_v8  ;;  %v6416_v52 = vmul.f32 -1.442695, %v4892_v51 }
 0x713   :  { %7649 = vrcp.f32 %v5036_v4  ;;  %v5038_v19 = vadd.f32 1.0, %v7630_v43  ;;  %v6417_v56 = vmul.f32 -1.442695, %v4893_v18 }
 0x714   :  { %v7632_v61 = vpop.eup %7631  ;;  %7651 = vrcp.f32 %v5037_v54  ;;  %v6418_v25 = vmul.f32 -1.442695, %v4894_v46 }
 0x715   :  { %v7634_v62 = vpop.eup %7633  ;;  %7653 = vrcp.f32 %v5038_v19 }
 0x716   :  { %v7636_v5 = vpop.eup %7635  ;;  %7655 = vpow2.f32 %v6415_v50  ;;  %v4796_v16 = vpop.f32.mrb[112].mxu1 }
 0x717   :  { %v7638_v17 = vpop.eup %7637  ;;  %7657 = vpow2.f32 %v6416_v52  ;;  %v4895_v28 = vadd.f32 %v9075_v59, %v4796_v16  ;;  %v4798_v27 = vpop.f32.mrb[113].mxu1  ;;  %v5137_v44 = vpack.c.bf16 %v7636_v5, %v7632_v61 }
 0x718   :  { %v7640_v58 = vpop.eup %7639  ;;  %7659 = vpow2.f32 %v6417_v56  ;;  %v4896_v36 = vadd.f32 %v9079_v53, %v4798_v27  ;;  %v4800_v38 = vpop.f32.mrb[114].mxu1  ;;  %v5138_v6 = vpack.c.bf16 %v7638_v17, %v7634_v62 }
 0x719   :  { %v7642_v7 = vpop.eup %7641  ;;  %v5039_v22 = vadd.f32 1.0, %v7640_v58  ;;  %7661 = vpow2.f32 %v6418_v25  ;;  %v4897_v48 = vadd.f32 %v9075_v59, %v4800_v38  ;;  %v4802_v47 = vpop.f32.mrb[115].mxu1  ;;  %v6419_v15 = vmul.f32 -1.442695, %v4895_v28 }
 0x71a   :  { %v7644_v24 = vpop.eup %7643  ;;  %v5040_v41 = vadd.f32 1.0, %v7642_v7  ;;  %6439 = vmatprep.mubr.msk.bf16.mxu1 %vm374_vm1, %v5138_v6  ;;  %v4898_v57 = vadd.f32 %v9079_v53, %v4802_v47  ;;  %v6420_v33 = vmul.f32 -1.442695, %v4896_v36 }
 0x71b   :  { %v7646_v34 = vpop.eup %7645  ;;  %7663 = vrcp.f32 %v5039_v22  ;;  %v5041_v9 = vadd.f32 1.0, %v7644_v24  ;;  %5324 = vmatmul.mubr.bf16.gmra.mrb[152].mxu1 %v5137_v44  ;;  %v6421_v10 = vmul.f32 -1.442695, %v4897_v48 }
 0x71c   :  { %v7648_v60 = vpop.eup %7647  ;;  %7665 = vrcp.f32 %v5040_v41  ;;  %v5042_v0 = vadd.f32 1.0, %v7646_v34  ;;  %v6422_v2 = vmul.f32 -1.442695, %v4898_v57 }
 0x71d   :  { %v7650_v26 = vpop.eup %7649  ;;  %7667 = vrcp.f32 %v5041_v9 }
 0x71e   :  { %v7652_v14 = vpop.eup %7651  ;;  %7669 = vrcp.f32 %v5042_v0  ;;  %v4806_v35 = vpop.f32.mrb[132].mxu1  ;;  %v7208_v0 = vld [vmem:[%s9325_s7 + $0x48] sm:$0xff]  }
 0x71f   :  { %v7654_v12 = vpop.eup %7653  ;;  %7671 = vpow2.f32 %v6419_v15  ;;  %v4849_v20 = vadd.f32 %v4806_v35, %v9066_v3  ;;  %v4808_v32 = vpop.f32.mrb[133].mxu1  ;;  %v5139_v55 = vpack.c.bf16 %v7652_v14, %v7648_v60  ;;  %v7206_v15 = vld [vmem:[%s9325_s7 + $0x40] sm:$0xff]   ;;  %v7212_v14 = vld [vmem:[%s9325_s7 + $0x58] sm:$0xff]  }
 0x720   :  { %v7656_v39 = vpop.eup %7655  ;;  %7673 = vpow2.f32 %v6420_v33  ;;  %v4850_v29 = vadd.f32 %v4808_v32, %v9068_v11  ;;  %v4810_v21 = vpop.f32.mrb[134].mxu1  ;;  %v5140_v49 = vpack.c.bf16 %v7654_v12, %v7650_v26  ;;  %v7207_v60 = vld [vmem:[%s9325_s7] sm:$0xff]   ;;  %6487 = vmatprep.subr.bf16.mxu1 %v7206_v15  ;;  %v7209_v33 = vld [vmem:[%s9325_s7 + $0x8] sm:$0xff]   ;;  %v7210_v26 = vld [vmem:[%s9325_s7 + $0x50] sm:$0xff]  }
 0x721   :  { %v7658_v8 = vpop.eup %7657  ;;  %v5043_v30 = vadd.f32 1.0, %v7656_v39  ;;  %7675 = vpow2.f32 %v6421_v10  ;;  %v4899_v13 = vadd.f32 %v9075_v59, %v4849_v20  ;;  %v4811_v45 = vpop.f32.mrb[135].mxu1  ;;  %6488 = vmatpush3.bf16.msra.mxu1 %v7207_v60  ;;  %v7211_v10 = vld [vmem:[%s9325_s7 + $0x10] sm:$0xff]   ;;  %v7214_v35 = vld [vmem:[%s9325_s7 + $0x60] sm:$0xff]   ;;  %v7216_v20 = vld [vmem:[%s9325_s7 + $0x68] sm:$0xff]  }
 0x722   :  { %v7660_v23 = vpop.eup %7659  ;;  %v5044_v40 = vadd.f32 1.0, %v7658_v8  ;;  %7677 = vpow2.f32 %v6422_v2  ;;  %v4900_v31 = vadd.f32 %v9079_v53, %v4850_v29  ;;  %6440 = vmatprep.mubr.msk.bf16.mxu1 %vm374_vm1, %v5140_v49  ;;  %6489 = vmatprep.subr.bf16.mxu1 %v7208_v0  ;;  %v7213_v2 = vld [vmem:[%s9325_s7 + $0x18] sm:$0xff]   ;;  %v7215_v12 = vld [vmem:[%s9325_s7 + $0x20] sm:$0xff]   ;;  %v7217_v32 = vld [vmem:[%s9325_s7 + $0x28] sm:$0xff]  }
 0x723   :  { %v7662_v3 = vpop.eup %7661  ;;  %7679 = vrcp.f32 %v5043_v30  ;;  %v5045_v51 = vadd.f32 1.0, %v7660_v23  ;;  %v6423_v42 = vmul.f32 -1.442695, %v4899_v13  ;;  %5332 = vmatmul.mubr.bf16.gmra.mrb[156].mxu1 %v5139_v55  ;;  %v7218_v55 = vld [vmem:[%s9325_s7 + $0x70] sm:$0xff]  }
 0x724   :  { %7681 = vrcp.f32 %v5044_v40  ;;  %v5046_v11 = vadd.f32 1.0, %v7662_v3  ;;  %v6424_v37 = vmul.f32 -1.442695, %v4900_v31  ;;  %v7219_v39 = vld [vmem:[%s9325_s7 + $0x30] sm:$0xff]  }
 0x725   :  { %v7664_v4 = vpop.eup %7663  ;;  %7683 = vrcp.f32 %v5045_v51  ;;  %6490 = vmatpush3.bf16.msra.mxu1 %v7209_v33 }
 0x726   :  { %v7666_v18 = vpop.eup %7665  ;;  %7685 = vrcp.f32 %v5046_v11  ;;  %6491 = vmatprep.subr.bf16.mxu1 %v7210_v26 }
 0x727   :  { %v7668_v59 = vpop.eup %7667  ;;  %7687 = vpow2.f32 %v6423_v42 }
 0x728   :  { %v7670_v63 = vpop.eup %7669  ;;  %7689 = vpow2.f32 %v6424_v37  ;;  %v5141_v43 = vpack.c.bf16 %v7668_v59, %v7664_v4 }
 0x729   :  { %v7672_v53 = vpop.eup %7671  ;;  %v5142_v54 = vpack.c.bf16 %v7670_v63, %v7666_v18  ;;  %6492 = vmatpush3.bf16.msra.mxu1 %v7211_v10 }
 0x72a   :  { %v7674_v50 = vpop.eup %7673  ;;  %v5047_v46 = vadd.f32 1.0, %v7672_v53  ;;  %6493 = vmatprep.subr.bf16.mxu1 %v7212_v14 }
 0x72b   :  { %v7676_v19 = vpop.eup %7675  ;;  %v5048_v52 = vadd.f32 1.0, %v7674_v50  ;;  %6441 = vmatprep.mubr.msk.bf16.mxu1 %vm374_vm1, %v5142_v54 }
 0x72c   :  { %v7678_v61 = vpop.eup %7677  ;;  %7691 = vrcp.f32 %v5047_v46  ;;  %v5049_v56 = vadd.f32 1.0, %v7676_v19  ;;  %5340 = vmatmul.mubr.bf16.gmra.mrb[160].mxu1 %v5141_v43 }
 0x72d   :  { %v7680_v62 = vpop.eup %7679  ;;  %7693 = vrcp.f32 %v5048_v52  ;;  %v5050_v25 = vadd.f32 1.0, %v7678_v61  ;;  %6494 = vmatpush3.bf16.msra.mxu1 %v7213_v2 }
 0x72e   :  { %v7682_v5 = vpop.eup %7681  ;;  %7695 = vrcp.f32 %v5049_v56  ;;  %6495 = vmatprep.subr.bf16.mxu1 %v7214_v35 }
 0x72f   :  { %v7684_v16 = vpop.eup %7683  ;;  %7697 = vrcp.f32 %v5050_v25 }
 0x730   :  { %v7686_v17 = vpop.eup %7685  ;;  %v5143_v28 = vpack.c.bf16 %v7684_v16, %v7680_v62 }
 0x731   :  { %v7688_v27 = vpop.eup %7687  ;;  %v5144_v44 = vpack.c.bf16 %v7686_v17, %v7682_v5  ;;  %6496 = vmatpush3.bf16.msra.mxu1 %v7215_v12 }
 0x732   :  { %v7690_v58 = vpop.eup %7689  ;;  %v5051_v36 = vadd.f32 1.0, %v7688_v27  ;;  %6497 = vmatprep.subr.bf16.mxu1 %v7216_v20  ;;  %v7220_v27 = vld [vmem:[%s9325_s7 + $0x78] sm:$0xff]  }
 0x733   :  { %v5052_v38 = vadd.f32 1.0, %v7690_v58  ;;  %6442 = vmatprep.mubr.msk.bf16.mxu1 %vm374_vm1, %v5144_v44  ;;  %v7221_v44 = vld [vmem:[%s9325_s7 + $0x38] sm:$0xff]  }
 0x734   :  { %5348 = vmatmul.mubr.bf16.gmra.mrb[164].mxu1 %v5143_v28 }
 0x735   :  { %7699 = vrcp.f32 %v5052_v38  ;;  %6498 = vmatpush3.bf16.msra.mxu1 %v7217_v32 }
 0x736   :  { %v7692_v6 = vpop.eup %7691  ;;  %7701 = vrcp.f32 %v5051_v36  ;;  %6499 = vmatprep.subr.bf16.mxu1 %v7218_v55 }
 0x737   :  { %v7694_v7 = vpop.eup %7693 }
 0x738   :  { %v7696_v22 = vpop.eup %7695 }
 0x739   :  { %v7698_v48 = vpop.eup %7697  ;;  %v5145_v47 = vpack.c.bf16 %v7696_v22, %v7692_v6  ;;  %6500 = vmatpush3.bf16.msra.mxu1 %v7219_v39 }
 0x73a   :  { %v5146_v24 = vpack.c.bf16 %v7698_v48, %v7694_v7  ;;  %6501 = vmatprep.subr.bf16.mxu1 %v7220_v27 }
 0x73c   :  { %6443 = vmatprep.mubr.msk.bf16.mxu1 %vm374_vm1, %v5146_v24 }
 0x73d   :  { %5356 = vmatmul.mubr.bf16.gmra.mrb[168].mxu1 %v5145_v47 }
 0x73e   :  { %6502 = vmatpush3.bf16.msra.mxu1 %v7221_v44 }
 0x73f   :  { %v7700_v41 = vpop.eup %7699  ;;  %5692 = vmatprep.subr.bf16.mxu1 %v7711_v1 }
 0x740   :  { %v7702_v57 = vpop.eup %7701  ;;  %v5148_v34 = vpack.c.bf16 %v7700_v41, %v7700_v41 }
 0x741   :  { %v5147_v9 = vpack.c.bf16 %v7702_v57, %v7702_v57 }
 0x742   :  { %6444 = vmatprep.mubr.msk.bf16.mxu1 %vm374_vm1, %v5148_v34 }
 0x745   :  { %5364 = vmatmul.mubr.bf16.gmra.mrb[172].mxu1 %v5147_v9 }
 0x7cc   :  { %v5293_v29 = vpop.f32.mrb[136].mxu1 }
 0x7cd   :  { %5372 = vst.msk [vmem:[#allocation4] sm:$0xff] %vm5371_vm10, %v5293_v29  ;;  %v5295_v21 = vpop.f32.mrb[137].mxu1 }
 0x7ce   :  { %v5296_v49 = vpop.f32.mrb[138].mxu1 }
 0x7cf   :  { %5373 = vst.msk [vmem:[#allocation4 + $0x8] sm:$0xff] %vm5371_vm10, %v5296_v49  ;;  %v5298_v8 = vpop.f32.mrb[139].mxu1  ;;  %v7222_v49 = vld [vmem:[%s9325_s7 + $0x80] sm:$0xff]  }
 0x7d4   :  { %v5301_v30 = vpop.f32.mrb[140].mxu1 }
 0x7d5   :  { %5374 = vst.msk [vmem:[#allocation4 + $0x10] sm:$0xff] %vm5371_vm10, %v5301_v30  ;;  %v5303_v13 = vpop.f32.mrb[141].mxu1 }
 0x7d6   :  { %v5304_v45 = vpop.f32.mrb[142].mxu1  ;;  %v7223_v13 = vld [vmem:[%s9325_s7 + $0x88] sm:$0xff]  }
 0x7d7   :  { %5375 = vst.msk [vmem:[#allocation4 + $0x18] sm:$0xff] %vm5371_vm10, %v5304_v45  ;;  %v5306_v23 = vpop.f32.mrb[143].mxu1  ;;  %v7224_v45 = vld [vmem:[%s9325_s7 + $0x90] sm:$0xff]  }
 0x7d8   :  { %v7225_v23 = vld [vmem:[%s9325_s7 + $0x98] sm:$0xff]  }
 0x7dd   :  { %v5309_v40 = vpop.f32.mrb[144].mxu1 }
 0x7de   :  { %v5311_v31 = vpop.f32.mrb[145].mxu1  ;;  %v7226_v40 = vld [vmem:[%s9325_s7 + $0xa0] sm:$0xff]  }
 0x7df   :  { %v5312_v3 = vpop.f32.mrb[146].mxu1  ;;  %v7227_v31 = vld [vmem:[%s9325_s7 + $0xa8] sm:$0xff]  }
 0x7e0   :  { %5377 = vst.msk [vmem:[#allocation4 + $0x28] sm:$0xff] %vm5371_vm10, %v5312_v3  ;;  %v5314_v51 = vpop.f32.mrb[147].mxu1  ;;  %v7228_v3 = vld [vmem:[%s9325_s7 + $0xb0] sm:$0xff]  }
 0x7e1   :  { %v7229_v51 = vld [vmem:[%s9325_s7 + $0xb8] sm:$0xff]  }
 0x7e5   :  { %v5317_v42 = vpop.f32.mrb[148].mxu1 }
 0x7e6   :  { %5378 = vst.msk [vmem:[#allocation4 + $0x30] sm:$0xff] %vm5371_vm10, %v5317_v42  ;;  %v5319_v11 = vpop.f32.mrb[149].mxu1  ;;  %v7230_v42 = vld [vmem:[%s9325_s7 + $0xc0] sm:$0xff]  }
 0x7e7   :  { %v5320_v37 = vpop.f32.mrb[150].mxu1 }
 0x7e8   :  { %5379 = vst.msk [vmem:[#allocation4 + $0x38] sm:$0xff] %vm5371_vm10, %v5320_v37  ;;  %v5322_v4 = vpop.f32.mrb[151].mxu1 }
 0x7e9   :  { %v7716_v4 = vmov 0.0  }
 0x7ee   :  { %v5325_v18 = vpop.f32.mrb[152].mxu1 }
 0x7ef   :  { %5380 = vst.msk [vmem:[#allocation4 + $0x40] sm:$0xff] %vm5371_vm10, %v5325_v18  ;;  %v5327_v59 = vpop.f32.mrb[153].mxu1  ;;  %v7231_v18 = vld [vmem:[%s9326_s9] sm:$0xff]  }
 0x7f0   :  { %v5328_v63 = vpop.f32.mrb[154].mxu1  ;;  %v7232_v59 = vld [vmem:[%s9326_s9 + $0x8] sm:$0xff]  }
 0x7f1   :  { %v5330_v43 = vpop.f32.mrb[155].mxu1  ;;  %v7234_v63 = vld [vmem:[%s9326_s9 + $0x18] sm:$0xff]  }
 0x7f2   :  { %v7235_v43 = vld [vmem:[%s9326_s9 + $0x20] sm:$0xff]  }
 0x7f6   :  { %v5333_v53 = vpop.f32.mrb[156].mxu1 }
 0x7f7   :  { %5382 = vst.msk [vmem:[#allocation4 + $0x50] sm:$0xff] %vm5371_vm10, %v5333_v53  ;;  %v5335_v54 = vpop.f32.mrb[157].mxu1  ;;  %v7236_v53 = vld [vmem:[%s9326_s9 + $0x28] sm:$0xff]  }
 0x7f8   :  { %v5336_v50 = vpop.f32.mrb[158].mxu1  ;;  %v7237_v54 = vld [vmem:[%s9326_s9 + $0x30] sm:$0xff]  }
 0x7f9   :  { %5383 = vst.msk [vmem:[#allocation4 + $0x58] sm:$0xff] %vm5371_vm10, %v5336_v50  ;;  %v5338_v46 = vpop.f32.mrb[159].mxu1  ;;  %v7238_v50 = vld [vmem:[%s9326_s9 + $0x38] ss:$0 sps:$4 sm:$0xff]  }
 0x7fa   :  { %v5811_v46 = vsel %vm3066_vm5, %v7238_v50, 0 }
 0x7ff   :  { %v5341_v19 = vpop.f32.mrb[160].mxu1 }
 0x800   :  { %5384 = vst.msk [vmem:[#allocation4 + $0x60] sm:$0xff] %vm5371_vm10, %v5341_v19  ;;  %v5343_v52 = vpop.f32.mrb[161].mxu1 }
 0x801   :  { %v5344_v61 = vpop.f32.mrb[162].mxu1 }
 0x802   :  { %5385 = vst.msk [vmem:[#allocation4 + $0x68] sm:$0xff] %vm5371_vm10, %v5344_v61  ;;  %v5346_v56 = vpop.f32.mrb[163].mxu1 }
 0x807   :  { %v5349_v62 = vpop.f32.mrb[164].mxu1 }
 0x808   :  { %v5351_v25 = vpop.f32.mrb[165].mxu1 }
 0x809   :  { %v5352_v5 = vpop.f32.mrb[166].mxu1  ;;  %v6445_v25 = vld [vmem:[%s9327_s8] ss:$0 sm:$0xff] }
 0x80a   :  { %5387 = vst.msk [vmem:[#allocation4 + $0x78] sm:$0xff] %vm5371_vm10, %v5352_v5  ;;  %v5354_v16 = vpop.f32.mrb[167].mxu1 }
 0x810   :  { %v5357_v17 = vpop.f32.mrb[168].mxu1 }
 0x811   :  { %5388 = vst.msk [vmem:[#allocation4 + $0x80] sm:$0xff] %vm5371_vm10, %v5357_v17  ;;  %v5359_v28 = vpop.f32.mrb[169].mxu1 }
 0x812   :  { %v5360_v58 = vpop.f32.mrb[170].mxu1 }
 0x813   :  { %5389 = vst.msk [vmem:[#allocation4 + $0x88] sm:$0xff] %vm5371_vm10, %v5360_v58  ;;  %v5362_v36 = vpop.f32.mrb[171].mxu1 }
 0x818   :  { %v5365_v38 = vpop.f32.mrb[172].mxu1 }
 0x819   :  { %5390 = vst.msk [vmem:[#allocation4 + $0x90] sm:$0xff] %vm5371_vm10, %v5365_v38  ;;  %v5367_v6 = vpop.f32.mrb[173].mxu1 }
 0x81a   :  { %v5368_v7 = vpop.f32.mrb[174].mxu1  ;;  %v5396_v22 = vld [vmem:[#allocation4 + $0x2] ss:$20 sm:$0xff]  ;;  %v5398_v48 = vld [vmem:[#allocation4 + $0x3] ss:$20 sm:$0xff] }
 0x81b   :  { %v5369_v47 = vpop.f32.mrb[175].mxu1  ;;  %v5399_v24 = vadd.f32 %v5398_v48, %v5396_v22  ;;  %v5391_v14 = vld [vmem:[#allocation4] ss:$20 sm:$0xff]  ;;  %v5393_v2 = vld [vmem:[#allocation4 + $0x1] ss:$20 sm:$0xff] }
 0x81c   :  { %v5394_v35 = vadd.f32 %v5393_v2, %v5391_v14  ;;  %v5859_v22 = vld [vmem:[%s9328_s11] sm:$0xff]  ;;  %v5860_v48 = vld [vmem:[%s9328_s11 + $0x8] sm:$0xff] }
 0x81d   :  { %5416 = vrot.lane.b32.xlu0 %v5399_v24, %s7712_s24  ;;  %v6576_v47 = vpack.c.bf16 %v5860_v48, %v5859_v22  ;;  %v7718_v24 = vmov 0.0|0.0   ;;  %v5868_v14 = vld [vmem:[%s9328_s11 + $0x48] sm:$0xff] }
 0x820   :  { %v5406_v41 = vld [vmem:[#allocation4 + $0x6] ss:$20 sm:$0xff]  ;;  %v5408_v57 = vld [vmem:[#allocation4 + $0x7] ss:$20 sm:$0xff]  ;;  %v5401_v34 = vld [vmem:[#allocation4 + $0x4] ss:$20 sm:$0xff] }
 0x821   :  { %v5409_v9 = vadd.f32 %v5408_v57, %v5406_v41  ;;  %v5403_v15 = vld [vmem:[#allocation4 + $0x5] ss:$20 sm:$0xff]  ;;  %v5411_v0 = vld [vmem:[#allocation4 + $0x8] ss:$20 sm:$0xff] }
 0x822   :  { %v5404_v60 = vadd.f32 %v5403_v15, %v5401_v34  ;;  %v5413_v33 = vld [vmem:[#allocation4 + $0x9] ss:$20 sm:$0xff] }
 0x823   :  { %5424 = vrot.lane.b32.xlu1 %v5409_v9, %s7713_s25  ;;  %v5414_v26 = vadd.f32 %v5413_v33, %v5411_v0  ;;  %v5861_v41 = vld [vmem:[%s9328_s11 + $0x10] sm:$0xff]  ;;  %v5862_v57 = vld [vmem:[%s9328_s11 + $0x18] sm:$0xff]  ;;  %v5863_v9 = vld [vmem:[%s9328_s11 + $0x20] sm:$0xff] }
 0x824   :  { %5420 = vrot.lane.b32.xlu0 %v5404_v60, %s7714_s1  ;;  %v6579_v34 = vpack.c.bf16 %v5862_v57, %v5861_v41  ;;  %v5864_v15 = vld [vmem:[%s9328_s11 + $0x28] sm:$0xff]  ;;  %v5865_v0 = vld [vmem:[%s9328_s11 + $0x30] sm:$0xff]  ;;  %v5866_v33 = vld [vmem:[%s9328_s11 + $0x38] sm:$0xff] }
 0x825   :  { %v6582_v60 = vpack.c.bf16 %v5864_v15, %v5863_v9 }
 0x827   :  { %5428 = vrot.lane.b32.xlu1 %v5414_v26, %s7715_s26  ;;  %v6585_v26 = vpack.c.bf16 %v5866_v33, %v5865_v0 }
 0x88f   :  { %v5417_v10 = vpop.permute.xlu0 %5416 }
 0x890   :  { %v5431_v32 = vsel %vm5371_vm10, %v5394_v35, %v5417_v10  ;;  %v5869_v35 = vld [vmem:[%s9328_s11 + $0x50] sm:$0xf] }
 0x891   :  { %v5437_v8 = vpack.c.bf16 %v5431_v32, %v5431_v32 }
 0x895   :  { %v5425_v12 = vpop.permute.xlu1 %5424 }
 0x896   :  { %v5421_v20 = vpop.permute.xlu0 %5420 }
 0x897   :  { %v5432_v55 = vsel %vm374_vm1, %v5417_v10, %v5421_v20  ;;  %v5867_v10 = vld [vmem:[%s9328_s11 + $0x40] sm:$0xff] }
 0x898   :  { %v5434_v39 = vsel %vm5433_vm11, %v5432_v55, %v5425_v12  ;;  %v6588_v2 = vpack.c.bf16 %v5868_v14, %v5867_v10 }
 0x899   :  { %v5429_v29 = vpop.permute.xlu1 %5428  ;;  %v5438_v21 = vpack.c.bf16 %v5434_v39, %v5434_v39 }
 0x89a   :  { %v5440_v30 = vpack.c.bf16 %v5429_v29, %v5429_v29  ;;  %v5436_v11 = vsel %vm5435_vm13, %v5425_v12, %v5429_v29  ;;  %v6473_v12 = vld [vmem:[%s9329_s10] ss:$0 sm:$0xff] }
 0x89b   :  { %5684 = vmatprep.mubr.bf16.mxu1 %v5438_v21  ;;  %v5439_v37 = vpack.c.bf16 %v5436_v11, %v5436_v11 }
 0x89c   :  { %5685 = vmatmul.mubr.bf16.vlgmr.msra.gmra.mrb[176].mxu1 %v5437_v8 }
 0x89d   :  { %5693 = vmatpush1.bf16.msra.mxu1 %v7222_v49  ;;  %6471 = vmatprep.mubr.msk.bf16.mxu1 %vm5648_vm12, %v5440_v30 }
 0x89e   :  { %5694 = vmatprep.subr.bf16.mxu1 %v7711_v1 }
 0x8a1   :  { %5695 = vmatpush1.bf16.msra.mxu1 %v7223_v13  ;;  %v6484_v13 = vld [vmem:[%s9330_s12] ss:$0 sm:$0xff] }
 0x8a2   :  { %5696 = vmatprep.subr.bf16.mxu1 %v7711_v1 }
 0x8a5   :  { %5697 = vmatpush1.bf16.msra.mxu1 %v7224_v45 }
 0x8a6   :  { %5698 = vmatprep.subr.bf16.mxu1 %v7711_v1 }
 0x8a9   :  { %5699 = vmatpush1.bf16.msra.mxu1 %v7225_v23 }
 0x8aa   :  { %5700 = vmatprep.subr.bf16.mxu1 %v7711_v1 }
 0x8ad   :  { %5701 = vmatpush1.bf16.msra.mxu1 %v7226_v40 }
 0x8ae   :  { %5702 = vmatprep.subr.bf16.mxu1 %v7711_v1 }
 0x8b1   :  { %5703 = vmatpush1.bf16.msra.mxu1 %v7227_v31 }
 0x8b2   :  { %5704 = vmatprep.subr.bf16.mxu1 %v7711_v1 }
 0x8b5   :  { %5705 = vmatpush1.bf16.msra.mxu1 %v7228_v3 }
 0x8b6   :  { %5706 = vmatprep.subr.bf16.mxu1 %v7711_v1 }
 0x8b9   :  { %5707 = vmatpush1.bf16.msra.mxu1 %v7229_v51 }
 0x8ba   :  { %5708 = vmatprep.subr.bf16.mxu1 %v7711_v1  ;;  %v7233_v1 = vld [vmem:[%s9326_s9 + $0x10] sm:$0xff]  }
 0x8bd   :  { %5709 = vmatpush1.bf16.msra.mxu1 %v7230_v42 }
 0x8be   :  { %6530 = vmatprep.subr.bf16.mxu1 %v7716_v4 }
 0x8c0   :  { %5725 = vmatmul.mubr.bf16.vlgmr.msra.gmra.mrb[180].mxu1 %v5439_v37 }
 0x8c1   :  { %6531 = vmatpush3.bf16.msra.mxu1 %v7231_v18  ;;  %6546 = vmatprep.mubr.msk.bf16.mxu1 %vm7717_vm14, %v7716_v4 }
 0x8c2   :  { %6532 = vmatprep.subr.bf16.mxu1 %v7716_v4 }
 0x8c5   :  { %6533 = vmatpush3.bf16.msra.mxu1 %v7232_v59 }
 0x8c6   :  { %6534 = vmatprep.subr.bf16.mxu1 %v7716_v4 }
 0x8c9   :  { %6535 = vmatpush3.bf16.msra.mxu1 %v7233_v1 }
 0x8ca   :  { %6536 = vmatprep.subr.bf16.mxu1 %v7716_v4 }
 0x8cd   :  { %6537 = vmatpush3.bf16.msra.mxu1 %v7234_v63 }
 0x8ce   :  { %6538 = vmatprep.subr.bf16.mxu1 %v7716_v4 }
 0x8d1   :  { %6539 = vmatpush3.bf16.msra.mxu1 %v7235_v43 }
 0x8d2   :  { %6540 = vmatprep.subr.bf16.mxu1 %v7716_v4 }
 0x8d5   :  { %6541 = vmatpush3.bf16.msra.mxu1 %v7236_v53 }
 0x8d6   :  { %6542 = vmatprep.subr.bf16.mxu1 %v7716_v4 }
 0x8d9   :  { %6543 = vmatpush3.bf16.msra.mxu1 %v7237_v54 }
 0x8da   :  { %6544 = vmatprep.subr.bf16.mxu1 %v7716_v4 }
 0x8dd   :  { %6545 = vmatpush3.bf16.msra.mxu1 %v5811_v46 }
 0x8de   :  { %6575 = vmatprep.subr.bf16.mxu1 %v7718_v24 }
 0x96f   :  { %v6503_v19 = vpop.f32.mrb[176].mxu1 }
 0x970   :  { %v6504_v52 = vpop.f32.mrb[177].mxu1 }
 0x971   :  { %v6505_v61 = vadd.f32 %v6504_v52, %v6503_v19  ;;  %v6506_v56 = vpop.f32.mrb[178].mxu1 }
 0x972   :  { %v6507_v62 = vpop.f32.mrb[179].mxu1 }
 0x973   :  { %v5687_v5 = vadd.f32 %v6505_v61, %v6445_v25 }
 0x993   :  { %v5726_v16 = vpop.f32.mrb[180].mxu1 }
 0x994   :  { %v5727_v17 = vadd.f32 %v5726_v16, %v5687_v5  ;;  %v5728_v28 = vpop.f32.mrb[181].mxu1 }
 0x995   :  { %v5729_v27 = vpop.f32.mrb[182].mxu1 }
 0x996   :  { %v6472_v44 = vmul.f32 -1.442695, %v5727_v17  ;;  %v5730_v58 = vpop.f32.mrb[183].mxu1 }
 0x998   :  { %7703 = vpow2.f32 %v6472_v44 }
 0x9a2   :  { %v7704_v36 = vpop.eup %7703 }
 0x9a3   :  { %v5735_v38 = vadd.f32 1.0, %v7704_v36 }
 0x9a5   :  { %7705 = vrcp.f32 %v5735_v38 }
 0x9af   :  { %v7706_v6 = vpop.eup %7705 }
 0x9b0   :  { %v5738_v7 = vpack.c.bf16 %v7706_v6, %v7706_v6 }
 0x9b2   :  { %6547 = vmatmul.mubr.msk.bf16.vlgmr.msra.gmra.mrb[184].mxu1 %vm5806_vm15, %v5738_v7 }
 0x9b3   :  { %6572 = vmatprep.mubr.msk.f32.mxu1 %vm7717_vm14, %v7716_v4  ;;  %6577 = vmatpush3.bf16.msra.mxu1 %v6576_v47 }
 0x9b4   :  { %6578 = vmatprep.subr.bf16.mxu1 %v7718_v24 }
 0x9b7   :  { %6580 = vmatpush3.bf16.msra.mxu1 %v6579_v34 }
 0x9b8   :  { %6581 = vmatprep.subr.bf16.mxu1 %v7718_v24 }
 0x9bb   :  { %6583 = vmatpush3.bf16.msra.mxu1 %v6582_v60 }
 0x9bc   :  { %6584 = vmatprep.subr.bf16.mxu1 %v7718_v24 }
 0x9bf   :  { %6586 = vmatpush3.bf16.msra.mxu1 %v6585_v26 }
 0x9c0   :  { %6587 = vmatprep.subr.bf16.mxu1 %v7718_v24 }
 0x9c3   :  { %6589 = vmatpush3.bf16.msra.mxu1 %v6588_v2 }
 0x9c4   :  { %6570 = vmatprep.subr.mxu1 %v7716_v4 }
 0x9c7   :  { %6571 = vmatpush3.msk.msra.mxu1 %vm3066_vm5, %v5869_v35 }
 0xa85   :  { %v5847_v20 = vpop.f32.mrb[184].mxu1 }
 0xa86   :  { %v5848_v32 = vadd.f32 %v6473_v12, %v5847_v20  ;;  %v6548_v55 = vpop.f32.mrb[185].mxu1 }
 0xa87   :  { %v5850_v39 = vpop.f32.mrb[186].mxu1 }
 0xa88   :  { %v6483_v29 = vmul.f32 -1.442695, %v5848_v32  ;;  %v6549_v21 = vpop.f32.mrb[187].mxu1 }
 0xa8a   :  { %7707 = vpow2.f32 %v6483_v29 }
 0xa94   :  { %v7708_v49 = vpop.eup %7707 }
 0xa95   :  { %v5856_v8 = vadd.f32 1.0, %v7708_v49 }
 0xa97   :  { %7709 = vrcp.f32 %v5856_v8 }
 0xaa1   :  { %v7710_v30 = vpop.eup %7709 }
 0xaa2   :  { %6573 = vmatmul.mubr.msk.f32.vlgmr.msra.gmra.mrb[188].mxu1 %vm3262_vm8, %v7710_v30 }
 0xb75   :  { %v5949_v45 = vpop.f32.mrb[188].mxu1 }
 0xb76   :  { %v5950_v23 = vadd.f32 %v6484_v13, %v5949_v45  ;;  %v6574_v40 = vpop.f32.mrb[189].mxu1 }
 0xb78   :  { %5954 = vst.msk [vmem:[%s9331_s13] sm:$0xff] %vm5953_vm0, %v5950_v23 }

</bundles_post_ra>
